<compile_context>
chip_gen: v5e
topology: v5e:2x2
jax: 0.10.0
libtpu: 0.0.40
codegen_flags: <defaults>
</compile_context>

<pallas_src>
import jax
import jax.numpy as jnp
from jax import lax
from jax.experimental import pallas as pl
from jax.experimental.pallas import tpu as pltpu

LANES = 128
NUM_CLASSES = 4
NUM_STATS = 5                       # inter_soft, sum_soft, sum_tgt, inter_hard, sum_hard
NUM_ACC = NUM_STATS * NUM_CLASSES   # 20 (8,128) slabs per accumulator block
CHUNK_MAX = 256                     # rows per inner chunk (MXU contraction length)
NCHUNK_MAX = 4                      # chunks per grid step -> <= 1024 rows / step
EPS = 1e-5


def _make_dice_stats_kernel(*, R, TR, CHUNK, NCHUNK, tiles_per_split,
                            need_row_mask, has_lane_pad, use_mxu):
    """Per-(batch, split, row-tile) statistics kernel.

    acc slab layout (each slab is an (8,128) lane-wise partial; the final
    reduction to scalars happens outside the kernel):
        slab  0+c : sum(output_c * (target == c))       soft intersection
        slab  4+c : sum(output_c)                       soft denominator
        slab  8+c : sum(target == c)                    target count
        slab 12+c : sum((argmax == c) & (target == c))  hard intersection
        slab 16+c : sum(argmax == c)                    prediction count
    """

    def kernel(out_ref, tgt_ref, acc_ref):
        # out_ref: (1, C, TR, LANES)       native float dtype
        # tgt_ref: (1, TR, LANES)          native int dtype
        # acc_ref: (1, NUM_ACC, 8, LANES)  f32, resident across the row-tile axis
        s_id = pl.program_id(1)
        t_id = pl.program_id(2)

        @pl.when(t_id == 0)
        def _():
            acc_ref[...] = jnp.zeros_like(acc_ref)

        tile = s_id * tiles_per_split + t_id          # logical row-tile index
        row_base = tile * TR                          # first logical sublane row

        if use_mxu:
            # Hoisted loop invariant (JAX does not CSE broadcasts inside loops).
            # Single non-zero row => MXU result has the column sums in row 0 and
            # zeros in rows 1..7, so the full-slab accumulation stays exact.
            mxu_lhs = (lax.broadcasted_iota(jnp.int32, (8, CHUNK), 0) == 0
                       ).astype(jnp.float32)

        def chunk_body(ci, carry):
            if NCHUNK == 1:
                tgt = tgt_ref[0]
                oc_raw = [out_ref[0, c] for c in range(NUM_CLASSES)]
            else:
                r0 = pl.multiple_of(ci * CHUNK, CHUNK)
                tgt = tgt_ref[0, pl.ds(r0, CHUNK)]
                oc_raw = [out_ref[0, c, pl.ds(r0, CHUNK)] for c in range(NUM_CLASSES)]
            tgt = tgt.astype(jnp.int32)

            # validity mask only materializes for awkward shapes (static choice)
            valid = None
            if need_row_mask:
                rows = (lax.broadcasted_iota(jnp.int32, (CHUNK, LANES), 0)
                        + row_base + ci * CHUNK)
                valid = rows < R
            if has_lane_pad:
                ok = tgt >= 0
                valid = ok if valid is None else jnp.logical_and(valid, ok)

            if valid is not None:
                tgt = jnp.where(valid, tgt, -1)
            tgt = jnp.where(tgt == 4, 3, tgt)            # target[target == 4] = 3

            # each class tile is loaded & masked exactly once, reused below
            ocs = []
            for c in range(NUM_CLASSES):
                oc = oc_raw[c].astype(jnp.float32)
                if valid is not None:
                    # where (not *mask): OOB-tail garbage / NaN cannot leak in
                    oc = jnp.where(valid, oc, 0.0)
                ocs.append(oc)

            # per-pixel argmax over classes; strict '>' -> first max wins (torch.max)
            best = ocs[0]
            labels = jnp.zeros(best.shape, jnp.int32)
            for c in range(1, NUM_CLASSES):
                hit = ocs[c] > best
                labels = jnp.where(hit, c, labels)
                best = jnp.where(hit, ocs[c], best)
            if valid is not None:
                labels = jnp.where(valid, labels, -1)    # exclude padding from hard dice

            for c in range(NUM_CLASSES):
                oc = ocs[c]
                tm = tgt == c                            # target one-hot (bool)
                lm = labels == c                         # argmax one-hot (bool)
                io_map = jnp.where(tm, oc, 0.0)          # soft intersection map
                tm_f = tm.astype(jnp.float32)            # exactly 0 / 1
                lm_f = lm.astype(jnp.float32)
                il_f = jnp.where(tm, lm_f, 0.0)

                # probability-valued sums: VPU in f32 (precision-safe), row 0 of slab
                acc_ref[0, 0 * NUM_CLASSES + c, 0:1] += jnp.sum(
                    io_map, axis=0, keepdims=True)
                acc_ref[0, 1 * NUM_CLASSES + c, 0:1] += jnp.sum(
                    oc, axis=0, keepdims=True)

                if use_mxu:
                    # 0/1-valued sums: idle MXU does the sublane reduction (exact)
                    acc_ref[0, 2 * NUM_CLASSES + c] += jnp.dot(
                        mxu_lhs, tm_f, preferred_element_type=jnp.float32)
                    acc_ref[0, 3 * NUM_CLASSES + c] += jnp.dot(
                        mxu_lhs, il_f, preferred_element_type=jnp.float32)
                    acc_ref[0, 4 * NUM_CLASSES + c] += jnp.dot(
                        mxu_lhs, lm_f, preferred_element_type=jnp.float32)
                else:
                    # tiny-image fallback (CHUNK % 8 != 0): plain VPU reductions
                    acc_ref[0, 2 * NUM_CLASSES + c, 0:1] += jnp.sum(
                        tm_f, axis=0, keepdims=True)
                    acc_ref[0, 3 * NUM_CLASSES + c, 0:1] += jnp.sum(
                        il_f, axis=0, keepdims=True)
                    acc_ref[0, 4 * NUM_CLASSES + c, 0:1] += jnp.sum(
                        lm_f, axis=0, keepdims=True)
            return carry

        if NCHUNK == 1:
            chunk_body(0, None)
        else:
            lax.fori_loop(0, NCHUNK, chunk_body, None)

    return kernel


def softmax_dice(output, target, eps=EPS):
    """Forward pass of the PyTorch `softmax_dice` module.

    Returns (loss0 + loss1 + loss2 + loss3, D0, D1, D2, D3)."""
    B, C, H, W = output.shape
    assert C == NUM_CLASSES
    HW = H * W

    out = output.reshape(B, C, HW)            # free views; keep native dtypes
    tgt = target.reshape(B, HW)

    has_lane_pad = (HW % LANES) != 0
    if has_lane_pad:
        # TODO(synk): rare case (HW not a multiple of 128); could be handled by an
        # in-kernel lane mask over the unpadded arrays to avoid this HBM copy.
        pad = LANES - HW % LANES
        out = jnp.pad(out, ((0, 0), (0, 0), (0, pad)))
        tgt = jnp.pad(tgt.astype(jnp.int32), ((0, 0), (0, pad)), constant_values=-1)
    R = out.shape[-1] // LANES                # sublane rows of 128 lanes

    if R <= CHUNK_MAX:
        CHUNK, NCHUNK = R, 1                  # whole (small) image in one chunk
    else:
        CHUNK = CHUNK_MAX
        NCHUNK = min(NCHUNK_MAX, R // CHUNK)
    TR = CHUNK * NCHUNK                       # sublane rows per grid step (<= R)
    num_tiles = pl.cdiv(R, TR)
    use_mxu = (CHUNK % 8) == 0

    # v7x megacore: if B alone cannot balance the two TensorCores (odd / single
    # batch), also shard the row-tile axis.  Neutral on single-TC v5e / v6e.
    NSPLIT = 2 if (B % 2 == 1 and num_tiles >= 2) else 1
    tiles_per_split = pl.cdiv(num_tiles, NSPLIT)
    need_row_mask = (NSPLIT * tiles_per_split * TR) > R

    out4 = out.reshape(B, C, R, LANES)        # free views
    tgt3 = tgt.reshape(B, R, LANES)

    kernel = _make_dice_stats_kernel(
        R=R, TR=TR, CHUNK=CHUNK, NCHUNK=NCHUNK, tiles_per_split=tiles_per_split,
        need_row_mask=need_row_mask, has_lane_pad=has_lane_pad, use_mxu=use_mxu)

    last_tile = num_tiles - 1

    def out_map(b, s, t):
        return (b, 0, jnp.minimum(s * tiles_per_split + t, last_tile), 0)

    def tgt_map(b, s, t):
        return (b, jnp.minimum(s * tiles_per_split + t, last_tile), 0)

    def acc_map(b, s, t):
        return (b * NSPLIT + s, 0, 0, 0)

    acc = pl.pallas_call(
        kernel,
        out_shape=jax.ShapeDtypeStruct((B * NSPLIT, NUM_ACC, 8, LANES), jnp.float32),
        grid_spec=pltpu.PrefetchScalarGridSpec(
            num_scalar_prefetch=0,
            grid=(B, NSPLIT, tiles_per_split),
            in_specs=[
                pl.BlockSpec((1, C, TR, LANES), out_map),
                pl.BlockSpec((1, TR, LANES), tgt_map),
            ],
            out_specs=pl.BlockSpec((1, NUM_ACC, 8, LANES), acc_map),
        ),
        compiler_params=pltpu.CompilerParams(
            dimension_semantics=("parallel", "parallel", "arbitrary")),
    )(out4, tgt3)

    sums = jnp.sum(acc, axis=(0, 2, 3))       # (20,) lane/slab-reduced statistics
    inter_o, sum_o, sum_t, inter_l, sum_l = (
        sums[0:4], sums[4:8], sums[8:12], sums[12:16], sums[16:20])

    def dice_loss(inter, a, b):
        return 1.0 - 2.0 * inter / (a + b + eps)

    loss = dice_loss(inter_o, sum_o, sum_t)        # per-class soft dice losses
    D = 1.0 - dice_loss(inter_l, sum_l, sum_t)     # per-class hard dice scores

    total = loss[1] + loss[2] + loss[3] + loss[0]
    return total, D[0], D[1], D[2], D[3]


def _reference(output, target, eps=EPS):
    """Pure-JAX reference mirroring the PyTorch module."""
    output = output.astype(jnp.float32)
    target = jnp.where(target == 4, 3, target)

    def dice(o, tm):
        num = 2.0 * jnp.sum(o * tm)
        den = jnp.sum(o) + jnp.sum(tm) + eps
        return 1.0 - num / den

    labels = jnp.argmax(output, axis=1)
    losses = [dice(output[:, c], (target == c).astype(jnp.float32)) for c in range(4)]
    Ds = [1.0 - dice((labels == c).astype(jnp.float32),
                     (target == c).astype(jnp.float32)) for c in range(4)]
    return (losses[1] + losses[2] + losses[3] + losses[0], Ds[0], Ds[1], Ds[2], Ds[3])


def _check(B, H, W, key):
    k_out, k_tgt = jax.random.split(key)
    logits = jax.random.normal(k_out, (B, NUM_CLASSES, H, W), dtype=jnp.float32)
    output = jax.nn.softmax(logits, axis=1)          # softmax-like probabilities
    # labels in {0..4}; value 4 exercises the target[target == 4] = 3 remap
    target = jax.random.randint(k_tgt, (B, H, W), 0, 5, dtype=jnp.int32)

    got = jax.block_until_ready(jax.jit(softmax_dice)(output, target))
    want = _reference(output, target)
    for g, w in zip(got, want):
        assert jnp.allclose(g, w, rtol=1e-4, atol=1e-5), (g, w)


if __name__ == "__main__":
    key = jax.random.PRNGKey(0)
    k1, k2, k3 = jax.random.split(key, 3)
    # main path: MXU reductions, 2-chunk inner loop, row-tail mask, t-axis accumulation
    _check(2, 320, 256, k1)
    # odd batch: row-tile axis split so both (v7x) TensorCores get work
    _check(1, 320, 256, k2)
    # tiny image: single-tile VPU fallback path
    _check(2, 16, 16, k3)
    print("KERNEL_OK")
</pallas_src>

<mosaic_0001>
module attributes {stable_mosaic.version = 11 : i64} {
  func.func @kernel(%arg0: i32, %arg1: i32, %arg2: i32, %arg3: memref<1x4x512x128xf32, #tpu.memory_space<vmem>>, %arg4: memref<1x512x128xi32, #tpu.memory_space<vmem>>, %arg5: memref<1x20x8x128xf32, #tpu.memory_space<vmem>>) attributes {dimension_semantics = [#tpu.dimension_semantics<parallel>, #tpu.dimension_semantics<parallel>, #tpu.dimension_semantics<arbitrary>], iteration_bounds = array<i64: 2, 1, 2>, scalar_prefetch = 0 : i64, scratch_operands = 0 : i64, tpu.core_type = #tpu.core_type<tc>, window_params = [{transform_indices = @transform_0, window_bounds = array<i64: 1, 4, 512, 128>}, {transform_indices = @transform_1, window_bounds = array<i64: 1, 512, 128>}, {transform_indices = @transform_2, window_bounds = array<i64: 1, 20, 8, 128>}]} {
    %c0_i32 = arith.constant 0 : i32
    %0 = arith.cmpi eq, %arg2, %c0_i32 : i32
    %1 = arith.extui %0 : i1 to i32
    %c0_i32_0 = arith.constant 0 : i32
    %2 = arith.cmpi ne, %1, %c0_i32_0 : i32
    scf.if %2 {
      %cst = arith.constant 0.000000e+00 : f32
      %12 = vector.broadcast %cst : f32 to vector<1x20x8x128xf32>
      %c0 = arith.constant 0 : index
      %c0_5 = arith.constant 0 : index
      %c0_6 = arith.constant 0 : index
      %c0_7 = arith.constant 0 : index
      %13 = vector.load %arg5[%c0, %c0_5, %c0_6, %c0_7] : memref<1x20x8x128xf32, #tpu.memory_space<vmem>>, vector<1x20x8x128xf32>
      tpu.vector_store %arg5[%c0, %c0_5, %c0_6, %c0_7], %12 {strides = array<i32>} : memref<1x20x8x128xf32, #tpu.memory_space<vmem>>, vector<1x20x8x128xf32>,
    } else {
    }
    %c2_i32 = arith.constant 2 : i32
    %3 = arith.muli %arg1, %c2_i32 : i32
    %4 = arith.addi %3, %arg2 : i32
    %c512_i32 = arith.constant 512 : i32
    %5 = arith.muli %4, %c512_i32 : i32
    %6 = tpu.iota {dimensions = array<i32: 0>} : vector<8x256xi32>
    %c0_i32_1 = arith.constant 0 : i32
    %7 = vector.broadcast %c0_i32_1 : i32 to vector<8x256xi32>
    %8 = arith.cmpi eq, %6, %7 : vector<8x256xi32>
    %9 = arith.extui %8 : vector<8x256xi1> to vector<8x256xi32>
    %10 = arith.sitofp %9 : vector<8x256xi32> to vector<8x256xf32>
    %c0_i32_2 = arith.constant 0 : i32
    %c2_i32_3 = arith.constant 2 : i32
    %11 = arith.addi %c0_i32_2, %c2_i32_3 : i32
    %c1_i32 = arith.constant 1 : i32
    scf.for %arg6 = %c0_i32_2 to %11 step %c1_i32  : i32 {
      %c256_i32 = arith.constant 256 : i32
      %12 = arith.muli %arg6, %c256_i32 : i32
      %13 = tpu.assume_multiple %12, 256 : i32
      %c0 = arith.constant 0 : index
      %14 = arith.index_cast %13 : i32 to index
      %c0_5 = arith.constant 0 : index
      %15 = vector.load %arg4[%c0, %14, %c0_5] : memref<1x512x128xi32, #tpu.memory_space<vmem>>, vector<1x256x128xi32>
      %16 = vector.shape_cast %15 : vector<1x256x128xi32> to vector<256x128xi32>
      %c0_6 = arith.constant 0 : index
      %c0_7 = arith.constant 0 : index
      %17 = arith.index_cast %13 : i32 to index
      %c0_8 = arith.constant 0 : index
      %18 = vector.load %arg3[%c0_6, %c0_7, %17, %c0_8] : memref<1x4x512x128xf32, #tpu.memory_space<vmem>>, vector<1x1x256x128xf32>
      %19 = vector.shape_cast %18 : vector<1x1x256x128xf32> to vector<256x128xf32>
      %c0_9 = arith.constant 0 : index
      %c1 = arith.constant 1 : index
      %20 = arith.index_cast %13 : i32 to index
      %c0_10 = arith.constant 0 : index
      %21 = vector.load %arg3[%c0_9, %c1, %20, %c0_10] : memref<1x4x512x128xf32, #tpu.memory_space<vmem>>, vector<1x1x256x128xf32>
      %22 = vector.shape_cast %21 : vector<1x1x256x128xf32> to vector<256x128xf32>
      %c0_11 = arith.constant 0 : index
      %c2 = arith.constant 2 : index
      %23 = arith.index_cast %13 : i32 to index
      %c0_12 = arith.constant 0 : index
      %24 = vector.load %arg3[%c0_11, %c2, %23, %c0_12] : memref<1x4x512x128xf32, #tpu.memory_space<vmem>>, vector<1x1x256x128xf32>
      %25 = vector.shape_cast %24 : vector<1x1x256x128xf32> to vector<256x128xf32>
      %c0_13 = arith.constant 0 : index
      %c3 = arith.constant 3 : index
      %26 = arith.index_cast %13 : i32 to index
      %c0_14 = arith.constant 0 : index
      %27 = vector.load %arg3[%c0_13, %c3, %26, %c0_14] : memref<1x4x512x128xf32, #tpu.memory_space<vmem>>, vector<1x1x256x128xf32>
      %28 = vector.shape_cast %27 : vector<1x1x256x128xf32> to vector<256x128xf32>
      %29 = tpu.iota {dimensions = array<i32: 0>} : vector<256x128xi32>
      %30 = vector.broadcast %5 : i32 to vector<256x128xi32>
      %31 = arith.addi %29, %30 : vector<256x128xi32>
      %c256_i32_15 = arith.constant 256 : i32
      %32 = arith.muli %arg6, %c256_i32_15 : i32
      %33 = vector.broadcast %32 : i32 to vector<256x128xi32>
      %34 = arith.addi %31, %33 : vector<256x128xi32>
      %c640_i32 = arith.constant 640 : i32
      %35 = vector.broadcast %c640_i32 : i32 to vector<256x128xi32>
      %36 = arith.cmpi slt, %34, %35 : vector<256x128xi32>
      %c-1_i32 = arith.constant -1 : i32
      %37 = vector.broadcast %c-1_i32 : i32 to vector<256x128xi32>
      %38 = arith.select %36, %16, %37 : vector<256x128xi1>, vector<256x128xi32>
      %c4_i32 = arith.constant 4 : i32
      %39 = vector.broadcast %c4_i32 : i32 to vector<256x128xi32>
      %40 = arith.cmpi eq, %38, %39 : vector<256x128xi32>
      %c3_i32 = arith.constant 3 : i32
      %41 = vector.broadcast %c3_i32 : i32 to vector<256x128xi32>
      %42 = arith.select %40, %41, %38 : vector<256x128xi1>, vector<256x128xi32>
      %cst = arith.constant 0.000000e+00 : f32
      %43 = vector.broadcast %cst : f32 to vector<256x128xf32>
      %44 = arith.select %36, %19, %43 : vector<256x128xi1>, vector<256x128xf32>
      %cst_16 = arith.constant 0.000000e+00 : f32
      %45 = vector.broadcast %cst_16 : f32 to vector<256x128xf32>
      %46 = arith.select %36, %22, %45 : vector<256x128xi1>, vector<256x128xf32>
      %cst_17 = arith.constant 0.000000e+00 : f32
      %47 = vector.broadcast %cst_17 : f32 to vector<256x128xf32>
      %48 = arith.select %36, %25, %47 : vector<256x128xi1>, vector<256x128xf32>
      %cst_18 = arith.constant 0.000000e+00 : f32
      %49 = vector.broadcast %cst_18 : f32 to vector<256x128xf32>
      %50 = arith.select %36, %28, %49 : vector<256x128xi1>, vector<256x128xf32>
      %c0_i32_19 = arith.constant 0 : i32
      %51 = vector.broadcast %c0_i32_19 : i32 to vector<256x128xi32>
      %52 = arith.cmpf ogt, %46, %44 : vector<256x128xf32>
      %c1_i32_20 = arith.constant 1 : i32
      %53 = vector.broadcast %c1_i32_20 : i32 to vector<256x128xi32>
      %54 = arith.select %52, %53, %51 : vector<256x128xi1>, vector<256x128xi32>
      %55 = arith.select %52, %46, %44 : vector<256x128xi1>, vector<256x128xf32>
      %56 = arith.cmpf ogt, %48, %55 : vector<256x128xf32>
      %c2_i32_21 = arith.constant 2 : i32
      %57 = vector.broadcast %c2_i32_21 : i32 to vector<256x128xi32>
      %58 = arith.select %56, %57, %54 : vector<256x128xi1>, vector<256x128xi32>
      %59 = arith.select %56, %48, %55 : vector<256x128xi1>, vector<256x128xf32>
      %60 = arith.cmpf ogt, %50, %59 : vector<256x128xf32>
      %c3_i32_22 = arith.constant 3 : i32
      %61 = vector.broadcast %c3_i32_22 : i32 to vector<256x128xi32>
      %62 = arith.select %60, %61, %58 : vector<256x128xi1>, vector<256x128xi32>
      %c-1_i32_23 = arith.constant -1 : i32
      %63 = vector.broadcast %c-1_i32_23 : i32 to vector<256x128xi32>
      %64 = arith.select %36, %62, %63 : vector<256x128xi1>, vector<256x128xi32>
      %c0_i32_24 = arith.constant 0 : i32
      %65 = vector.broadcast %c0_i32_24 : i32 to vector<256x128xi32>
      %66 = arith.cmpi eq, %42, %65 : vector<256x128xi32>
      %c0_i32_25 = arith.constant 0 : i32
      %67 = vector.broadcast %c0_i32_25 : i32 to vector<256x128xi32>
      %68 = arith.cmpi eq, %64, %67 : vector<256x128xi32>
      %cst_26 = arith.constant 0.000000e+00 : f32
      %69 = vector.broadcast %cst_26 : f32 to vector<256x128xf32>
      %70 = arith.select %66, %44, %69 : vector<256x128xi1>, vector<256x128xf32>
      %71 = arith.extui %66 : vector<256x128xi1> to vector<256x128xi32>
      %72 = arith.sitofp %71 : vector<256x128xi32> to vector<256x128xf32>
      %73 = arith.extui %68 : vector<256x128xi1> to vector<256x128xi32>
      %74 = arith.sitofp %73 : vector<256x128xi32> to vector<256x128xf32>
      %cst_27 = arith.constant 0.000000e+00 : f32
      %75 = vector.broadcast %cst_27 : f32 to vector<256x128xf32>
      %76 = arith.select %66, %74, %75 : vector<256x128xi1>, vector<256x128xf32>
      %c0_28 = arith.constant 0 : index
      %c0_29 = arith.constant 0 : index
      %c0_30 = arith.constant 0 : index
      %c0_31 = arith.constant 0 : index
      %77 = vector.load %arg5[%c0_28, %c0_29, %c0_30, %c0_31] : memref<1x20x8x128xf32, #tpu.memory_space<vmem>>, vector<1x1x1x128xf32>
      %78 = vector.shape_cast %77 : vector<1x1x1x128xf32> to vector<1x128xf32>
      %cst_32 = arith.constant dense<0.000000e+00> : vector<128xf32>
      %79 = vector.multi_reduction <add>, %70, %cst_32 [0] : vector<256x128xf32> to vector<128xf32>
      %80 = vector.shape_cast %79 : vector<128xf32> to vector<1x128xf32>
      %81 = arith.addf %78, %80 : vector<1x128xf32>
      %c0_33 = arith.constant 0 : index
      %c0_34 = arith.constant 0 : index
      %c0_35 = arith.constant 0 : index
      %c0_36 = arith.constant 0 : index
      %82 = vector.load %arg5[%c0_33, %c0_34, %c0_35, %c0_36] : memref<1x20x8x128xf32, #tpu.memory_space<vmem>>, vector<1x1x1x128xf32>
      %83 = vector.shape_cast %82 : vector<1x1x1x128xf32> to vector<1x128xf32>
      %84 = vector.shape_cast %81 : vector<1x128xf32> to vector<1x1x1x128xf32>
      tpu.vector_store %arg5[%c0_33, %c0_34, %c0_35, %c0_36], %84 {strides = array<i32>} : memref<1x20x8x128xf32, #tpu.memory_space<vmem>>, vector<1x1x1x128xf32>,
      %c0_37 = arith.constant 0 : index
      %c4 = arith.constant 4 : index
      %c0_38 = arith.constant 0 : index
      %c0_39 = arith.constant 0 : index
      %85 = vector.load %arg5[%c0_37, %c4, %c0_38, %c0_39] : memref<1x20x8x128xf32, #tpu.memory_space<vmem>>, vector<1x1x1x128xf32>
      %86 = vector.shape_cast %85 : vector<1x1x1x128xf32> to vector<1x128xf32>
      %cst_40 = arith.constant dense<0.000000e+00> : vector<128xf32>
      %87 = vector.multi_reduction <add>, %44, %cst_40 [0] : vector<256x128xf32> to vector<128xf32>
      %88 = vector.shape_cast %87 : vector<128xf32> to vector<1x128xf32>
      %89 = arith.addf %86, %88 : vector<1x128xf32>
      %c0_41 = arith.constant 0 : index
      %c4_42 = arith.constant 4 : index
      %c0_43 = arith.constant 0 : index
      %c0_44 = arith.constant 0 : index
      %90 = vector.load %arg5[%c0_41, %c4_42, %c0_43, %c0_44] : memref<1x20x8x128xf32, #tpu.memory_space<vmem>>, vector<1x1x1x128xf32>
      %91 = vector.shape_cast %90 : vector<1x1x1x128xf32> to vector<1x128xf32>
      %92 = vector.shape_cast %89 : vector<1x128xf32> to vector<1x1x1x128xf32>
      tpu.vector_store %arg5[%c0_41, %c4_42, %c0_43, %c0_44], %92 {strides = array<i32>} : memref<1x20x8x128xf32, #tpu.memory_space<vmem>>, vector<1x1x1x128xf32>,
      %c0_45 = arith.constant 0 : index
      %c8 = arith.constant 8 : index
      %c0_46 = arith.constant 0 : index
      %c0_47 = arith.constant 0 : index
      %93 = vector.load %arg5[%c0_45, %c8, %c0_46, %c0_47] : memref<1x20x8x128xf32, #tpu.memory_space<vmem>>, vector<1x1x8x128xf32>
      %94 = vector.shape_cast %93 : vector<1x1x8x128xf32> to vector<8x128xf32>
      %cst_48 = arith.constant dense<0.000000e+00> : vector<8x128xf32>
      %95 = tpu.matmul %10, %72, %cst_48 {dimension_numbers = #tpu.dot_dimension_numbers<[1], [0], [0], [1], [0, 0, 1, 1], [], []>} : vector<8x256xf32>, vector<256x128xf32>, vector<8x128xf32> -> vector<8x128xf32>
      %96 = arith.addf %94, %95 : vector<8x128xf32>
      %c0_49 = arith.constant 0 : index
      %c8_50 = arith.constant 8 : index
      %c0_51 = arith.constant 0 : index
      %c0_52 = arith.constant 0 : index
      %97 = vector.load %arg5[%c0_49, %c8_50, %c0_51, %c0_52] : memref<1x20x8x128xf32, #tpu.memory_space<vmem>>, vector<1x1x8x128xf32>
      %98 = vector.shape_cast %97 : vector<1x1x8x128xf32> to vector<8x128xf32>
      %99 = vector.shape_cast %96 : vector<8x128xf32> to vector<1x1x8x128xf32>
      tpu.vector_store %arg5[%c0_49, %c8_50, %c0_51, %c0_52], %99 {strides = array<i32>} : memref<1x20x8x128xf32, #tpu.memory_space<vmem>>, vector<1x1x8x128xf32>,
      %c0_53 = arith.constant 0 : index
      %c12 = arith.constant 12 : index
      %c0_54 = arith.constant 0 : index
      %c0_55 = arith.constant 0 : index
      %100 = vector.load %arg5[%c0_53, %c12, %c0_54, %c0_55] : memref<1x20x8x128xf32, #tpu.memory_space<vmem>>, vector<1x1x8x128xf32>
      %101 = vector.shape_cast %100 : vector<1x1x8x128xf32> to vector<8x128xf32>
      %cst_56 = arith.constant dense<0.000000e+00> : vector<8x128xf32>
      %102 = tpu.matmul %10, %76, %cst_56 {dimension_numbers = #tpu.dot_dimension_numbers<[1], [0], [0], [1], [0, 0, 1, 1], [], []>} : vector<8x256xf32>, vector<256x128xf32>, vector<8x128xf32> -> vector<8x128xf32>
      %103 = arith.addf %101, %102 : vector<8x128xf32>
      %c0_57 = arith.constant 0 : index
      %c12_58 = arith.constant 12 : index
      %c0_59 = arith.constant 0 : index
      %c0_60 = arith.constant 0 : index
      %104 = vector.load %arg5[%c0_57, %c12_58, %c0_59, %c0_60] : memref<1x20x8x128xf32, #tpu.memory_space<vmem>>, vector<1x1x8x128xf32>
      %105 = vector.shape_cast %104 : vector<1x1x8x128xf32> to vector<8x128xf32>
      %106 = vector.shape_cast %103 : vector<8x128xf32> to vector<1x1x8x128xf32>
      tpu.vector_store %arg5[%c0_57, %c12_58, %c0_59, %c0_60], %106 {strides = array<i32>} : memref<1x20x8x128xf32, #tpu.memory_space<vmem>>, vector<1x1x8x128xf32>,
      %c0_61 = arith.constant 0 : index
      %c16 = arith.constant 16 : index
      %c0_62 = arith.constant 0 : index
      %c0_63 = arith.constant 0 : index
      %107 = vector.load %arg5[%c0_61, %c16, %c0_62, %c0_63] : memref<1x20x8x128xf32, #tpu.memory_space<vmem>>, vector<1x1x8x128xf32>
      %108 = vector.shape_cast %107 : vector<1x1x8x128xf32> to vector<8x128xf32>
      %cst_64 = arith.constant dense<0.000000e+00> : vector<8x128xf32>
      %109 = tpu.matmul %10, %74, %cst_64 {dimension_numbers = #tpu.dot_dimension_numbers<[1], [0], [0], [1], [0, 0, 1, 1], [], []>} : vector<8x256xf32>, vector<256x128xf32>, vector<8x128xf32> -> vector<8x128xf32>
      %110 = arith.addf %108, %109 : vector<8x128xf32>
      %c0_65 = arith.constant 0 : index
      %c16_66 = arith.constant 16 : index
      %c0_67 = arith.constant 0 : index
      %c0_68 = arith.constant 0 : index
      %111 = vector.load %arg5[%c0_65, %c16_66, %c0_67, %c0_68] : memref<1x20x8x128xf32, #tpu.memory_space<vmem>>, vector<1x1x8x128xf32>
      %112 = vector.shape_cast %111 : vector<1x1x8x128xf32> to vector<8x128xf32>
      %113 = vector.shape_cast %110 : vector<8x128xf32> to vector<1x1x8x128xf32>
      tpu.vector_store %arg5[%c0_65, %c16_66, %c0_67, %c0_68], %113 {strides = array<i32>} : memref<1x20x8x128xf32, #tpu.memory_space<vmem>>, vector<1x1x8x128xf32>,
      %c1_i32_69 = arith.constant 1 : i32
      %114 = vector.broadcast %c1_i32_69 : i32 to vector<256x128xi32>
      %115 = arith.cmpi eq, %42, %114 : vector<256x128xi32>
      %c1_i32_70 = arith.constant 1 : i32
      %116 = vector.broadcast %c1_i32_70 : i32 to vector<256x128xi32>
      %117 = arith.cmpi eq, %64, %116 : vector<256x128xi32>
      %cst_71 = arith.constant 0.000000e+00 : f32
      %118 = vector.broadcast %cst_71 : f32 to vector<256x128xf32>
      %119 = arith.select %115, %46, %118 : vector<256x128xi1>, vector<256x128xf32>
      %120 = arith.extui %115 : vector<256x128xi1> to vector<256x128xi32>
      %121 = arith.sitofp %120 : vector<256x128xi32> to vector<256x128xf32>
      %122 = arith.extui %117 : vector<256x128xi1> to vector<256x128xi32>
      %123 = arith.sitofp %122 : vector<256x128xi32> to vector<256x128xf32>
      %cst_72 = arith.constant 0.000000e+00 : f32
      %124 = vector.broadcast %cst_72 : f32 to vector<256x128xf32>
      %125 = arith.select %115, %123, %124 : vector<256x128xi1>, vector<256x128xf32>
      %c0_73 = arith.constant 0 : index
      %c1_74 = arith.constant 1 : index
      %c0_75 = arith.constant 0 : index
      %c0_76 = arith.constant 0 : index
      %126 = vector.load %arg5[%c0_73, %c1_74, %c0_75, %c0_76] : memref<1x20x8x128xf32, #tpu.memory_space<vmem>>, vector<1x1x1x128xf32>
      %127 = vector.shape_cast %126 : vector<1x1x1x128xf32> to vector<1x128xf32>
      %cst_77 = arith.constant dense<0.000000e+00> : vector<128xf32>
      %128 = vector.multi_reduction <add>, %119, %cst_77 [0] : vector<256x128xf32> to vector<128xf32>
      %129 = vector.shape_cast %128 : vector<128xf32> to vector<1x128xf32>
      %130 = arith.addf %127, %129 : vector<1x128xf32>
      %c0_78 = arith.constant 0 : index
      %c1_79 = arith.constant 1 : index
      %c0_80 = arith.constant 0 : index
      %c0_81 = arith.constant 0 : index
      %131 = vector.load %arg5[%c0_78, %c1_79, %c0_80, %c0_81] : memref<1x20x8x128xf32, #tpu.memory_space<vmem>>, vector<1x1x1x128xf32>
      %132 = vector.shape_cast %131 : vector<1x1x1x128xf32> to vector<1x128xf32>
      %133 = vector.shape_cast %130 : vector<1x128xf32> to vector<1x1x1x128xf32>
      tpu.vector_store %arg5[%c0_78, %c1_79, %c0_80, %c0_81], %133 {strides = array<i32>} : memref<1x20x8x128xf32, #tpu.memory_space<vmem>>, vector<1x1x1x128xf32>,
      %c0_82 = arith.constant 0 : index
      %c5 = arith.constant 5 : index
      %c0_83 = arith.constant 0 : index
      %c0_84 = arith.constant 0 : index
      %134 = vector.load %arg5[%c0_82, %c5, %c0_83, %c0_84] : memref<1x20x8x128xf32, #tpu.memory_space<vmem>>, vector<1x1x1x128xf32>
      %135 = vector.shape_cast %134 : vector<1x1x1x128xf32> to vector<1x128xf32>
      %cst_85 = arith.constant dense<0.000000e+00> : vector<128xf32>
      %136 = vector.multi_reduction <add>, %46, %cst_85 [0] : vector<256x128xf32> to vector<128xf32>
      %137 = vector.shape_cast %136 : vector<128xf32> to vector<1x128xf32>
      %138 = arith.addf %135, %137 : vector<1x128xf32>
      %c0_86 = arith.constant 0 : index
      %c5_87 = arith.constant 5 : index
      %c0_88 = arith.constant 0 : index
      %c0_89 = arith.constant 0 : index
      %139 = vector.load %arg5[%c0_86, %c5_87, %c0_88, %c0_89] : memref<1x20x8x128xf32, #tpu.memory_space<vmem>>, vector<1x1x1x128xf32>
      %140 = vector.shape_cast %139 : vector<1x1x1x128xf32> to vector<1x128xf32>
      %141 = vector.shape_cast %138 : vector<1x128xf32> to vector<1x1x1x128xf32>
      tpu.vector_store %arg5[%c0_86, %c5_87, %c0_88, %c0_89], %141 {strides = array<i32>} : memref<1x20x8x128xf32, #tpu.memory_space<vmem>>, vector<1x1x1x128xf32>,
      %c0_90 = arith.constant 0 : index
      %c9 = arith.constant 9 : index
      %c0_91 = arith.constant 0 : index
      %c0_92 = arith.constant 0 : index
      %142 = vector.load %arg5[%c0_90, %c9, %c0_91, %c0_92] : memref<1x20x8x128xf32, #tpu.memory_space<vmem>>, vector<1x1x8x128xf32>
      %143 = vector.shape_cast %142 : vector<1x1x8x128xf32> to vector<8x128xf32>
      %cst_93 = arith.constant dense<0.000000e+00> : vector<8x128xf32>
      %144 = tpu.matmul %10, %121, %cst_93 {dimension_numbers = #tpu.dot_dimension_numbers<[1], [0], [0], [1], [0, 0, 1, 1], [], []>} : vector<8x256xf32>, vector<256x128xf32>, vector<8x128xf32> -> vector<8x128xf32>
      %145 = arith.addf %143, %144 : vector<8x128xf32>
      %c0_94 = arith.constant 0 : index
      %c9_95 = arith.constant 9 : index
      %c0_96 = arith.constant 0 : index
      %c0_97 = arith.constant 0 : index
      %146 = vector.load %arg5[%c0_94, %c9_95, %c0_96, %c0_97] : memref<1x20x8x128xf32, #tpu.memory_space<vmem>>, vector<1x1x8x128xf32>
      %147 = vector.shape_cast %146 : vector<1x1x8x128xf32> to vector<8x128xf32>
      %148 = vector.shape_cast %145 : vector<8x128xf32> to vector<1x1x8x128xf32>
      tpu.vector_store %arg5[%c0_94, %c9_95, %c0_96, %c0_97], %148 {strides = array<i32>} : memref<1x20x8x128xf32, #tpu.memory_space<vmem>>, vector<1x1x8x128xf32>,
      %c0_98 = arith.constant 0 : index
      %c13 = arith.constant 13 : index
      %c0_99 = arith.constant 0 : index
      %c0_100 = arith.constant 0 : index
      %149 = vector.load %arg5[%c0_98, %c13, %c0_99, %c0_100] : memref<1x20x8x128xf32, #tpu.memory_space<vmem>>, vector<1x1x8x128xf32>
      %150 = vector.shape_cast %149 : vector<1x1x8x128xf32> to vector<8x128xf32>
      %cst_101 = arith.constant dense<0.000000e+00> : vector<8x128xf32>
      %151 = tpu.matmul %10, %125, %cst_101 {dimension_numbers = #tpu.dot_dimension_numbers<[1], [0], [0], [1], [0, 0, 1, 1], [], []>} : vector<8x256xf32>, vector<256x128xf32>, vector<8x128xf32> -> vector<8x128xf32>
      %152 = arith.addf %150, %151 : vector<8x128xf32>
      %c0_102 = arith.constant 0 : index
      %c13_103 = arith.constant 13 : index
      %c0_104 = arith.constant 0 : index
      %c0_105 = arith.constant 0 : index
      %153 = vector.load %arg5[%c0_102, %c13_103, %c0_104, %c0_105] : memref<1x20x8x128xf32, #tpu.memory_space<vmem>>, vector<1x1x8x128xf32>
      %154 = vector.shape_cast %153 : vector<1x1x8x128xf32> to vector<8x128xf32>
      %155 = vector.shape_cast %152 : vector<8x128xf32> to vector<1x1x8x128xf32>
      tpu.vector_store %arg5[%c0_102, %c13_103, %c0_104, %c0_105], %155 {strides = array<i32>} : memref<1x20x8x128xf32, #tpu.memory_space<vmem>>, vector<1x1x8x128xf32>,
      %c0_106 = arith.constant 0 : index
      %c17 = arith.constant 17 : index
      %c0_107 = arith.constant 0 : index
      %c0_108 = arith.constant 0 : index
      %156 = vector.load %arg5[%c0_106, %c17, %c0_107, %c0_108] : memref<1x20x8x128xf32, #tpu.memory_space<vmem>>, vector<1x1x8x128xf32>
      %157 = vector.shape_cast %156 : vector<1x1x8x128xf32> to vector<8x128xf32>
      %cst_109 = arith.constant dense<0.000000e+00> : vector<8x128xf32>
      %158 = tpu.matmul %10, %123, %cst_109 {dimension_numbers = #tpu.dot_dimension_numbers<[1], [0], [0], [1], [0, 0, 1, 1], [], []>} : vector<8x256xf32>, vector<256x128xf32>, vector<8x128xf32> -> vector<8x128xf32>
      %159 = arith.addf %157, %158 : vector<8x128xf32>
      %c0_110 = arith.constant 0 : index
      %c17_111 = arith.constant 17 : index
      %c0_112 = arith.constant 0 : index
      %c0_113 = arith.constant 0 : index
      %160 = vector.load %arg5[%c0_110, %c17_111, %c0_112, %c0_113] : memref<1x20x8x128xf32, #tpu.memory_space<vmem>>, vector<1x1x8x128xf32>
      %161 = vector.shape_cast %160 : vector<1x1x8x128xf32> to vector<8x128xf32>
      %162 = vector.shape_cast %159 : vector<8x128xf32> to vector<1x1x8x128xf32>
      tpu.vector_store %arg5[%c0_110, %c17_111, %c0_112, %c0_113], %162 {strides = array<i32>} : memref<1x20x8x128xf32, #tpu.memory_space<vmem>>, vector<1x1x8x128xf32>,
      %c2_i32_114 = arith.constant 2 : i32
      %163 = vector.broadcast %c2_i32_114 : i32 to vector<256x128xi32>
      %164 = arith.cmpi eq, %42, %163 : vector<256x128xi32>
      %c2_i32_115 = arith.constant 2 : i32
      %165 = vector.broadcast %c2_i32_115 : i32 to vector<256x128xi32>
      %166 = arith.cmpi eq, %64, %165 : vector<256x128xi32>
      %cst_116 = arith.constant 0.000000e+00 : f32
      %167 = vector.broadcast %cst_116 : f32 to vector<256x128xf32>
      %168 = arith.select %164, %48, %167 : vector<256x128xi1>, vector<256x128xf32>
      %169 = arith.extui %164 : vector<256x128xi1> to vector<256x128xi32>
      %170 = arith.sitofp %169 : vector<256x128xi32> to vector<256x128xf32>
      %171 = arith.extui %166 : vector<256x128xi1> to vector<256x128xi32>
      %172 = arith.sitofp %171 : vector<256x128xi32> to vector<256x128xf32>
      %cst_117 = arith.constant 0.000000e+00 : f32
      %173 = vector.broadcast %cst_117 : f32 to vector<256x128xf32>
      %174 = arith.select %164, %172, %173 : vector<256x128xi1>, vector<256x128xf32>
      %c0_118 = arith.constant 0 : index
      %c2_119 = arith.constant 2 : index
      %c0_120 = arith.constant 0 : index
      %c0_121 = arith.constant 0 : index
      %175 = vector.load %arg5[%c0_118, %c2_119, %c0_120, %c0_121] : memref<1x20x8x128xf32, #tpu.memory_space<vmem>>, vector<1x1x1x128xf32>
      %176 = vector.shape_cast %175 : vector<1x1x1x128xf32> to vector<1x128xf32>
      %cst_122 = arith.constant dense<0.000000e+00> : vector<128xf32>
      %177 = vector.multi_reduction <add>, %168, %cst_122 [0] : vector<256x128xf32> to vector<128xf32>
      %178 = vector.shape_cast %177 : vector<128xf32> to vector<1x128xf32>
      %179 = arith.addf %176, %178 : vector<1x128xf32>
      %c0_123 = arith.constant 0 : index
      %c2_124 = arith.constant 2 : index
      %c0_125 = arith.constant 0 : index
      %c0_126 = arith.constant 0 : index
      %180 = vector.load %arg5[%c0_123, %c2_124, %c0_125, %c0_126] : memref<1x20x8x128xf32, #tpu.memory_space<vmem>>, vector<1x1x1x128xf32>
      %181 = vector.shape_cast %180 : vector<1x1x1x128xf32> to vector<1x128xf32>
      %182 = vector.shape_cast %179 : vector<1x128xf32> to vector<1x1x1x128xf32>
      tpu.vector_store %arg5[%c0_123, %c2_124, %c0_125, %c0_126], %182 {strides = array<i32>} : memref<1x20x8x128xf32, #tpu.memory_space<vmem>>, vector<1x1x1x128xf32>,
      %c0_127 = arith.constant 0 : index
      %c6 = arith.constant 6 : index
      %c0_128 = arith.constant 0 : index
      %c0_129 = arith.constant 0 : index
      %183 = vector.load %arg5[%c0_127, %c6, %c0_128, %c0_129] : memref<1x20x8x128xf32, #tpu.memory_space<vmem>>, vector<1x1x1x128xf32>
      %184 = vector.shape_cast %183 : vector<1x1x1x128xf32> to vector<1x128xf32>
      %cst_130 = arith.constant dense<0.000000e+00> : vector<128xf32>
      %185 = vector.multi_reduction <add>, %48, %cst_130 [0] : vector<256x128xf32> to vector<128xf32>
      %186 = vector.shape_cast %185 : vector<128xf32> to vector<1x128xf32>
      %187 = arith.addf %184, %186 : vector<1x128xf32>
      %c0_131 = arith.constant 0 : index
      %c6_132 = arith.constant 6 : index
      %c0_133 = arith.constant 0 : index
      %c0_134 = arith.constant 0 : index
      %188 = vector.load %arg5[%c0_131, %c6_132, %c0_133, %c0_134] : memref<1x20x8x128xf32, #tpu.memory_space<vmem>>, vector<1x1x1x128xf32>
      %189 = vector.shape_cast %188 : vector<1x1x1x128xf32> to vector<1x128xf32>
      %190 = vector.shape_cast %187 : vector<1x128xf32> to vector<1x1x1x128xf32>
      tpu.vector_store %arg5[%c0_131, %c6_132, %c0_133, %c0_134], %190 {strides = array<i32>} : memref<1x20x8x128xf32, #tpu.memory_space<vmem>>, vector<1x1x1x128xf32>,
      %c0_135 = arith.constant 0 : index
      %c10 = arith.constant 10 : index
      %c0_136 = arith.constant 0 : index
      %c0_137 = arith.constant 0 : index
      %191 = vector.load %arg5[%c0_135, %c10, %c0_136, %c0_137] : memref<1x20x8x128xf32, #tpu.memory_space<vmem>>, vector<1x1x8x128xf32>
      %192 = vector.shape_cast %191 : vector<1x1x8x128xf32> to vector<8x128xf32>
      %cst_138 = arith.constant dense<0.000000e+00> : vector<8x128xf32>
      %193 = tpu.matmul %10, %170, %cst_138 {dimension_numbers = #tpu.dot_dimension_numbers<[1], [0], [0], [1], [0, 0, 1, 1], [], []>} : vector<8x256xf32>, vector<256x128xf32>, vector<8x128xf32> -> vector<8x128xf32>
      %194 = arith.addf %192, %193 : vector<8x128xf32>
      %c0_139 = arith.constant 0 : index
      %c10_140 = arith.constant 10 : index
      %c0_141 = arith.constant 0 : index
      %c0_142 = arith.constant 0 : index
      %195 = vector.load %arg5[%c0_139, %c10_140, %c0_141, %c0_142] : memref<1x20x8x128xf32, #tpu.memory_space<vmem>>, vector<1x1x8x128xf32>
      %196 = vector.shape_cast %195 : vector<1x1x8x128xf32> to vector<8x128xf32>
      %197 = vector.shape_cast %194 : vector<8x128xf32> to vector<1x1x8x128xf32>
      tpu.vector_store %arg5[%c0_139, %c10_140, %c0_141, %c0_142], %197 {strides = array<i32>} : memref<1x20x8x128xf32, #tpu.memory_space<vmem>>, vector<1x1x8x128xf32>,
      %c0_143 = arith.constant 0 : index
      %c14 = arith.constant 14 : index
      %c0_144 = arith.constant 0 : index
      %c0_145 = arith.constant 0 : index
      %198 = vector.load %arg5[%c0_143, %c14, %c0_144, %c0_145] : memref<1x20x8x128xf32, #tpu.memory_space<vmem>>, vector<1x1x8x128xf32>
      %199 = vector.shape_cast %198 : vector<1x1x8x128xf32> to vector<8x128xf32>
      %cst_146 = arith.constant dense<0.000000e+00> : vector<8x128xf32>
      %200 = tpu.matmul %10, %174, %cst_146 {dimension_numbers = #tpu.dot_dimension_numbers<[1], [0], [0], [1], [0, 0, 1, 1], [], []>} : vector<8x256xf32>, vector<256x128xf32>, vector<8x128xf32> -> vector<8x128xf32>
      %201 = arith.addf %199, %200 : vector<8x128xf32>
      %c0_147 = arith.constant 0 : index
      %c14_148 = arith.constant 14 : index
      %c0_149 = arith.constant 0 : index
      %c0_150 = arith.constant 0 : index
      %202 = vector.load %arg5[%c0_147, %c14_148, %c0_149, %c0_150] : memref<1x20x8x128xf32, #tpu.memory_space<vmem>>, vector<1x1x8x128xf32>
      %203 = vector.shape_cast %202 : vector<1x1x8x128xf32> to vector<8x128xf32>
      %204 = vector.shape_cast %201 : vector<8x128xf32> to vector<1x1x8x128xf32>
      tpu.vector_store %arg5[%c0_147, %c14_148, %c0_149, %c0_150], %204 {strides = array<i32>} : memref<1x20x8x128xf32, #tpu.memory_space<vmem>>, vector<1x1x8x128xf32>,
      %c0_151 = arith.constant 0 : index
      %c18 = arith.constant 18 : index
      %c0_152 = arith.constant 0 : index
      %c0_153 = arith.constant 0 : index
      %205 = vector.load %arg5[%c0_151, %c18, %c0_152, %c0_153] : memref<1x20x8x128xf32, #tpu.memory_space<vmem>>, vector<1x1x8x128xf32>
      %206 = vector.shape_cast %205 : vector<1x1x8x128xf32> to vector<8x128xf32>
      %cst_154 = arith.constant dense<0.000000e+00> : vector<8x128xf32>
      %207 = tpu.matmul %10, %172, %cst_154 {dimension_numbers = #tpu.dot_dimension_numbers<[1], [0], [0], [1], [0, 0, 1, 1], [], []>} : vector<8x256xf32>, vector<256x128xf32>, vector<8x128xf32> -> vector<8x128xf32>
      %208 = arith.addf %206, %207 : vector<8x128xf32>
      %c0_155 = arith.constant 0 : index
      %c18_156 = arith.constant 18 : index
      %c0_157 = arith.constant 0 : index
      %c0_158 = arith.constant 0 : index
      %209 = vector.load %arg5[%c0_155, %c18_156, %c0_157, %c0_158] : memref<1x20x8x128xf32, #tpu.memory_space<vmem>>, vector<1x1x8x128xf32>
      %210 = vector.shape_cast %209 : vector<1x1x8x128xf32> to vector<8x128xf32>
      %211 = vector.shape_cast %208 : vector<8x128xf32> to vector<1x1x8x128xf32>
      tpu.vector_store %arg5[%c0_155, %c18_156, %c0_157, %c0_158], %211 {strides = array<i32>} : memref<1x20x8x128xf32, #tpu.memory_space<vmem>>, vector<1x1x8x128xf32>,
      %c3_i32_159 = arith.constant 3 : i32
      %212 = vector.broadcast %c3_i32_159 : i32 to vector<256x128xi32>
      %213 = arith.cmpi eq, %42, %212 : vector<256x128xi32>
      %c3_i32_160 = arith.constant 3 : i32
      %214 = vector.broadcast %c3_i32_160 : i32 to vector<256x128xi32>
      %215 = arith.cmpi eq, %64, %214 : vector<256x128xi32>
      %cst_161 = arith.constant 0.000000e+00 : f32
      %216 = vector.broadcast %cst_161 : f32 to vector<256x128xf32>
      %217 = arith.select %213, %50, %216 : vector<256x128xi1>, vector<256x128xf32>
      %218 = arith.extui %213 : vector<256x128xi1> to vector<256x128xi32>
      %219 = arith.sitofp %218 : vector<256x128xi32> to vector<256x128xf32>
      %220 = arith.extui %215 : vector<256x128xi1> to vector<256x128xi32>
      %221 = arith.sitofp %220 : vector<256x128xi32> to vector<256x128xf32>
      %cst_162 = arith.constant 0.000000e+00 : f32
      %222 = vector.broadcast %cst_162 : f32 to vector<256x128xf32>
      %223 = arith.select %213, %221, %222 : vector<256x128xi1>, vector<256x128xf32>
      %c0_163 = arith.constant 0 : index
      %c3_164 = arith.constant 3 : index
      %c0_165 = arith.constant 0 : index
      %c0_166 = arith.constant 0 : index
      %224 = vector.load %arg5[%c0_163, %c3_164, %c0_165, %c0_166] : memref<1x20x8x128xf32, #tpu.memory_space<vmem>>, vector<1x1x1x128xf32>
      %225 = vector.shape_cast %224 : vector<1x1x1x128xf32> to vector<1x128xf32>
      %cst_167 = arith.constant dense<0.000000e+00> : vector<128xf32>
      %226 = vector.multi_reduction <add>, %217, %cst_167 [0] : vector<256x128xf32> to vector<128xf32>
      %227 = vector.shape_cast %226 : vector<128xf32> to vector<1x128xf32>
      %228 = arith.addf %225, %227 : vector<1x128xf32>
      %c0_168 = arith.constant 0 : index
      %c3_169 = arith.constant 3 : index
      %c0_170 = arith.constant 0 : index
      %c0_171 = arith.constant 0 : index
      %229 = vector.load %arg5[%c0_168, %c3_169, %c0_170, %c0_171] : memref<1x20x8x128xf32, #tpu.memory_space<vmem>>, vector<1x1x1x128xf32>
      %230 = vector.shape_cast %229 : vector<1x1x1x128xf32> to vector<1x128xf32>
      %231 = vector.shape_cast %228 : vector<1x128xf32> to vector<1x1x1x128xf32>
      tpu.vector_store %arg5[%c0_168, %c3_169, %c0_170, %c0_171], %231 {strides = array<i32>} : memref<1x20x8x128xf32, #tpu.memory_space<vmem>>, vector<1x1x1x128xf32>,
      %c0_172 = arith.constant 0 : index
      %c7 = arith.constant 7 : index
      %c0_173 = arith.constant 0 : index
      %c0_174 = arith.constant 0 : index
      %232 = vector.load %arg5[%c0_172, %c7, %c0_173, %c0_174] : memref<1x20x8x128xf32, #tpu.memory_space<vmem>>, vector<1x1x1x128xf32>
      %233 = vector.shape_cast %232 : vector<1x1x1x128xf32> to vector<1x128xf32>
      %cst_175 = arith.constant dense<0.000000e+00> : vector<128xf32>
      %234 = vector.multi_reduction <add>, %50, %cst_175 [0] : vector<256x128xf32> to vector<128xf32>
      %235 = vector.shape_cast %234 : vector<128xf32> to vector<1x128xf32>
      %236 = arith.addf %233, %235 : vector<1x128xf32>
      %c0_176 = arith.constant 0 : index
      %c7_177 = arith.constant 7 : index
      %c0_178 = arith.constant 0 : index
      %c0_179 = arith.constant 0 : index
      %237 = vector.load %arg5[%c0_176, %c7_177, %c0_178, %c0_179] : memref<1x20x8x128xf32, #tpu.memory_space<vmem>>, vector<1x1x1x128xf32>
      %238 = vector.shape_cast %237 : vector<1x1x1x128xf32> to vector<1x128xf32>
      %239 = vector.shape_cast %236 : vector<1x128xf32> to vector<1x1x1x128xf32>
      tpu.vector_store %arg5[%c0_176, %c7_177, %c0_178, %c0_179], %239 {strides = array<i32>} : memref<1x20x8x128xf32, #tpu.memory_space<vmem>>, vector<1x1x1x128xf32>,
      %c0_180 = arith.constant 0 : index
      %c11 = arith.constant 11 : index
      %c0_181 = arith.constant 0 : index
      %c0_182 = arith.constant 0 : index
      %240 = vector.load %arg5[%c0_180, %c11, %c0_181, %c0_182] : memref<1x20x8x128xf32, #tpu.memory_space<vmem>>, vector<1x1x8x128xf32>
      %241 = vector.shape_cast %240 : vector<1x1x8x128xf32> to vector<8x128xf32>
      %cst_183 = arith.constant dense<0.000000e+00> : vector<8x128xf32>
      %242 = tpu.matmul %10, %219, %cst_183 {dimension_numbers = #tpu.dot_dimension_numbers<[1], [0], [0], [1], [0, 0, 1, 1], [], []>} : vector<8x256xf32>, vector<256x128xf32>, vector<8x128xf32> -> vector<8x128xf32>
      %243 = arith.addf %241, %242 : vector<8x128xf32>
      %c0_184 = arith.constant 0 : index
      %c11_185 = arith.constant 11 : index
      %c0_186 = arith.constant 0 : index
      %c0_187 = arith.constant 0 : index
      %244 = vector.load %arg5[%c0_184, %c11_185, %c0_186, %c0_187] : memref<1x20x8x128xf32, #tpu.memory_space<vmem>>, vector<1x1x8x128xf32>
      %245 = vector.shape_cast %244 : vector<1x1x8x128xf32> to vector<8x128xf32>
      %246 = vector.shape_cast %243 : vector<8x128xf32> to vector<1x1x8x128xf32>
      tpu.vector_store %arg5[%c0_184, %c11_185, %c0_186, %c0_187], %246 {strides = array<i32>} : memref<1x20x8x128xf32, #tpu.memory_space<vmem>>, vector<1x1x8x128xf32>,
      %c0_188 = arith.constant 0 : index
      %c15 = arith.constant 15 : index
      %c0_189 = arith.constant 0 : index
      %c0_190 = arith.constant 0 : index
      %247 = vector.load %arg5[%c0_188, %c15, %c0_189, %c0_190] : memref<1x20x8x128xf32, #tpu.memory_space<vmem>>, vector<1x1x8x128xf32>
      %248 = vector.shape_cast %247 : vector<1x1x8x128xf32> to vector<8x128xf32>
      %cst_191 = arith.constant dense<0.000000e+00> : vector<8x128xf32>
      %249 = tpu.matmul %10, %223, %cst_191 {dimension_numbers = #tpu.dot_dimension_numbers<[1], [0], [0], [1], [0, 0, 1, 1], [], []>} : vector<8x256xf32>, vector<256x128xf32>, vector<8x128xf32> -> vector<8x128xf32>
      %250 = arith.addf %248, %249 : vector<8x128xf32>
      %c0_192 = arith.constant 0 : index
      %c15_193 = arith.constant 15 : index
      %c0_194 = arith.constant 0 : index
      %c0_195 = arith.constant 0 : index
      %251 = vector.load %arg5[%c0_192, %c15_193, %c0_194, %c0_195] : memref<1x20x8x128xf32, #tpu.memory_space<vmem>>, vector<1x1x8x128xf32>
      %252 = vector.shape_cast %251 : vector<1x1x8x128xf32> to vector<8x128xf32>
      %253 = vector.shape_cast %250 : vector<8x128xf32> to vector<1x1x8x128xf32>
      tpu.vector_store %arg5[%c0_192, %c15_193, %c0_194, %c0_195], %253 {strides = array<i32>} : memref<1x20x8x128xf32, #tpu.memory_space<vmem>>, vector<1x1x8x128xf32>,
      %c0_196 = arith.constant 0 : index
      %c19 = arith.constant 19 : index
      %c0_197 = arith.constant 0 : index
      %c0_198 = arith.constant 0 : index
      %254 = vector.load %arg5[%c0_196, %c19, %c0_197, %c0_198] : memref<1x20x8x128xf32, #tpu.memory_space<vmem>>, vector<1x1x8x128xf32>
      %255 = vector.shape_cast %254 : vector<1x1x8x128xf32> to vector<8x128xf32>
      %cst_199 = arith.constant dense<0.000000e+00> : vector<8x128xf32>
      %256 = tpu.matmul %10, %221, %cst_199 {dimension_numbers = #tpu.dot_dimension_numbers<[1], [0], [0], [1], [0, 0, 1, 1], [], []>} : vector<8x256xf32>, vector<256x128xf32>, vector<8x128xf32> -> vector<8x128xf32>
      %257 = arith.addf %255, %256 : vector<8x128xf32>
      %c0_200 = arith.constant 0 : index
      %c19_201 = arith.constant 19 : index
      %c0_202 = arith.constant 0 : index
      %c0_203 = arith.constant 0 : index
      %258 = vector.load %arg5[%c0_200, %c19_201, %c0_202, %c0_203] : memref<1x20x8x128xf32, #tpu.memory_space<vmem>>, vector<1x1x8x128xf32>
      %259 = vector.shape_cast %258 : vector<1x1x8x128xf32> to vector<8x128xf32>
      %260 = vector.shape_cast %257 : vector<8x128xf32> to vector<1x1x8x128xf32>
      tpu.vector_store %arg5[%c0_200, %c19_201, %c0_202, %c0_203], %260 {strides = array<i32>} : memref<1x20x8x128xf32, #tpu.memory_space<vmem>>, vector<1x1x8x128xf32>,
    }
    %c2_i32_4 = arith.constant 2 : i32
    return
  }
  func.func @transform_0(%arg0: i32, %arg1: i32, %arg2: i32) -> (i32, i32, i32, i32) {
    %c2_i32 = arith.constant 2 : i32
    %0 = arith.muli %arg1, %c2_i32 : i32
    %1 = arith.addi %0, %arg2 : i32
    %c1_i32 = arith.constant 1 : i32
    %2 = arith.minsi %1, %c1_i32 : i32
    %c0_i32 = arith.constant 0 : i32
    %c0_i32_0 = arith.constant 0 : i32
    %c0_i32_1 = arith.constant 0 : i32
    return %arg0, %c0_i32, %2, %c0_i32_0 : i32, i32, i32, i32
  }
  func.func @transform_1(%arg0: i32, %arg1: i32, %arg2: i32) -> (i32, i32, i32) {
    %c2_i32 = arith.constant 2 : i32
    %0 = arith.muli %arg1, %c2_i32 : i32
    %1 = arith.addi %0, %arg2 : i32
    %c1_i32 = arith.constant 1 : i32
    %2 = arith.minsi %1, %c1_i32 : i32
    %c0_i32 = arith.constant 0 : i32
    %c0_i32_0 = arith.constant 0 : i32
    return %arg0, %2, %c0_i32 : i32, i32, i32
  }
  func.func @transform_2(%arg0: i32, %arg1: i32, %arg2: i32) -> (i32, i32, i32, i32) {
    %c1_i32 = arith.constant 1 : i32
    %0 = arith.muli %arg0, %c1_i32 : i32
    %1 = arith.addi %0, %arg1 : i32
    %c0_i32 = arith.constant 0 : i32
    %c0_i32_0 = arith.constant 0 : i32
    %c0_i32_1 = arith.constant 0 : i32
    %c0_i32_2 = arith.constant 0 : i32
    return %1, %c0_i32, %c0_i32_0, %c0_i32_1 : i32, i32, i32, i32
  }
}

</mosaic_0001>

<bundles_post_ra>
// kernel: softmax_dice.1
= control target key start
LH: loop header
LB: loop body
LE: loop exit
PB: predicated region body
PF: predicated region fallthrough
CT: control target
= control target key end

     0   :  { %s4532_s9 = smov 0   ;;  %s4534_s10 = smov 0   ;;  %s8354_s0 = inlined_call_operand.vmem [shape: f32[2,4,640,128], index: 0, kind: input, shape index: {}]   ;;  %s8355_s1 = inlined_call_operand.vmem [shape: s32[2,640,128], index: 1, kind: input, shape index: {}]   ;;  %s8356_s2 = inlined_call_operand.vmem [shape: f32[2,20,8,128], index: 2, kind: output, shape index: {}]  }
   0x1   :  { %s4536_s11 = smov 0   ;;  %s4538_s12 = smov 0  }
   0x2   :  { %s4540_s13 = smov 0   ;;  %s4542_s14 = smov 0  }
   0x3   :  { %s4544_s15 = smov 0  }
   0x4 LB: > { %s24_s16 = sadd.s32 1, %s4467_s13  ;;  %s31_s17 = sadd.s32 1, %s4471_s14  ;;  %s4475_s15 = sphi %s4544_s15, %s12_s15   ;;  %s4471_s14 = sphi %s4542_s14, %s9685_s14   ;;  %s4467_s13 = sphi %s4540_s13, %s9684_s13   ;;  %s4463_s12 = sphi %s4538_s12, %s9683_s12   ;;  %s4459_s11 = sphi %s4536_s11, %s9682_s11   ;;  %s4455_s10 = sphi %s4534_s10, %s9681_s10   ;;  %s4451_s9 = sphi %s4532_s9, %s9680_s9  }
   0x5   : > { %p25_p0 = scmp.ge.s32.totalorder %s24_s16, 2  ;;  %p37_p1 = scmp.lt.s32.totalorder %s4467_s13, 1 }
   0x6   : > { %p55_p2 = scmp.ne.s32.totalorder %s4455_s10, %s4451_s9  ;;  %p56_p5 = scmp.eq.s32.totalorder %s4475_s15, 0 }
   0x7   : > { %s9687_s16 = smov (%p25_p0, %s24_s16), 0  ;;  %s9689_s17 = smov (!%p25_p0, %s31_s17), %s4471_s14 }
   0x8   : > { %s38_s18 = scalar_select %p37_p1, %s4467_s13, 1 }
   0x9   : > { %p33_p3 = scmp.ge.s32.totalorder %s9689_s17, 2  ;;  %p41_p4 = scmp.lt.s32.totalorder %s9687_s16, 1 }
   0xa   : > { %p57_p6 = por %p56_p5, %p55_p2  ;;  %s48_s23 = sadd.s32 1, %s4455_s10 }
   0xb   : > { %s9691_s17 = smov (%p33_p3, %s9689_s17), 0  ;;  %p3419_p8 = scmp.ge.s32.totalorder %s4475_s15, 4 }
   0xc   : > { %s42_s19 = scalar_select %p41_p4, %s9687_s16, 1 }
   0xd   : > { %s43_s20 = ssub.s32 %s4471_s14, %s9691_s17 }
   0xe   : > { %s44_s21 = ssub.s32 %s38_s18, %s42_s19  ;;  %145 = sbr.rel (%p3419_p8) target bundleno = 79 (0x4f), region = 16 }
   0xf   : > { %s45_s22 = sor.u32 %s44_s21, %s43_s20 }
  0x10   : > { %p46_p7 = scmp.eq.s32.totalorder %s45_s22, 0 }
  0x12   : > { %s4585_s24 = scalar_select %p46_p7, %s4455_s10, %s48_s23  }
  0x13   : > { %148 = sbr.rel (!%p57_p6) target bundleno = 79 (0x4f), region = 20  ;;  %s150_s25 = sand.u32 (%p57_p6), 1, %s4455_s10  }
  0x14   : > { %s3421_s26 = sshll.u32 (%p57_p6), %s38_s18, 6  ;;  %s3420_s27 = sshll.u32 (%p57_p6), %s150_s25, 11 }
  0x15   : > { %s158_s28 = ssub.s32 (%p57_p6), 80, %s3421_s26  ;;  %s4249_s29 = smul.u32 (%p57_p6), 320, %s4471_s14 }
  0x16   : > { %p159_p9 = scmp.lt.s32.totalorder (%p57_p6), %s158_s28, 64  ;;  %s4598_s8 = scalar_lea.vmem (%p57_p6), [#allocation2], %s3420_s27  }
  0x17   : > { %s164_s30 = sadd.s32 (%p57_p6), %s4249_s29, %s3421_s26 }
  0x18   : > { %s9693_s28 = smov (!%p159_p9, %s158_s28), 64  ;;  %s3424_s4 = sshll.u32 %s164_s30, 3 }
  0x19   : > { %s3422_s3 = sshll.u32 %s9693_s28, 5  ;;  %s4596_s7 = scalar_lea.vmem %s8354_s0, %s3424_s4  }
  0x1a   : > { %p3425_p10 = scmp.eq.s32.totalorder %s3422_s3, 0 }
  0x1b   : > { %s4601_s18 = sshrl.u32 (!%p3425_p10), %s9693_s28, 3  ;;  %s8910_s19 = smov (!%p3425_p10), %s4598_s8 }
  0x1c   : > { %169 = sbr.rel (%p3425_p10) target bundleno = 79 (0x4f), region = 24  ;;  %s8911_s20 = smov (!%p3425_p10), %s4596_s7 }
  0x1d   : > { %s4609_s21 = smov (!%p3425_p10), 0   ;;  %s4611_s22 = smov (!%p3425_p10), 0  }
  0x21 LB: >> { %v300_v0 = vld [vmem:[%s4483_s20] sm:$0xff]  ;;  %v302_v1 = vld [vmem:[%s4483_s20 + $0x8] sm:$0xff]  ;;  %v304_v2 = vld [vmem:[%s4483_s20 + $0x10] sm:$0xff]  ;;  %s364_s23 = sadd.s32 1, %s4487_s21  ;;  %s294_s22 = sadd.s32 1, %s4491_s22   ;;  %s4491_s22 = sphi %s4611_s22, %s294_s22   ;;  %s4487_s21 = sphi %s4609_s21, %s8914_s21   ;;  %s4483_s20 = sphi %s8911_s20, %s8913_s20   ;;  %s4479_s19 = sphi %s8910_s19, %s8912_s19  }
  0x22   : >> { %301 = vst [vmem:[%s4479_s19] sm:$0xff] %v300_v0  ;;  %v306_v3 = vld [vmem:[%s4483_s20 + $0x18] sm:$0xff]  ;;  %p365_p11 = scmp.ge.s32.totalorder %s364_s23, %s4601_s18  ;;  %v308_v4 = vld [vmem:[%s4483_s20 + $0x20] sm:$0xff]  ;;  %v310_v5 = vld [vmem:[%s4483_s20 + $0x28] sm:$0xff]  ;;  %p293_p12 = scmp.ge.s32.totalorder %s294_s22, %s4601_s18 }
  0x23   : >> { %303 = vst [vmem:[%s4479_s19 + $0x8] sm:$0xff] %v302_v1  ;;  %v312_v6 = vld [vmem:[%s4483_s20 + $0x30] sm:$0xff]  ;;  %v314_v7 = vld [vmem:[%s4483_s20 + $0x38] sm:$0xff]  ;;  %v316_v8 = vld [vmem:[%s4483_s20 + $0x280] sm:$0xff]  ;;  %s4711_s29 = sand.u32 (%p293_p12), 7, %s9693_s28   ;;  %s4247_s30 = sshll.u32 (%p293_p12), %s4601_s18, 6 }
  0x24   : >> { %305 = vst [vmem:[%s4479_s19 + $0x10] sm:$0xff] %v304_v2  ;;  %s9695_s23 = smov (%p365_p11, %s364_s23), 0  ;;  %v318_v9 = vld [vmem:[%s4483_s20 + $0x288] sm:$0xff]  ;;  %v320_v10 = vld [vmem:[%s4483_s20 + $0x290] sm:$0xff]  ;;  %v322_v11 = vld [vmem:[%s4483_s20 + $0x298] sm:$0xff]  ;;  %s4715_s3 = scalar_lea.vmem (%p293_p12), %s4596_s7, %s4247_s30  }
  0x25   : >> { %307 = vst [vmem:[%s4479_s19 + $0x18] sm:$0xff] %v306_v3  ;;  %s3427_s25 = sshll.u32 %s9695_s23, 6  ;;  %v324_v12 = vld [vmem:[%s4483_s20 + $0x2a0] sm:$0xff]  ;;  %v326_v13 = vld [vmem:[%s4483_s20 + $0x2a8] sm:$0xff]  ;;  %v328_v14 = vld [vmem:[%s4483_s20 + $0x2b0] sm:$0xff]  ;;  %s8914_s21 = smov %s9695_s23 }
  0x26   : >> { %309 = vst [vmem:[%s4479_s19 + $0x20] sm:$0xff] %v308_v4  ;;  %s4643_s26 = scalar_lea.vmem %s4596_s7, %s3427_s25   ;;  %s4646_s27 = scalar_lea.vmem %s4598_s8, %s3427_s25 [#allocation2]   ;;  %v330_v15 = vld [vmem:[%s4483_s20 + $0x2b8] sm:$0xff]  ;;  %v332_v16 = vld [vmem:[%s4483_s20 + $0x500] sm:$0xff]  ;;  %v334_v17 = vld [vmem:[%s4483_s20 + $0x508] sm:$0xff] }
  0x27   : >> { %311 = vst [vmem:[%s4479_s19 + $0x28] sm:$0xff] %v310_v5  ;;  %v336_v18 = vld [vmem:[%s4483_s20 + $0x510] sm:$0xff]  ;;  %v338_v19 = vld [vmem:[%s4483_s20 + $0x518] sm:$0xff]  ;;  %v340_v20 = vld [vmem:[%s4483_s20 + $0x520] sm:$0xff]  ;;  %s4718_s4 = scalar_lea.vmem (%p293_p12), %s4598_s8, %s4247_s30 [#allocation2]   ;;  %p3432_p13 = scmp.le.s32.totalorder (%p293_p12), %s4711_s29, 0 }
  0x28   : >> { %313 = vst [vmem:[%s4479_s19 + $0x30] sm:$0xff] %v312_v6  ;;  %v342_v21 = vld [vmem:[%s4483_s20 + $0x528] sm:$0xff]  ;;  %v344_v22 = vld [vmem:[%s4483_s20 + $0x530] sm:$0xff]  ;;  %v346_v23 = vld [vmem:[%s4483_s20 + $0x538] sm:$0xff] }
  0x29   : >> { %315 = vst [vmem:[%s4479_s19 + $0x38] sm:$0xff] %v314_v7  ;;  %v348_v24 = vld [vmem:[%s4483_s20 + $0x780] sm:$0xff]  ;;  %v350_v25 = vld [vmem:[%s4483_s20 + $0x788] sm:$0xff]  ;;  %v352_v26 = vld [vmem:[%s4483_s20 + $0x790] sm:$0xff] }
  0x2a   : >> { %317 = vst [vmem:[%s4479_s19 + $0x200] sm:$0xff] %v316_v8  ;;  %v354_v27 = vld [vmem:[%s4483_s20 + $0x798] sm:$0xff]  ;;  %v356_v28 = vld [vmem:[%s4483_s20 + $0x7a0] sm:$0xff]  ;;  %v358_v29 = vld [vmem:[%s4483_s20 + $0x7a8] sm:$0xff] }
  0x2b   : >> { %319 = vst [vmem:[%s4479_s19 + $0x208] sm:$0xff] %v318_v9  ;;  %v360_v30 = vld [vmem:[%s4483_s20 + $0x7b0] sm:$0xff]  ;;  %v362_v31 = vld [vmem:[%s4483_s20 + $0x7b8] sm:$0xff]  ;;  %s8913_s20 = smov %s4643_s26 }
  0x2c   : >> { %321 = vst [vmem:[%s4479_s19 + $0x210] sm:$0xff] %v320_v10 }
  0x2d   : >> { %323 = vst [vmem:[%s4479_s19 + $0x218] sm:$0xff] %v322_v11 }
  0x2e   : >> { %325 = vst [vmem:[%s4479_s19 + $0x220] sm:$0xff] %v324_v12 }
  0x2f   : >> { %327 = vst [vmem:[%s4479_s19 + $0x228] sm:$0xff] %v326_v13 }
  0x30   : >> { %329 = vst [vmem:[%s4479_s19 + $0x230] sm:$0xff] %v328_v14 }
  0x31   : >> { %331 = vst [vmem:[%s4479_s19 + $0x238] sm:$0xff] %v330_v15 }
  0x32   : >> { %333 = vst [vmem:[%s4479_s19 + $0x400] sm:$0xff] %v332_v16 }
  0x33   : >> { %335 = vst [vmem:[%s4479_s19 + $0x408] sm:$0xff] %v334_v17 }
  0x34   : >> { %337 = vst [vmem:[%s4479_s19 + $0x410] sm:$0xff] %v336_v18 }
  0x35   : >> { %339 = vst [vmem:[%s4479_s19 + $0x418] sm:$0xff] %v338_v19 }
  0x36   : >> { %341 = vst [vmem:[%s4479_s19 + $0x420] sm:$0xff] %v340_v20 }
  0x37   : >> { %343 = vst [vmem:[%s4479_s19 + $0x428] sm:$0xff] %v342_v21 }
  0x38   : >> { %345 = vst [vmem:[%s4479_s19 + $0x430] sm:$0xff] %v344_v22 }
  0x39   : >> { %347 = vst [vmem:[%s4479_s19 + $0x438] sm:$0xff] %v346_v23 }
  0x3a   : >> { %349 = vst [vmem:[%s4479_s19 + $0x600] sm:$0xff] %v348_v24 }
  0x3b   : >> { %351 = vst [vmem:[%s4479_s19 + $0x608] sm:$0xff] %v350_v25 }
  0x3c   : >> { %353 = vst [vmem:[%s4479_s19 + $0x610] sm:$0xff] %v352_v26 }
  0x3d   : >> { %355 = vst [vmem:[%s4479_s19 + $0x618] sm:$0xff] %v354_v27  ;;  %296 = sbr.rel (!%p293_p12) target bundleno = 33 (0x21), region = 161 }
  0x3e   : >> { %357 = vst [vmem:[%s4479_s19 + $0x620] sm:$0xff] %v356_v28 }
  0x3f   : >> { %359 = vst [vmem:[%s4479_s19 + $0x628] sm:$0xff] %v358_v29 }
  0x40   : >> { %361 = vst [vmem:[%s4479_s19 + $0x630] sm:$0xff] %v360_v30 }
  0x41   : >> { %363 = vst [vmem:[%s4479_s19 + $0x638] sm:$0xff] %v362_v31  ;;  %s8912_s19 = smov %s4646_s27 }
  0x42   : > { %3361 = sbr.rel (%p3432_p13) target bundleno = 79 (0x4f), region = 166  ;;  %s8915_s5 = smov (!%p3432_p13), %s4718_s4 }
  0x43   : > { %s8916_s6 = smov (!%p3432_p13), %s4715_s3  ;;  %s4501_s19 = smov (!%p3432_p13), 0  }
  0x44   : > { %s4505_s20 = smov (!%p3432_p13), 0  }
  0x47 LB: >> { %v387_v32 = vld [vmem:[%s4499_s6] sm:$0xff]  ;;  %s395_s28 = sadd.s32 1, %s4503_s19  ;;  %s381_s20 = sadd.s32 1, %s4507_s20   ;;  %s4507_s20 = sphi %s4505_s20, %s381_s20   ;;  %s4503_s19 = sphi %s4501_s19, %s4502_s19   ;;  %s4499_s6 = sphi %s8916_s6, %s400_s6   ;;  %s4495_s5 = sphi %s8915_s5, %s401_s5  }
  0x48   : >> { %v389_v33 = vld [vmem:[%s4499_s6 + $0x280] sm:$0xff]  ;;  %388 = vst [vmem:[%s4495_s5] sm:$0xff] %v387_v32  ;;  %p396_p0 = scmp.ge.s32.totalorder %s395_s28, %s4711_s29  ;;  %p380_p1 = scmp.ge.s32.totalorder %s381_s20, %s4711_s29 }
  0x49   : >> { %v391_v34 = vld [vmem:[%s4499_s6 + $0x500] sm:$0xff]  ;;  %390 = vst [vmem:[%s4495_s5 + $0x200] sm:$0xff] %v389_v33 }
  0x4a   : >> { %v393_v35 = vld [vmem:[%s4499_s6 + $0x780] sm:$0xff]  ;;  %392 = vst [vmem:[%s4495_s5 + $0x400] sm:$0xff] %v391_v34  ;;  %s9697_s28 = smov (%p396_p0, %s395_s28), 0  ;;  %383 = sbr.rel (!%p380_p1) target bundleno = 71 (0x47), region = 172 }
  0x4b   : >> { %394 = vst [vmem:[%s4495_s5 + $0x600] sm:$0xff] %v393_v35  ;;  %s3433_s7 = sshll.u32 %s9697_s28, 3  ;;  %s4502_s19 = smov %s9697_s28  }
  0x4c   : >> { %s400_s6 = scalar_lea.vmem %s4715_s3, %s3433_s7   ;;  %s401_s5 = scalar_lea.vmem %s4718_s4, %s3433_s7 [#allocation2]  }
  0x4f PF: > { %p3435_p2 = scmp.ge.s32.totalorder %s4475_s15, 1  ;;  %p435_p3 = scmp.lt.s32.totalorder %s4475_s15, 5 }
  0x51   : > { %p436_p4 = pnand %p3435_p2, %p435_p3 }
  0x52   : > { %s442_s8 = sand.u32 (!%p436_p4), 1, %s4451_s9   ;;  %p492_p5 = scmp.lt.s32.totalorder (!%p436_p4), %s4459_s11, 1 }
  0x53   : > { %439 = sbr.rel (%p436_p4) target bundleno = 649 (0x289), region = 76  ;;  %s4741_s18 = sshll.u32 (!%p436_p4), %s442_s8, 11 }
  0x54   : > { %p499_p6 = scmp.lt.s32.totalorder (!%p436_p4), %s4463_s12, 1  ;;  %s444_s6 = scalar_lea.vmem (!%p436_p4), [#allocation2], %s4741_s18 }
  0x55   : > { %p3440_p8 = scmp.ne.s32.totalorder (!%p436_p4), %s4459_s11, 0 }
  0x58   : > { %s493_s21 = scalar_select %p492_p5, %s4459_s11, 1 }
  0x59   : > { %s9699_s12 = smov (!%p499_p6, %s4463_s12), 1 }
  0x5a   : > { %s3437_s22 = sshll.u32 %s493_s21, 6  ;;  %s4250_s23 = smul.u32 80, %s9699_s12 }
  0x5b   : > { %p501_p7 = scmp.lt.s32.totalorder %s3437_s22, 79  ;;  %s4251_s25 = smul.u32 160, %s9699_s12 }
  0x5c   : > { %526 = sbr.rel (%p3440_p8) target bundleno = 118 (0x76), region = 84 }
  0x5d   : > { %s9701_s22 = smov (!%p501_p7, %s3437_s22), 79  ;;  %s4749_s29 = scalar_lea.vmem %s8356_s2, %s4251_s25 }
  0x5e   : > { %s504_s30 = sadd.s32 %s4250_s23, %s9701_s22 }
  0x5f   : > { %s3438_s3 = sshll.u32 %s504_s30, 3 }
  0x60   : > { %s4754_s5 = scalar_lea.vmem %s8355_s1, %s3438_s3 }
  0x61   : > { %v4513_v36 = vmov 0.0  }
  0x62   : > { %527 = vst [vmem:[%s4749_s29] sm:$0xff] %v4513_v36 }
  0x63   : > { %528 = vst [vmem:[%s4749_s29 + $0x8] sm:$0xff] %v4513_v36 }
  0x64   : > { %529 = vst [vmem:[%s4749_s29 + $0x10] sm:$0xff] %v4513_v36 }
  0x65   : > { %530 = vst [vmem:[%s4749_s29 + $0x18] sm:$0xff] %v4513_v36 }
  0x66   : > { %531 = vst [vmem:[%s4749_s29 + $0x20] sm:$0xff] %v4513_v36 }
  0x67   : > { %532 = vst [vmem:[%s4749_s29 + $0x28] sm:$0xff] %v4513_v36 }
  0x68   : > { %533 = vst [vmem:[%s4749_s29 + $0x30] sm:$0xff] %v4513_v36 }
  0x69   : > { %534 = vst [vmem:[%s4749_s29 + $0x38] sm:$0xff] %v4513_v36 }
  0x6a   : > { %535 = vst [vmem:[%s4749_s29 + $0x40] sm:$0xff] %v4513_v36 }
  0x6b   : > { %536 = vst [vmem:[%s4749_s29 + $0x48] sm:$0xff] %v4513_v36 }
  0x6c   : > { %537 = vst [vmem:[%s4749_s29 + $0x50] sm:$0xff] %v4513_v36 }
  0x6d   : > { %538 = vst [vmem:[%s4749_s29 + $0x58] sm:$0xff] %v4513_v36 }
  0x6e   : > { %539 = vst [vmem:[%s4749_s29 + $0x60] sm:$0xff] %v4513_v36 }
  0x6f   : > { %540 = vst [vmem:[%s4749_s29 + $0x68] sm:$0xff] %v4513_v36 }
  0x70   : > { %541 = vst [vmem:[%s4749_s29 + $0x70] sm:$0xff] %v4513_v36 }
  0x71   : > { %542 = vst [vmem:[%s4749_s29 + $0x78] sm:$0xff] %v4513_v36 }
  0x72   : > { %543 = vst [vmem:[%s4749_s29 + $0x80] sm:$0xff] %v4513_v36 }
  0x73   : > { %544 = vst [vmem:[%s4749_s29 + $0x88] sm:$0xff] %v4513_v36 }
  0x74   : > { %545 = vst [vmem:[%s4749_s29 + $0x90] sm:$0xff] %v4513_v36 }
  0x75   : > { %546 = vst [vmem:[%s4749_s29 + $0x98] sm:$0xff] %v4513_v36 }
  0x76 PF: > { %s3441_s12 = sshll.u32 %s4459_s11, 9  ;;  %v550_v37 = vlaneseq  ;;  %s4782_s19 = smov 0  }
  0x78   : > { %v4779_v38 = vshrl.u32 %v550_v37, 7 }
  0x7a   : > { %8917 = vst [vmem:[#allocation3_spill] sm:$0xff] %v4779_v38 }
  0x7b LB: >> { %v4790_v40 = vstv %s3441_s12  ;;  %s3443_s20 = sshll.u32 %s4511_s19, 8  ;;  %v8364_v6 = vmov 0   ;;  %v8362_v33 = vmov 0.0   ;;  %s560_s19 = sadd.s32 1, %s4511_s19   ;;  %s4511_s19 = sphi %s4782_s19, %s560_s19  }
  0x7c   : >> { %s4799_s28 = scalar_lea.vmem %s4754_s5, %s3443_s20  ;;  %s4803_s7 = scalar_lea.vmem %s444_s6, %s3443_s20 [#allocation2]  ;;  %v4805_v46 = vstv %s3443_s20 }
  0x7d   : >> { %v578_v49 = vld [vmem:[%s4799_s28 + $0x78] sm:$0xff]  ;;  %v577_v21 = vld [vmem:[%s4799_s28 + $0x70] sm:$0xff]  ;;  %p557_p9 = scmp.ge.s32.totalorder %s560_s19, 2  }
  0x7e   : >> { %v611_v50 = vld [vmem:[%s4803_s7 + $0x78] sm:$0xff]  ;;  %v610_v22 = vld [vmem:[%s4803_s7 + $0x70] sm:$0xff] }
  0x7f   : >> { %v3460_v51 = vld [vmem:[%s4803_s7 + $0x278] sm:$0xff]  ;;  %v3459_v29 = vld [vmem:[%s4803_s7 + $0x270] sm:$0xff] }
  0x80   : >> { %v3493_v53 = vld [vmem:[%s4803_s7 + $0x478] sm:$0xff]  ;;  %v3492_v30 = vld [vmem:[%s4803_s7 + $0x470] sm:$0xff] }
  0x81   : >> { %v8918_v38 = vld [vmem:[#allocation3_spill] sm:$0xff]  ;;  %v3526_v54 = vld [vmem:[%s4803_s7 + $0x678] sm:$0xff]  ;;  %v3525_v37 = vld [vmem:[%s4803_s7 + $0x670] sm:$0xff] }
  0x82   : >> { %v744_v39 = vadd.s32 120, %v8918_v38  ;;  %v760_v41 = vadd.s32 248, %v8918_v38  ;;  %v743_v42 = vadd.s32 112, %v8918_v38  ;;  %v759_v44 = vadd.s32 240, %v8918_v38  ;;  %v594_v59 = vld [vmem:[%s4799_s28 + $0xf8] sm:$0xff] }
  0x83   : >> { %v742_v45 = vadd.s32 104, %v8918_v38  ;;  %v758_v56 = vadd.s32 232, %v8918_v38  ;;  %v741_v57 = vadd.s32 96, %v8918_v38  ;;  %v4821_v58 = vadd.s32 224, %v8918_v38  ;;  %v627_v3 = vld [vmem:[%s4803_s7 + $0xf8] sm:$0xff] }
  0x84   : >> { %v777_v43 = vadd.s32 %v4790_v40, %v744_v39  ;;  %v793_v47 = vadd.s32 %v4790_v40, %v760_v41  ;;  %v776_v48 = vadd.s32 %v4790_v40, %v743_v42  ;;  %v792_v61 = vadd.s32 %v4790_v40, %v759_v44  ;;  %v3476_v9 = vld [vmem:[%s4803_s7 + $0x2f8] sm:$0xff]  ;;  %v593_v44 = vld [vmem:[%s4799_s28 + $0xf0] sm:$0xff] }
  0x85   : >> { %v775_v62 = vadd.s32 %v4790_v40, %v742_v45  ;;  %v3509_v10 = vld [vmem:[%s4803_s7 + $0x4f8] sm:$0xff]  ;;  %v791_v13 = vadd.s32 %v4790_v40, %v758_v56  ;;  %v4867_v18 = vadd.s32 %v4790_v40, %v741_v57  ;;  %vm9089_vm0 = vcmp.eq.s32.totalorder %v8918_v38, 0 }
  0x86   : >> { %v810_v52 = vadd.s32 %v4805_v46, %v777_v43  ;;  %v4816_v55 = vadd.s32 %v4805_v46, %v793_v47  ;;  %v4825_v60 = vadd.s32 %v4805_v46, %v776_v48  ;;  %v3542_v16 = vld [vmem:[%s4803_s7 + $0x6f8] sm:$0xff]  ;;  %v4864_v17 = vadd.s32 %v4805_v46, %v792_v61  ;;  %v576_v61 = vld [vmem:[%s4799_s28 + $0x68] sm:$0xff] }
  0x87   : >> { %v4912_v39 = vadd.s32 %v4805_v46, %v775_v62  ;;  %v4930_v45 = vadd.s32 %v4805_v46, %v791_v13  ;;  %v3541_v62 = vld [vmem:[%s4803_s7 + $0x6f0] sm:$0xff]  ;;  %v3458_v13 = vld [vmem:[%s4803_s7 + $0x268] sm:$0xff] }
  0x88   : >> { %vm842_vm1 = vcmp.lt.s32.totalorder %v810_v52, 640  ;;  %vm858_vm4 = vcmp.lt.s32.totalorder %v4816_v55, 640  ;;  %vm841_vm10 = vcmp.lt.s32.totalorder %v4825_v60, 640  ;;  %v3475_v52 = vld [vmem:[%s4803_s7 + $0x2f0] sm:$0xff] }
  0x89   : >> { %v874_v63 = vsel %vm842_vm1, %v578_v49, 4294967295  ;;  %v4831_v0 = vsel %vm842_vm1, %v611_v50, 0.0  ;;  %v4834_v1 = vsel %vm842_vm1, %v3460_v51, 0.0  ;;  %v4837_v2 = vsel %vm842_vm1, %v3493_v53, 0.0  ;;  %v626_v51 = vld [vmem:[%s4803_s7 + $0xf0] sm:$0xff] }
  0x8a   : >> { %8919 = vst [vmem:[#allocation4_spill] sm:$0xff] %v4831_v0  ;;  %vm906_vm2 = vcmp.eq.s32.totalorder %v874_v63, 4  ;;  %v4841_v4 = vsel %vm842_vm1, %v3526_v54, 0.0  ;;  %vm1098_vm3 = vcmp.gt.f32.partialorder %v4834_v1, %v4831_v0  ;;  %v890_v11 = vsel %vm858_vm4, %v594_v59, 4294967295  ;;  %v3508_v54 = vld [vmem:[%s4803_s7 + $0x4f0] sm:$0xff] }
  0x8b   : >> { %8920 = vst [vmem:[#allocation5_spill] sm:$0xff] %v4834_v1  ;;  %v4846_v5 = vsel %vm906_vm2, 3, %v874_v63  ;;  %v1130_v7 = vsel %vm1098_vm3, 1, %v8364_v6  ;;  %v1162_v8 = vsel %vm1098_vm3, %v4834_v1, %v4831_v0  ;;  %vm922_vm6 = vcmp.eq.s32.totalorder %v890_v11, 4 }
  0x8c   : >> { %8921 = vst [vmem:[#allocation6_spill] sm:$0xff] %v4837_v2  ;;  %vm1194_vm5 = vcmp.gt.f32.partialorder %v4837_v2, %v1162_v8  ;;  %v4858_v12 = vsel %vm858_vm4, %v627_v3, 0.0  ;;  %vm8370_vm8 = vcmp.eq.s32.totalorder %v4846_v5, 0  ;;  %v4873_v19 = vsel %vm858_vm4, %v3476_v9, 0.0  ;;  %v609_v9 = vld [vmem:[%s4803_s7 + $0x68] sm:$0xff] }
  0x8d   : >> { %8922 = vst [vmem:[#allocation7_spill] sm:$0xff] %v4841_v4  ;;  %v1226_v14 = vsel %vm1194_vm5, 2, %v1130_v7  ;;  %v1258_v15 = vsel %vm1194_vm5, %v4837_v2, %v1162_v8  ;;  %v4877_v20 = vsel %vm858_vm4, %v3509_v10, 0.0  ;;  %v4881_v24 = vsel %vm922_vm6, 3, %v890_v11  ;;  %v3455_v2 = vld [vmem:[%s4803_s7 + $0x250] sm:$0xff] }
  0x8e   : >> { %8923 = vst [vmem:[#allocation8_spill] sm:$0xff] %v4846_v5  ;;  %vm1290_vm7 = vcmp.gt.f32.partialorder %v4841_v4, %v1258_v15  ;;  %vm1114_vm9 = vcmp.gt.f32.partialorder %v4873_v19, %v4858_v12  ;;  %v4891_v26 = vsel %vm858_vm4, %v3542_v16, 0.0  ;;  %v873_v31 = vsel %vm841_vm10, %v577_v21, 4294967295  ;;  %v3491_v21 = vld [vmem:[%s4803_s7 + $0x468] sm:$0xff]  ;;  %v606_v4 = vld [vmem:[%s4803_s7 + $0x50] sm:$0xff] }
  0x8f   : >> { %8924 = vst [vmem:[#allocation9_spill] sm:$0xff] %v4858_v12  ;;  %v1322_v23 = vsel %vm1290_vm7, 3, %v1226_v14  ;;  %v1146_v27 = vsel %vm1114_vm9, 1, %v8364_v6  ;;  %v1178_v28 = vsel %vm1114_vm9, %v4873_v19, %v4858_v12  ;;  %v4904_v32 = vsel %vm841_vm10, %v610_v22, 0.0 }
  0x90   : >> { %8925 = vst [vmem:[#allocation10_spill] sm:$0xff] %v4873_v19  ;;  %v4887_v25 = vsel %vm842_vm1, %v1322_v23, 4294967295  ;;  %vm1210_vm12 = vcmp.gt.f32.partialorder %v4877_v20, %v1178_v28  ;;  %vm905_vm14 = vcmp.eq.s32.totalorder %v873_v31, 4  ;;  %v4919_v41 = vsel %vm841_vm10, %v3459_v29, 0.0  ;;  %v3524_v23 = vld [vmem:[%s4803_s7 + $0x668] sm:$0xff] }
  0x91   : >> { %8926 = vst [vmem:[#allocation11_spill] sm:$0xff] %v4877_v20  ;;  %vm1418_vm11 = vcmp.eq.s32.totalorder %v4887_v25, 0  ;;  %v1242_v35 = vsel %vm1210_vm12, 2, %v1146_v27  ;;  %v1274_v36 = vsel %vm1210_vm12, %v4877_v20, %v1178_v28  ;;  %v4923_v42 = vsel %vm841_vm10, %v3492_v30, 0.0 }
  0x92   : >> { %8927 = vst [vmem:[#allocation12_spill] sm:$0xff] %v4881_v24  ;;  %v3590_v34 = vsel %vm1418_vm11, 1.0, %v8362_v33  ;;  %vm1306_vm13 = vcmp.gt.f32.partialorder %v4891_v26, %v1274_v36  ;;  %vm8357_vm15 = vcmp.eq.s32.totalorder %v4881_v24, 0  ;;  %vm1097_vm1 = vcmp.gt.f32.partialorder %v4919_v41, %v4904_v32 }
  0x93   : >> { %8928 = vst [vmem:[#allocation13_spill] sm:$0xff] %v4891_v26  ;;  %3646 = vmatpush.msk.msra.mxu2 %vm8370_vm8, %v3590_v34  ;;  %v1338_v43 = vsel %vm1306_vm13, 3, %v1242_v35  ;;  %v4938_v48 = vsel %vm841_vm10, %v3525_v37, 0.0  ;;  %v1129_v49 = vsel %vm1097_vm1, 1, %v8364_v6  ;;  %v1161_v50 = vsel %vm1097_vm1, %v4919_v41, %v4904_v32  ;;  %v592_v34 = vld [vmem:[%s4799_s28 + $0xe8] sm:$0xff] }
  0x94   : >> { %8929 = vst [vmem:[#allocation14_spill] sm:$0xff] %v4904_v32  ;;  %v4934_v47 = vsel %vm858_vm4, %v1338_v43, 4294967295  ;;  %v4946_v53 = vsel %vm905_vm14, 3, %v873_v31  ;;  %vm1193_vm3 = vcmp.gt.f32.partialorder %v4923_v42, %v1161_v50  ;;  %vm857_vm4 = vcmp.lt.s32.totalorder %v4864_v17, 640 }
  0x95   : >> { %8930 = vst [vmem:[#allocation15_spill] sm:$0xff] %v4919_v41  ;;  %vm8459_vm2 = vcmp.eq.s32.totalorder %v4934_v47, 0  ;;  %v1225_v56 = vsel %vm1193_vm3, 2, %v1129_v49  ;;  %v1257_v57 = vsel %vm1193_vm3, %v4923_v42, %v1161_v50  ;;  %v889_v59 = vsel %vm857_vm4, %v593_v44, 4294967295  ;;  %v625_v44 = vld [vmem:[%s4803_s7 + $0xe8] sm:$0xff] }
  0x96   : >> { %8931 = vst [vmem:[#allocation16_spill] sm:$0xff] %v4923_v42  ;;  %v3606_v55 = vsel %vm8459_vm2, 1.0, %v8362_v33  ;;  %vm1289_vm5 = vcmp.gt.f32.partialorder %v4938_v48, %v1257_v57  ;;  %vm921_vm6 = vcmp.eq.s32.totalorder %v889_v59, 4  ;;  %v4964_v63 = vsel %vm857_vm4, %v626_v51, 0.0  ;;  %v3474_v51 = vld [vmem:[%s4803_s7 + $0x2e8] sm:$0xff]  ;;  %v3521_v42 = vld [vmem:[%s4803_s7 + $0x650] sm:$0xff] }
  0x97   : >> { %8932 = vst [vmem:[#allocation17_spill] sm:$0xff] %v4938_v48  ;;  %3663 = vmatpush.msk.msra.mxu3 %vm8357_vm15, %v3606_v55  ;;  %v4968_v3 = vsel %vm857_vm4, %v3475_v52, 0.0  ;;  %v1321_v7 = vsel %vm1289_vm5, 3, %v1225_v56  ;;  %vm8377_vm7 = vcmp.eq.s32.totalorder %v4946_v53, 0  ;;  %v4973_v8 = vsel %vm857_vm4, %v3508_v54, 0.0  ;;  %v3507_v52 = vld [vmem:[%s4803_s7 + $0x4e8] sm:$0xff] }
  0x98   : >> { %8933 = vst [vmem:[#allocation18_spill] sm:$0xff] %v4946_v53  ;;  %vm840_vm9 = vcmp.lt.s32.totalorder %v4912_v39, 640  ;;  %v4979_v10 = vsel %vm841_vm10, %v1321_v7, 4294967295  ;;  %v4981_v11 = vsel %vm921_vm6, 3, %v889_v59  ;;  %vm1113_vm12 = vcmp.gt.f32.partialorder %v4968_v3, %v4964_v63  ;;  %v3540_v57 = vld [vmem:[%s4803_s7 + $0x6e8] sm:$0xff] }
  0x99   : >> { %8934 = vst [vmem:[#allocation19_spill] sm:$0xff] %v4964_v63  ;;  %v872_v14 = vsel %vm840_vm9, %v576_v61, 4294967295  ;;  %vm1417_vm13 = vcmp.eq.s32.totalorder %v4979_v10, 0  ;;  %v4991_v15 = vsel %vm857_vm4, %v3541_v62, 0.0  ;;  %v1145_v16 = vsel %vm1113_vm12, 1, %v8364_v6  ;;  %v3512_v53 = vld [vmem:[%s4803_s7 + $0x608] sm:$0xff] }
  0x9a   : >> { %8935 = vst [vmem:[#allocation20_spill] sm:$0xff] %v4968_v3  ;;  %v1177_v60 = vsel %vm1113_vm12, %v4968_v3, %v4964_v63  ;;  %v3589_v22 = vsel %vm1417_vm13, 1.0, %v8362_v33  ;;  %v5004_v27 = vsel %vm840_vm9, %v609_v9, 0.0  ;;  %v5008_v28 = vadd.s32 %v4805_v46, %v4867_v18  ;;  %v3516_v63 = vld [vmem:[%s4803_s7 + $0x628] sm:$0xff] }
  0x9b   : >> { %8936 = vst [vmem:[#allocation21_spill] sm:$0xff] %v4973_v8  ;;  %vm1209_vm10 = vcmp.gt.f32.partialorder %v4973_v8, %v1177_v60  ;;  %3647 = vmatpush.msk.msra.mxu2 %vm8377_vm7, %v3589_v22  ;;  %vm904_vm14 = vcmp.eq.s32.totalorder %v872_v14, 4  ;;  %v5015_v31 = vsel %vm840_vm9, %v3458_v13, 0.0  ;;  %vm8358_vm3 = vcmp.eq.s32.totalorder %v4981_v11, 0  ;;  %v3457_v22 = vld [vmem:[%s4803_s7 + $0x260] sm:$0xff] }
  0x9c   : >> { %8937 = vst [vmem:[#allocation22_spill] sm:$0xff] %v4979_v10  ;;  %v1241_v29 = vsel %vm1209_vm10, 2, %v1145_v16  ;;  %v1273_v30 = vsel %vm1209_vm10, %v4973_v8, %v1177_v60  ;;  %v5021_v18 = vsel %vm840_vm9, %v3491_v21, 0.0  ;;  %vm1096_vm5 = vcmp.gt.f32.partialorder %v5015_v31, %v5004_v27  ;;  %v575_v16 = vld [vmem:[%s4799_s28 + $0x60] sm:$0xff] }
  0x9d   : >> { %8938 = vst [vmem:[#allocation23_spill] sm:$0xff] %v4981_v11  ;;  %vm1305_vm1 = vcmp.gt.f32.partialorder %v4991_v15, %v1273_v30  ;;  %v5028_v36 = vsel %vm840_vm9, %v3524_v23, 0.0  ;;  %v1128_v37 = vsel %vm1096_vm5, 1, %v8364_v6  ;;  %v1160_v43 = vsel %vm1096_vm5, %v5015_v31, %v5004_v27  ;;  %v608_v60 = vld [vmem:[%s4803_s7 + $0x60] sm:$0xff] }
  0x9e   : >> { %8939 = vst [vmem:[#allocation24_spill] sm:$0xff] %v4991_v15  ;;  %v1337_v35 = vsel %vm1305_vm1, 3, %v1241_v29  ;;  %v5038_v50 = vsel %vm904_vm14, 3, %v872_v14  ;;  %vm1192_vm6 = vcmp.gt.f32.partialorder %v5021_v18, %v1160_v43  ;;  %vm856_vm12 = vcmp.lt.s32.totalorder %v4930_v45, 640  ;;  %v3490_v23 = vld [vmem:[%s4803_s7 + $0x460] sm:$0xff]  ;;  %v3489_v15 = vld [vmem:[%s4803_s7 + $0x458] sm:$0xff] }
  0x9f   : >> { %8940 = vst [vmem:[#allocation25_spill] sm:$0xff] %v5004_v27  ;;  %v5036_v49 = vsel %vm857_vm4, %v1337_v35, 4294967295  ;;  %v1224_v54 = vsel %vm1192_vm6, 2, %v1128_v37  ;;  %v1256_v55 = vsel %vm1192_vm6, %v5021_v18, %v1160_v43  ;;  %v888_v56 = vsel %vm856_vm12, %v592_v34, 4294967295  ;;  %v3523_v37 = vld [vmem:[%s4803_s7 + $0x660] sm:$0xff] }
  0xa0   : >> { %8941 = vst [vmem:[#allocation26_spill] sm:$0xff] %v5015_v31  ;;  %vm8435_vm10 = vcmp.eq.s32.totalorder %v5036_v49, 0  ;;  %vm1288_vm4 = vcmp.gt.f32.partialorder %v5028_v36, %v1256_v55  ;;  %vm920_vm14 = vcmp.eq.s32.totalorder %v888_v56, 4  ;;  %v5055_v59 = vsel %vm856_vm12, %v625_v44, 0.0  ;;  %v591_v45 = vld [vmem:[%s4799_s28 + $0xe0] sm:$0xff] }
  0xa1   : >> { %8942 = vst [vmem:[#allocation27_spill] sm:$0xff] %v5021_v18  ;;  %v3605_v17 = vsel %vm8435_vm10, 1.0, %v8362_v33  ;;  %v1320_v61 = vsel %vm1288_vm4, 3, %v1224_v54  ;;  %v5061_v62 = vsel %vm856_vm12, %v3474_v51, 0.0  ;;  %v5065_v7 = vsel %vm856_vm12, %v3507_v52, 0.0 }
  0xa2   : >> { %8943 = vst [vmem:[#allocation28_spill] sm:$0xff] %v5028_v36  ;;  %3664 = vmatpush.msk.msra.mxu3 %vm8358_vm3, %v3605_v17  ;;  %v790_v9 = vadd.s32 %v4790_v40, %v4821_v58  ;;  %v5071_v13 = vsel %vm840_vm9, %v1320_v61, 4294967295  ;;  %vm8378_vm1 = vcmp.eq.s32.totalorder %v5038_v50, 0  ;;  %v5074_v14 = vsel %vm920_vm14, 3, %v888_v56 }
  0xa3   : >> { %8944 = vst [vmem:[#allocation29_spill] sm:$0xff] %v5036_v49  ;;  %vm1112_vm5 = vcmp.gt.f32.partialorder %v5061_v62, %v5055_v59  ;;  %vm1416_vm6 = vcmp.eq.s32.totalorder %v5071_v13, 0  ;;  %v5083_v21 = vsel %vm856_vm12, %v3540_v57, 0.0  ;;  %vm839_vm4 = vcmp.lt.s32.totalorder %v5008_v28, 640 }
  0xa4   : >> { %8945 = vst [vmem:[#allocation30_spill] sm:$0xff] %v5038_v50  ;;  %v1144_v58 = vsel %vm1112_vm5, 1, %v8364_v6  ;;  %v1176_v39 = vsel %vm1112_vm5, %v5061_v62, %v5055_v59  ;;  %v3588_v29 = vsel %vm1416_vm6, 1.0, %v8362_v33  ;;  %v8360_v35 = vmov 1.0   ;;  %v3530_v50 = vld [vmem:[%s4803_s7 + $0x698] sm:$0xff] }
  0xa5   : >> { %8946 = vst [vmem:[#allocation31_spill] sm:$0xff] %v5055_v59  ;;  %vm1208_vm9 = vcmp.gt.f32.partialorder %v5065_v7, %v1176_v39  ;;  %3648 = vmatpush.msk.msra.mxu2 %vm8378_vm1, %v3588_v29  ;;  %3610 = vmatpush.msk.msra.mxu0 %vm8370_vm8, %v8360_v35  ;;  %v871_v43 = vsel %vm839_vm4, %v575_v16, 4294967295  ;;  %v5106_v44 = vsel %vm839_vm4, %v608_v60, 0.0  ;;  %v5114_v51 = vsel %vm839_vm4, %v3457_v22, 0.0  ;;  %v624_v16 = vld [vmem:[%s4803_s7 + $0xe0] sm:$0xff]  ;;  %v3503_v59 = vld [vmem:[%s4803_s7 + $0x4c8] sm:$0xff] }
  0xa6   : >> { %8947 = vst [vmem:[#allocation32_spill] sm:$0xff] %v5061_v62  ;;  %v1240_v30 = vsel %vm1208_vm9, 2, %v1144_v58  ;;  %v1272_v34 = vsel %vm1208_vm9, %v5065_v7, %v1176_v39  ;;  %3627 = vmatpush.msk.msra.mxu1 %vm8357_vm15, %v8360_v35  ;;  %vm903_vm5 = vcmp.eq.s32.totalorder %v871_v43, 4  ;;  %v5118_v52 = vsel %vm839_vm4, %v3490_v23, 0.0  ;;  %v3473_v60 = vld [vmem:[%s4803_s7 + $0x2e0] sm:$0xff] }
  0xa7   : >> { %8948 = vst [vmem:[#allocation33_spill] sm:$0xff] %v5065_v7  ;;  %vm1304_vm14 = vcmp.gt.f32.partialorder %v5083_v21, %v1272_v34  ;;  %vm8359_vm9 = vcmp.eq.s32.totalorder %v5074_v14, 0  ;;  %v5121_v55 = vsel %vm903_vm5, 3, %v871_v43  ;;  %vm1095_vm15 = vcmp.gt.f32.partialorder %v5114_v51, %v5106_v44  ;;  %3611 = vmatpush.msk.msra.mxu0 %vm8377_vm7, %v8360_v35  ;;  %v3506_v29 = vld [vmem:[%s4803_s7 + $0x4e0] sm:$0xff] }
  0xa8   : >> { %8949 = vst [vmem:[#allocation34_spill] sm:$0xff] %v5071_v13  ;;  %v1336_v54 = vsel %vm1304_vm14, 3, %v1240_v30  ;;  %v5134_v17 = vsel %vm839_vm4, %v3523_v37, 0.0  ;;  %v1127_v57 = vsel %vm1095_vm15, 1, %v8364_v6  ;;  %v1159_v61 = vsel %vm1095_vm15, %v5114_v51, %v5106_v44  ;;  %3628 = vmatpush.msk.msra.mxu1 %vm8358_vm3, %v8360_v35  ;;  %v3539_v30 = vld [vmem:[%s4803_s7 + $0x6e0] sm:$0xff] }
  0xa9   : >> { %8950 = vst [vmem:[#allocation35_spill] sm:$0xff] %v5074_v14  ;;  %v5130_v56 = vsel %vm856_vm12, %v1336_v54, 4294967295  ;;  %vm1191_vm12 = vcmp.gt.f32.partialorder %v5118_v52, %v1159_v61  ;;  %vm8410_vm5 = vcmp.eq.s32.totalorder %v5121_v55, 0  ;;  %v823_v58 = vadd.s32 %v4805_v46, %v790_v9  ;;  %3612 = vmatpush.msk.msra.mxu0 %vm8378_vm1, %v8360_v35 }
  0xaa   : >> { %8951 = vst [vmem:[#allocation36_spill] sm:$0xff] %v5083_v21  ;;  %vm8405_vm14 = vcmp.eq.s32.totalorder %v5130_v56, 0  ;;  %v1223_v22 = vsel %vm1191_vm12, 2, %v1127_v57  ;;  %v1255_v23 = vsel %vm1191_vm12, %v5118_v52, %v1159_v61  ;;  %v740_v34 = vadd.s32 88, %v8918_v38  ;;  %3629 = vmatpush.msk.msra.mxu1 %vm8359_vm9, %v8360_v35 }
  0xab   : >> { %8952 = vst [vmem:[#allocation37_spill] sm:$0xff] %v5106_v44  ;;  %v3604_v39 = vsel %vm8405_vm14, 1.0, %v8362_v33  ;;  %vm1287_vm15 = vcmp.gt.f32.partialorder %v5134_v17, %v1255_v23  ;;  %vm855_vm3 = vcmp.lt.s32.totalorder %v823_v58, 640  ;;  %v756_v9 = vadd.s32 216, %v8918_v38  ;;  %3613 = vmatpush.msk.msra.mxu0 %vm8410_vm5, %v8360_v35  ;;  %v3472_v58 = vld [vmem:[%s4803_s7 + $0x2d8] sm:$0xff] }
  0xac   : >> { %8953 = vst [vmem:[#allocation38_spill] sm:$0xff] %v5114_v51  ;;  %3665 = vmatpush.msk.msra.mxu3 %vm8359_vm9, %v3604_v39  ;;  %v739_v37 = vadd.s32 80, %v8918_v38  ;;  %v1319_v43 = vsel %vm1287_vm15, 3, %v1223_v22  ;;  %v887_v54 = vsel %vm855_vm3, %v591_v45, 4294967295  ;;  %v5172_v57 = vsel %vm855_vm3, %v624_v16, 0.0 }
  0xad   : >> { %8954 = vst [vmem:[#allocation39_spill] sm:$0xff] %v5118_v52  ;;  %v5175_v61 = vsel %vm855_vm3, %v3473_v60, 0.0  ;;  %v5179_v39 = vsel %vm839_vm4, %v1319_v43, 4294967295  ;;  %vm919_vm12 = vcmp.eq.s32.totalorder %v887_v54, 4  ;;  %v5182_v23 = vsel %vm855_vm3, %v3506_v29, 0.0  ;;  %v607_v43 = vld [vmem:[%s4803_s7 + $0x58] sm:$0xff] }
  0xae   : >> { %8955 = vst [vmem:[#allocation40_spill] sm:$0xff] %v5121_v55  ;;  %v5185_v22 = vsel %vm855_vm3, %v3539_v30, 0.0  ;;  %vm8678_vm15 = vcmp.eq.s32.totalorder %v5179_v39, 0  ;;  %v5188_v45 = vsel %vm919_vm12, 3, %v887_v54  ;;  %vm1111_vm9 = vcmp.gt.f32.partialorder %v5175_v61, %v5172_v57  ;;  %v574_v30 = vld [vmem:[%s4799_s28 + $0x58] sm:$0xff]  ;;  %v3520_v52 = vld [vmem:[%s4803_s7 + $0x648] sm:$0xff] }
  0xaf   : >> { %8956 = vst [vmem:[#allocation41_spill] sm:$0xff] %v5130_v56  ;;  %v773_v28 = vadd.s32 %v4790_v40, %v740_v34  ;;  %v3587_v16 = vsel %vm8678_vm15, 1.0, %v8362_v33  ;;  %v1143_v60 = vsel %vm1111_vm9, 1, %v8364_v6  ;;  %v1175_v29 = vsel %vm1111_vm9, %v5175_v61, %v5172_v57  ;;  %v3456_v34 = vld [vmem:[%s4803_s7 + $0x258] sm:$0xff] }
  0xb0   : >> { %8957 = vst [vmem:[#allocation42_spill] sm:$0xff] %v5134_v17  ;;  %vm8389_vm4 = vcmp.eq.s32.totalorder %v5188_v45, 0  ;;  %3649 = vmatpush.msk.msra.mxu2 %vm8410_vm5, %v3587_v16  ;;  %vm1207_vm12 = vcmp.gt.f32.partialorder %v5182_v23, %v1175_v29  ;;  %v789_v35 = vadd.s32 %v4790_v40, %v756_v9  ;;  %v8964_v33 = vmov 1.0   ;;  %v3522_v16 = vld [vmem:[%s4803_s7 + $0x658] sm:$0xff] }
  0xb1   : >> { %8958 = vst [vmem:[#allocation43_spill] sm:$0xff] %v5172_v57  ;;  %v806_v54 = vadd.s32 %v4805_v46, %v773_v28  ;;  %3630 = vmatpush.msk.msra.mxu1 %vm8389_vm4, %v8964_v33  ;;  %v1239_v6 = vsel %vm1207_vm12, 2, %v1143_v60  ;;  %v1271_v26 = vsel %vm1207_vm12, %v5182_v23, %v1175_v29  ;;  %v772_v9 = vadd.s32 %v4790_v40, %v739_v37  ;;  %v623_v37 = vld [vmem:[%s4803_s7 + $0xd8] sm:$0xff] }
  0xb2   : >> { %8959 = vst [vmem:[#allocation44_spill] sm:$0xff] %v5175_v61  ;;  %vm1303_vm9 = vcmp.gt.f32.partialorder %v5185_v22, %v1271_v26  ;;  %v5216_v21 = vadd.s32 %v4805_v46, %v789_v35  ;;  %v573_v61 = vld [vmem:[%s4799_s28 + $0x50] sm:$0xff]  ;;  %v754_v31 = vadd.s32 200, %v8918_v38  ;;  %v753_v12 = vadd.s32 192, %v8918_v38 }
  0xb3   : >> { %8960 = vst [vmem:[#allocation45_spill] sm:$0xff] %v5179_v39  ;;  %vm838_vm8 = vcmp.lt.s32.totalorder %v806_v54, 640  ;;  %v1335_v28 = vsel %vm1303_vm9, 3, %v1239_v6  ;;  %v590_v6 = vld [vmem:[%s4799_s28 + $0xd8] sm:$0xff]  ;;  %v3488_v54 = vld [vmem:[%s4803_s7 + $0x450] sm:$0xff] }
  0xb4   : >> { %8961 = vst [vmem:[#allocation46_spill] sm:$0xff] %v5182_v23  ;;  %v870_v20 = vsel %vm838_vm8, %v574_v30, 4294967295  ;;  %v5221_v60 = vsel %vm838_vm8, %v607_v43, 0.0  ;;  %v5224_v29 = vsel %vm838_vm8, %v3456_v34, 0.0  ;;  %v5227_v8 = vsel %vm855_vm3, %v1335_v28, 4294967295 }
  0xb5   : >> { %8962 = vst [vmem:[#allocation47_spill] sm:$0xff] %v5185_v22  ;;  %vm902_vm12 = vcmp.eq.s32.totalorder %v870_v20, 4  ;;  %v5230_v26 = vsel %vm838_vm8, %v3489_v15, 0.0  ;;  %v5233_v35 = vsel %vm838_vm8, %v3522_v16, 0.0  ;;  %vm8392_vm9 = vcmp.eq.s32.totalorder %v5227_v8, 0 }
  0xb6   : >> { %8963 = vst [vmem:[#allocation48_spill] sm:$0xff] %v5188_v45  ;;  %v5238_v30 = vsel %vm902_vm12, 3, %v870_v20  ;;  %vm1094_vm7 = vcmp.gt.f32.partialorder %v5224_v29, %v5221_v60  ;;  %vm854_vm3 = vcmp.lt.s32.totalorder %v5216_v21, 640  ;;  %v8970_v43 = vmov 0.0   ;;  %v3505_v20 = vld [vmem:[%s4803_s7 + $0x4d8] sm:$0xff]  ;;  %v3450_v45 = vld [vmem:[%s4803_s7 + $0x228] sm:$0xff] }
  0xb7   : >> { %8965 = vst [vmem:[#allocation49_spill] sm:$0xff] %v5224_v29  ;;  %v3603_v15 = vsel %vm8392_vm9, 1.0, %v8970_v43  ;;  %v8971_v34 = vmov 0   ;;  %v1158_v28 = vsel %vm1094_vm7, %v5224_v29, %v5221_v60  ;;  %vm8452_vm1 = vcmp.eq.s32.totalorder %v5238_v30, 0 }
  0xb8   : >> { %8966 = vst [vmem:[#allocation50_spill] sm:$0xff] %v5227_v8  ;;  %v1126_v16 = vsel %vm1094_vm7, 1, %v8971_v34  ;;  %3666 = vmatpush.msk.msra.mxu3 %vm8389_vm4, %v3603_v15  ;;  %vm1190_vm12 = vcmp.gt.f32.partialorder %v5230_v26, %v1158_v28  ;;  %v886_v22 = vsel %vm854_vm3, %v590_v6, 4294967295  ;;  %v5259_v7 = vsel %vm854_vm3, %v623_v37, 0.0  ;;  %3614 = vmatpush.msk.msra.mxu0 %vm8452_vm1, %v8964_v33  ;;  %v3538_v15 = vld [vmem:[%s4803_s7 + $0x6d8] sm:$0xff] }
  0xb9   : >> { %8967 = vst [vmem:[#allocation51_spill] sm:$0xff] %v5230_v26  ;;  %v755_v23 = vadd.s32 208, %v8918_v38  ;;  %v1222_v19 = vsel %vm1190_vm12, 2, %v1126_v16  ;;  %v1254_v3 = vsel %vm1190_vm12, %v5230_v26, %v1158_v28  ;;  %vm918_vm7 = vcmp.eq.s32.totalorder %v886_v22, 4 }
  0xba   : >> { %8968 = vst [vmem:[#allocation52_spill] sm:$0xff] %v5233_v35  ;;  %v5269_v6 = vsel %vm854_vm3, %v3472_v58, 0.0  ;;  %vm1286_vm4 = vcmp.gt.f32.partialorder %v5233_v35, %v1254_v3  ;;  %v5272_v37 = vsel %vm918_vm7, 3, %v886_v22  ;;  %v5276_v62 = vsel %vm854_vm3, %v3505_v20, 0.0 }
  0xbb   : >> { %8969 = vst [vmem:[#allocation53_spill] sm:$0xff] %v5238_v30  ;;  %v738_v16 = vadd.s32 72, %v8918_v38  ;;  %v1318_v28 = vsel %vm1286_vm4, 3, %v1222_v19  ;;  %vm1110_vm12 = vcmp.gt.f32.partialorder %v5269_v6, %v5259_v7  ;;  %vm8422_vm9 = vcmp.eq.s32.totalorder %v5272_v37, 0 }
  0xbc   : >> { %8972 = vst [vmem:[#allocation54_spill] sm:$0xff] %v5259_v7  ;;  %v805_v58 = vadd.s32 %v4805_v46, %v772_v9  ;;  %v5285_v3 = vsel %vm838_vm8, %v1318_v28, 4294967295  ;;  %v5289_v22 = vsel %vm854_vm3, %v3538_v15, 0.0  ;;  %v1142_v20 = vsel %vm1110_vm12, 1, %v8971_v34  ;;  %3631 = vmatpush.msk.msra.mxu1 %vm8422_vm9, %v8964_v33 }
  0xbd   : >> { %8973 = vst [vmem:[#allocation55_spill] sm:$0xff] %v5269_v6  ;;  %v1174_v19 = vsel %vm1110_vm12, %v5269_v6, %v5259_v7  ;;  %vm8602_vm4 = vcmp.eq.s32.totalorder %v5285_v3, 0  ;;  %v788_v9 = vadd.s32 %v4790_v40, %v755_v23  ;;  %v734_v7 = vadd.s32 40, %v8918_v38 }
  0xbe   : >> { %8974 = vst [vmem:[#allocation56_spill] sm:$0xff] %v5272_v37  ;;  %vm1206_vm8 = vcmp.gt.f32.partialorder %v5276_v62, %v1174_v19  ;;  %vm837_vm7 = vcmp.lt.s32.totalorder %v805_v58, 640  ;;  %v3586_v15 = vsel %vm8602_vm4, 1.0, %v8970_v43 }
  0xbf   : >> { %8975 = vst [vmem:[#allocation57_spill] sm:$0xff] %v5276_v62  ;;  %v1238_v28 = vsel %vm1206_vm8, 2, %v1142_v20  ;;  %v1270_v6 = vsel %vm1206_vm8, %v5276_v62, %v1174_v19  ;;  %v869_v48 = vsel %vm837_vm7, %v573_v61, 4294967295  ;;  %3650 = vmatpush.msk.msra.mxu2 %vm8452_vm1, %v3586_v15  ;;  %v5313_v23 = vsel %vm837_vm7, %v606_v4, 0.0  ;;  %v589_v4 = vld [vmem:[%s4799_s28 + $0xd0] sm:$0xff] }
  0xc0   : >> { %8976 = vst [vmem:[#allocation58_spill] sm:$0xff] %v5285_v3  ;;  %vm1302_vm12 = vcmp.gt.f32.partialorder %v5289_v22, %v1270_v6  ;;  %vm901_vm14 = vcmp.eq.s32.totalorder %v869_v48, 4  ;;  %v5316_v1 = vsel %vm837_vm7, %v3455_v2, 0.0  ;;  %v5321_v61 = vsel %vm837_vm7, %v3488_v54, 0.0  ;;  %v622_v19 = vld [vmem:[%s4803_s7 + $0xd0] sm:$0xff] }
  0xc1   : >> { %8977 = vst [vmem:[#allocation59_spill] sm:$0xff] %v5289_v22  ;;  %v1334_v20 = vsel %vm1302_vm12, 3, %v1238_v28  ;;  %v5318_v36 = vsel %vm901_vm14, 3, %v869_v48  ;;  %vm1093_vm8 = vcmp.gt.f32.partialorder %v5316_v1, %v5313_v23  ;;  %v821_v2 = vadd.s32 %v4805_v46, %v788_v9  ;;  %v3471_v15 = vld [vmem:[%s4803_s7 + $0x2d0] sm:$0xff] }
  0xc2   : >> { %8978 = vst [vmem:[#allocation60_spill] sm:$0xff] %v5316_v1  ;;  %v5325_v6 = vsel %vm854_vm3, %v1334_v20, 4294967295  ;;  %vm8462_vm5 = vcmp.eq.s32.totalorder %v5318_v36, 0  ;;  %v5335_v48 = vsel %vm837_vm7, %v3521_v42, 0.0  ;;  %v1125_v54 = vsel %vm1093_vm8, 1, %v8971_v34  ;;  %v3504_v28 = vld [vmem:[%s4803_s7 + $0x4d0] sm:$0xff] }
  0xc3   : >> { %8979 = vst [vmem:[#allocation61_spill] sm:$0xff] %v5318_v36  ;;  %vm8419_vm14 = vcmp.eq.s32.totalorder %v5325_v6, 0  ;;  %v1157_v21 = vsel %vm1093_vm8, %v5316_v1, %v5313_v23  ;;  %3615 = vmatpush.msk.msra.mxu0 %vm8462_vm5, %v8964_v33  ;;  %v3537_v20 = vld [vmem:[%s4803_s7 + $0x6d0] sm:$0xff]  ;;  %vm853_vm12 = vcmp.lt.s32.totalorder %v821_v2, 640  ;;  %v771_v42 = vadd.s32 %v4790_v40, %v738_v16 }
  0xc4   : >> { %8980 = vst [vmem:[#allocation62_spill] sm:$0xff] %v5321_v61  ;;  %v3602_v9 = vsel %vm8419_vm14, 1.0, %v8970_v43  ;;  %vm1189_vm3 = vcmp.gt.f32.partialorder %v5321_v61, %v1157_v21  ;;  %v885_v18 = vsel %vm853_vm12, %v589_v4, 4294967295  ;;  %v5356_v41 = vsel %vm853_vm12, %v622_v19, 0.0 }
  0xc5   : >> { %8981 = vst [vmem:[#allocation63_spill] sm:$0xff] %v5325_v6  ;;  %3667 = vmatpush.msk.msra.mxu3 %vm8422_vm9, %v3602_v9  ;;  %v1221_v22 = vsel %vm1189_vm3, 2, %v1125_v54  ;;  %v1253_v62 = vsel %vm1189_vm3, %v5321_v61, %v1157_v21  ;;  %vm917_vm14 = vcmp.eq.s32.totalorder %v885_v18, 4  ;;  %v5360_v17 = vsel %vm853_vm12, %v3471_v15, 0.0  ;;  %v3454_v15 = vld [vmem:[%s4803_s7 + $0x248] sm:$0xff] }
  0xc6   : >> { %8982 = vst [vmem:[#allocation64_spill] sm:$0xff] %v5335_v48  ;;  %vm1285_vm8 = vcmp.gt.f32.partialorder %v5335_v48, %v1253_v62  ;;  %v5363_v16 = vsel %vm853_vm12, %v3504_v28, 0.0  ;;  %v5365_v9 = vsel %vm917_vm14, 3, %v885_v18  ;;  %v5368_v4 = vsel %vm853_vm12, %v3537_v20, 0.0  ;;  %v572_v18 = vld [vmem:[%s4799_s28 + $0x48] sm:$0xff] }
  0xc7   : >> { %8983 = vst [vmem:[#allocation65_spill] sm:$0xff] %v5356_v41  ;;  %v1317_v54 = vsel %vm1285_vm8, 3, %v1221_v22  ;;  %vm1109_vm3 = vcmp.gt.f32.partialorder %v5360_v17, %v5356_v41  ;;  %vm8444_vm8 = vcmp.eq.s32.totalorder %v5365_v9, 0  ;;  %v605_v22 = vld [vmem:[%s4803_s7 + $0x48] sm:$0xff]  ;;  %v804_v28 = vadd.s32 %v4805_v46, %v771_v42 }
  0xc8   : >> { %8984 = vst [vmem:[#allocation66_spill] sm:$0xff] %v5360_v17  ;;  %v5373_v62 = vsel %vm837_vm7, %v1317_v54, 4294967295  ;;  %v1141_v19 = vsel %vm1109_vm3, 1, %v8971_v34  ;;  %v1173_v21 = vsel %vm1109_vm3, %v5360_v17, %v5356_v41  ;;  %3632 = vmatpush.msk.msra.mxu1 %vm8444_vm8, %v8964_v33  ;;  %v3487_v17 = vld [vmem:[%s4803_s7 + $0x448] sm:$0xff]  ;;  %v737_v42 = vadd.s32 64, %v8918_v38 }
  0xc9   : >> { %8985 = vst [vmem:[#allocation67_spill] sm:$0xff] %v5363_v16  ;;  %vm8545_vm14 = vcmp.eq.s32.totalorder %v5373_v62, 0  ;;  %vm1205_vm9 = vcmp.gt.f32.partialorder %v5363_v16, %v1173_v21  ;;  %vm836_vm3 = vcmp.lt.s32.totalorder %v804_v28, 640  ;;  %v787_v2 = vadd.s32 %v4790_v40, %v754_v31  ;;  %v3470_v31 = vld [vmem:[%s4803_s7 + $0x2c8] sm:$0xff]  ;;  %v3453_v28 = vld [vmem:[%s4803_s7 + $0x240] sm:$0xff] }
  0xca   : >> { %8986 = vst [vmem:[#allocation68_spill] sm:$0xff] %v5365_v9  ;;  %v3585_v58 = vsel %vm8545_vm14, 1.0, %v8970_v43  ;;  %v1237_v20 = vsel %vm1205_vm9, 2, %v1141_v19  ;;  %v1269_v54 = vsel %vm1205_vm9, %v5363_v16, %v1173_v21  ;;  %v868_v26 = vsel %vm836_vm3, %v572_v18, 4294967295  ;;  %v3535_v9 = vld [vmem:[%s4803_s7 + $0x6c0] sm:$0xff] }
  0xcb   : >> { %8987 = vst [vmem:[#allocation69_spill] sm:$0xff] %v5368_v4  ;;  %3651 = vmatpush.msk.msra.mxu2 %vm8462_vm5, %v3585_v58  ;;  %vm1301_vm7 = vcmp.gt.f32.partialorder %v5368_v4, %v1269_v54  ;;  %v5402_v19 = vsel %vm836_vm3, %v605_v22, 0.0  ;;  %v5405_v21 = vsel %vm836_vm3, %v3454_v15, 0.0  ;;  %vm900_vm9 = vcmp.eq.s32.totalorder %v868_v26, 4  ;;  %v621_v22 = vld [vmem:[%s4803_s7 + $0xc8] sm:$0xff] }
  0xcc   : >> { %8988 = vst [vmem:[#allocation70_spill] sm:$0xff] %v5373_v62  ;;  %v1333_v35 = vsel %vm1301_vm7, 3, %v1237_v20  ;;  %v5411_v54 = vsel %vm836_vm3, %v3487_v17, 0.0  ;;  %v5414_v20 = vsel %vm836_vm3, %v3520_v52, 0.0  ;;  %v5417_v18 = vsel %vm900_vm9, 3, %v868_v26  ;;  %v588_v26 = vld [vmem:[%s4799_s28 + $0xc8] sm:$0xff] }
  0xcd   : >> { %8989 = vst [vmem:[#allocation71_spill] sm:$0xff] %v5405_v21  ;;  %v5408_v58 = vsel %vm853_vm12, %v1333_v35, 4294967295  ;;  %vm1092_vm10 = vcmp.gt.f32.partialorder %v5405_v21, %v5402_v19  ;;  %vm8522_vm12 = vcmp.eq.s32.totalorder %v5417_v18, 0  ;;  %v820_v15 = vadd.s32 %v4805_v46, %v787_v2 }
  0xce   : >> { %8990 = vst [vmem:[#allocation72_spill] sm:$0xff] %v5408_v58  ;;  %vm8451_vm7 = vcmp.eq.s32.totalorder %v5408_v58, 0  ;;  %v1124_v17 = vsel %vm1092_vm10, 1, %v8971_v34  ;;  %v1156_v52 = vsel %vm1092_vm10, %v5405_v21, %v5402_v19  ;;  %v770_v4 = vadd.s32 %v4790_v40, %v737_v42  ;;  %3616 = vmatpush.msk.msra.mxu0 %vm8522_vm12, %v8964_v33  ;;  %v3469_v21 = vld [vmem:[%s4803_s7 + $0x2c0] sm:$0xff] }
  0xcf   : >> { %8991 = vst [vmem:[#allocation73_spill] sm:$0xff] %v5411_v54  ;;  %v3601_v35 = vsel %vm8451_vm7, 1.0, %v8970_v43  ;;  %vm1188_vm9 = vcmp.gt.f32.partialorder %v5411_v54, %v1156_v52  ;;  %v786_v42 = vadd.s32 %v4790_v40, %v753_v12  ;;  %v571_v12 = vld [vmem:[%s4799_s28 + $0x40] sm:$0xff] }
  0xd0   : >> { %8992 = vst [vmem:[#allocation74_spill] sm:$0xff] %v5414_v20  ;;  %3668 = vmatpush.msk.msra.mxu3 %vm8444_vm8, %v3601_v35  ;;  %v1220_v16 = vsel %vm1188_vm9, 2, %v1124_v17  ;;  %v1252_v51 = vsel %vm1188_vm9, %v5411_v54, %v1156_v52  ;;  %v3536_v35 = vld [vmem:[%s4803_s7 + $0x6c8] sm:$0xff]  ;;  %vm852_vm8 = vcmp.lt.s32.totalorder %v820_v15, 640  ;;  %v5445_v48 = vadd.s32 %v4805_v46, %v770_v4  ;;  %v3502_v15 = vld [vmem:[%s4803_s7 + $0x4c0] sm:$0xff] }
  0xd1   : >> { %8993 = vst [vmem:[#allocation75_spill] sm:$0xff] %v5417_v18  ;;  %vm1284_vm10 = vcmp.gt.f32.partialorder %v5414_v20, %v1252_v51  ;;  %v884_v61 = vsel %vm852_vm8, %v588_v26, 4294967295  ;;  %v5450_v17 = vsel %vm852_vm8, %v621_v22, 0.0  ;;  %v5453_v52 = vsel %vm852_vm8, %v3470_v31, 0.0 }
  0xd2   : >> { %v1316_v2 = vsel %vm1284_vm10, 3, %v1220_v16  ;;  %8994 = vst [vmem:[#allocation76_spill] sm:$0xff] %v5450_v17  ;;  %vm916_vm9 = vcmp.eq.s32.totalorder %v884_v61, 4  ;;  %v5459_v51 = vsel %vm852_vm8, %v3503_v59, 0.0  ;;  %v5462_v4 = vsel %vm852_vm8, %v3536_v35, 0.0  ;;  %v604_v16 = vld [vmem:[%s4803_s7 + $0x40] sm:$0xff] }
  0xd3   : >> { %8995 = vst [vmem:[#allocation77_spill] sm:$0xff] %v5453_v52  ;;  %v5456_v29 = vsel %vm836_vm3, %v1316_v2, 4294967295  ;;  %v5467_v26 = vsel %vm916_vm9, 3, %v884_v61  ;;  %vm1108_vm7 = vcmp.gt.f32.partialorder %v5453_v52, %v5450_v17  ;;  %vm835_vm3 = vcmp.lt.s32.totalorder %v5445_v48, 640  ;;  %v3486_v61 = vld [vmem:[%s4803_s7 + $0x440] sm:$0xff] }
  0xd4   : >> { %8996 = vst [vmem:[#allocation78_spill] sm:$0xff] %v5456_v29  ;;  %vm8475_vm10 = vcmp.eq.s32.totalorder %v5456_v29, 0  ;;  %v1140_v22 = vsel %vm1108_vm7, 1, %v8971_v34  ;;  %v1172_v31 = vsel %vm1108_vm7, %v5453_v52, %v5450_v17  ;;  %vm8480_vm1 = vcmp.eq.s32.totalorder %v5467_v26, 0 }
  0xd5   : >> { %8997 = vst [vmem:[#allocation79_spill] sm:$0xff] %v5459_v51  ;;  %v3584_v59 = vsel %vm8475_vm10, 1.0, %v8970_v43  ;;  %vm1204_vm9 = vcmp.gt.f32.partialorder %v5459_v51, %v1172_v31  ;;  %v867_v35 = vsel %vm835_vm3, %v571_v12, 4294967295  ;;  %v5488_v2 = vsel %vm835_vm3, %v604_v16, 0.0  ;;  %3633 = vmatpush.msk.msra.mxu1 %vm8480_vm1, %v8964_v33 }
  0xd6   : >> { %8998 = vst [vmem:[#allocation80_spill] sm:$0xff] %v5462_v4  ;;  %3652 = vmatpush.msk.msra.mxu2 %vm8522_vm12, %v3584_v59  ;;  %v736_v20 = vadd.s32 56, %v8918_v38  ;;  %v1236_v52 = vsel %vm1204_vm9, 2, %v1140_v22  ;;  %v1268_v1 = vsel %vm1204_vm9, %v5459_v51, %v1172_v31  ;;  %v3519_v59 = vld [vmem:[%s4803_s7 + $0x640] sm:$0xff]  ;;  %vm899_vm7 = vcmp.eq.s32.totalorder %v867_v35, 4 }
  0xd7   : >> { %8999 = vst [vmem:[#allocation81_spill] sm:$0xff] %v5467_v26  ;;  %v5498_v12 = vsel %vm835_vm3, %v3453_v28, 0.0  ;;  %vm1300_vm2 = vcmp.gt.f32.partialorder %v5462_v4, %v1268_v1  ;;  %v5501_v16 = vsel %vm899_vm7, 3, %v867_v35  ;;  %v5505_v54 = vsel %vm835_vm3, %v3486_v61, 0.0  ;;  %v587_v51 = vld [vmem:[%s4799_s28 + $0xc0] sm:$0xff] }
  0xd8   : >> { %9000 = vst [vmem:[#allocation82_spill] sm:$0xff] %v5498_v12  ;;  %v752_v22 = vadd.s32 184, %v8918_v38  ;;  %v1332_v31 = vsel %vm1300_vm2, 3, %v1236_v52  ;;  %vm1091_vm9 = vcmp.gt.f32.partialorder %v5498_v12, %v5488_v2  ;;  %vm8592_vm5 = vcmp.eq.s32.totalorder %v5501_v16, 0  ;;  %v620_v4 = vld [vmem:[%s4803_s7 + $0xc0] sm:$0xff] }
  0xd9   : >> { %9001 = vst [vmem:[#allocation83_spill] sm:$0xff] %v5501_v16  ;;  %v819_v28 = vadd.s32 %v4805_v46, %v786_v42  ;;  %v5514_v1 = vsel %vm852_vm8, %v1332_v31, 4294967295  ;;  %v5518_v35 = vsel %vm835_vm3, %v3519_v59, 0.0  ;;  %v1123_v61 = vsel %vm1091_vm9, 1, %v8971_v34  ;;  %3617 = vmatpush.msk.msra.mxu0 %vm8592_vm5, %v8964_v33 }
  0xda   : >> { %9002 = vst [vmem:[#allocation84_spill] sm:$0xff] %v5505_v54  ;;  %v1155_v52 = vsel %vm1091_vm9, %v5498_v12, %v5488_v2  ;;  %vm8489_vm2 = vcmp.eq.s32.totalorder %v5514_v1, 0  ;;  %v769_v42 = vadd.s32 %v4790_v40, %v736_v20 }
  0xdb   : >> { %9003 = vst [vmem:[#allocation85_spill] sm:$0xff] %v5514_v1  ;;  %vm1187_vm8 = vcmp.gt.f32.partialorder %v5505_v54, %v1155_v52  ;;  %vm851_vm7 = vcmp.lt.s32.totalorder %v819_v28, 640  ;;  %v3600_v59 = vsel %vm8489_vm2, 1.0, %v8970_v43 }
  0xdc   : >> { %9004 = vst [vmem:[#allocation86_spill] sm:$0xff] %v5518_v35  ;;  %v1219_v31 = vsel %vm1187_vm8, 2, %v1123_v61  ;;  %v1251_v12 = vsel %vm1187_vm8, %v5505_v54, %v1155_v52  ;;  %v883_v17 = vsel %vm851_vm7, %v587_v51, 4294967295  ;;  %3669 = vmatpush.msk.msra.mxu3 %vm8480_vm1, %v3600_v59  ;;  %v5542_v20 = vsel %vm851_vm7, %v620_v4, 0.0  ;;  %v570_v4 = vld [vmem:[%s4799_s28 + $0x38] sm:$0xff] }
  0xdd   : >> { %vm1283_vm9 = vcmp.gt.f32.partialorder %v5518_v35, %v1251_v12  ;;  %vm915_vm10 = vcmp.eq.s32.totalorder %v883_v17, 4  ;;  %9005 = vst [vmem:[#allocation87_spill] sm:$0xff] %v5542_v20  ;;  %v5545_v41 = vsel %vm851_vm7, %v3469_v21, 0.0  ;;  %v5550_v51 = vsel %vm851_vm7, %v3502_v15, 0.0  ;;  %v603_v52 = vld [vmem:[%s4803_s7 + $0x38] sm:$0xff] }
  0xde   : >> { %9006 = vst [vmem:[#allocation88_spill] sm:$0xff] %v5545_v41  ;;  %v1315_v61 = vsel %vm1283_vm9, 3, %v1219_v31  ;;  %v5547_v37 = vsel %vm915_vm10, 3, %v883_v17  ;;  %vm1107_vm8 = vcmp.gt.f32.partialorder %v5545_v41, %v5542_v20  ;;  %v802_v21 = vadd.s32 %v4805_v46, %v769_v42  ;;  %v3452_v59 = vld [vmem:[%s4803_s7 + $0x238] sm:$0xff] }
  0xdf   : >> { %9007 = vst [vmem:[#allocation89_spill] sm:$0xff] %v5547_v37  ;;  %v5554_v12 = vsel %vm835_vm3, %v1315_v61, 4294967295  ;;  %vm8505_vm1 = vcmp.eq.s32.totalorder %v5547_v37, 0  ;;  %v5564_v17 = vsel %vm851_vm7, %v3535_v9, 0.0  ;;  %v1139_v15 = vsel %vm1107_vm8, 1, %v8971_v34  ;;  %v3485_v31 = vld [vmem:[%s4803_s7 + $0x438] sm:$0xff] }
  0xe0   : >> { %9008 = vst [vmem:[#allocation90_spill] sm:$0xff] %v5550_v51  ;;  %vm8492_vm10 = vcmp.eq.s32.totalorder %v5554_v12, 0  ;;  %v1171_v48 = vsel %vm1107_vm8, %v5545_v41, %v5542_v20  ;;  %3634 = vmatpush.msk.msra.mxu1 %vm8505_vm1, %v8964_v33  ;;  %v3518_v61 = vld [vmem:[%s4803_s7 + $0x638] sm:$0xff]  ;;  %vm834_vm9 = vcmp.lt.s32.totalorder %v802_v21, 640  ;;  %v785_v9 = vadd.s32 %v4790_v40, %v752_v22 }
  0xe1   : >> { %9009 = vst [vmem:[#allocation91_spill] sm:$0xff] %v5554_v12  ;;  %v3583_v42 = vsel %vm8492_vm10, 1.0, %v8970_v43  ;;  %vm1203_vm3 = vcmp.gt.f32.partialorder %v5550_v51, %v1171_v48  ;;  %v866_v54 = vsel %vm834_vm9, %v570_v4, 4294967295  ;;  %v5585_v20 = vsel %vm834_vm9, %v603_v52, 0.0 }
  0xe2   : >> { %9010 = vst [vmem:[#allocation92_spill] sm:$0xff] %v5564_v17  ;;  %3653 = vmatpush.msk.msra.mxu2 %vm8592_vm5, %v3583_v42  ;;  %v1235_v41 = vsel %vm1203_vm3, 2, %v1139_v15  ;;  %v1267_v35 = vsel %vm1203_vm3, %v5550_v51, %v1171_v48  ;;  %vm898_vm2 = vcmp.eq.s32.totalorder %v866_v54, 4  ;;  %v5589_v26 = vsel %vm834_vm9, %v3452_v59, 0.0  ;;  %v3468_v59 = vld [vmem:[%s4803_s7 + $0x2b8] sm:$0xff] }
  0xe3   : >> { %vm1299_vm8 = vcmp.gt.f32.partialorder %v5564_v17, %v1267_v35  ;;  %9011 = vst [vmem:[#allocation93_spill] sm:$0xff] %v5589_v26  ;;  %v5592_v22 = vsel %vm834_vm9, %v3485_v31, 0.0  ;;  %v5594_v42 = vsel %vm898_vm2, 3, %v866_v54  ;;  %v5597_v4 = vsel %vm834_vm9, %v3518_v61, 0.0  ;;  %v619_v54 = vld [vmem:[%s4803_s7 + $0xb8] sm:$0xff] }
  0xe4   : >> { %9012 = vst [vmem:[#allocation94_spill] sm:$0xff] %v5592_v22  ;;  %v1331_v15 = vsel %vm1299_vm8, 3, %v1235_v41  ;;  %vm1090_vm3 = vcmp.gt.f32.partialorder %v5589_v26, %v5585_v20  ;;  %vm8615_vm8 = vcmp.eq.s32.totalorder %v5594_v42, 0  ;;  %v586_v41 = vld [vmem:[%s4799_s28 + $0xb8] sm:$0xff]  ;;  %v818_v31 = vadd.s32 %v4805_v46, %v785_v9 }
  0xe5   : >> { %9013 = vst [vmem:[#allocation95_spill] sm:$0xff] %v5594_v42  ;;  %v5602_v35 = vsel %vm851_vm7, %v1331_v15, 4294967295  ;;  %v1122_v52 = vsel %vm1090_vm3, 1, %v8971_v34  ;;  %v1154_v48 = vsel %vm1090_vm3, %v5589_v26, %v5585_v20  ;;  %3618 = vmatpush.msk.msra.mxu0 %vm8615_vm8, %v8964_v33  ;;  %v3501_v17 = vld [vmem:[%s4803_s7 + $0x4b8] sm:$0xff]  ;;  %v735_v26 = vadd.s32 48, %v8918_v38 }
  0xe6   : >> { %9014 = vst [vmem:[#allocation96_spill] sm:$0xff] %v5597_v4  ;;  %vm8514_vm2 = vcmp.eq.s32.totalorder %v5602_v35, 0  ;;  %vm1186_vm10 = vcmp.gt.f32.partialorder %v5592_v22, %v1154_v48  ;;  %v3534_v51 = vld [vmem:[%s4803_s7 + $0x6b8] sm:$0xff]  ;;  %vm850_vm3 = vcmp.lt.s32.totalorder %v818_v31, 640  ;;  %v751_v9 = vadd.s32 176, %v8918_v38  ;;  %v3467_v31 = vld [vmem:[%s4803_s7 + $0x2b0] sm:$0xff] }
  0xe7   : >> { %9015 = vst [vmem:[#allocation97_spill] sm:$0xff] %v5602_v35  ;;  %v3599_v28 = vsel %vm8514_vm2, 1.0, %v8970_v43  ;;  %v1218_v61 = vsel %vm1186_vm10, 2, %v1122_v52  ;;  %v1250_v15 = vsel %vm1186_vm10, %v5592_v22, %v1154_v48  ;;  %v882_v35 = vsel %vm850_vm3, %v586_v41, 4294967295 }
  0xe8   : >> { %3670 = vmatpush.msk.msra.mxu3 %vm8505_vm1, %v3599_v28  ;;  %vm1282_vm7 = vcmp.gt.f32.partialorder %v5597_v4, %v1250_v15  ;;  %v5631_v52 = vsel %vm850_vm3, %v619_v54, 0.0  ;;  %v5634_v48 = vsel %vm850_vm3, %v3468_v59, 0.0  ;;  %vm914_vm10 = vcmp.eq.s32.totalorder %v882_v35, 4  ;;  %v602_v54 = vld [vmem:[%s4803_s7 + $0x30] sm:$0xff] }
  0xe9   : >> { %v1314_v57 = vsel %vm1282_vm7, 3, %v1218_v61  ;;  %9016 = vst [vmem:[#allocation98_spill] sm:$0xff] %v5631_v52  ;;  %v5640_v15 = vsel %vm850_vm3, %v3501_v17, 0.0  ;;  %v5643_v61 = vsel %vm850_vm3, %v3534_v51, 0.0  ;;  %v5646_v41 = vsel %vm914_vm10, 3, %v882_v35  ;;  %v569_v35 = vld [vmem:[%s4799_s28 + $0x30] sm:$0xff] }
  0xea   : >> { %9017 = vst [vmem:[#allocation99_spill] sm:$0xff] %v5634_v48  ;;  %v5637_v28 = vsel %vm834_vm9, %v1314_v57, 4294967295  ;;  %vm1106_vm1 = vcmp.gt.f32.partialorder %v5634_v48, %v5631_v52  ;;  %v768_v21 = vadd.s32 %v4790_v40, %v735_v26  ;;  %vm8529_vm9 = vcmp.eq.s32.totalorder %v5646_v41, 0  ;;  %v3451_v26 = vld [vmem:[%s4803_s7 + $0x230] sm:$0xff] }
  0xeb   : >> { %9018 = vst [vmem:[#allocation100_spill] sm:$0xff] %v5637_v28  ;;  %vm8521_vm7 = vcmp.eq.s32.totalorder %v5637_v28, 0  ;;  %v1138_v17 = vsel %vm1106_vm1, 1, %v8971_v34  ;;  %v1170_v51 = vsel %vm1106_vm1, %v5634_v48, %v5631_v52  ;;  %v784_v4 = vadd.s32 %v4790_v40, %v751_v9  ;;  %3635 = vmatpush.msk.msra.mxu1 %vm8529_vm9, %v8964_v33  ;;  %v3484_v52 = vld [vmem:[%s4803_s7 + $0x430] sm:$0xff]  ;;  %v3478_v28 = vld [vmem:[%s4803_s7 + $0x400] sm:$0xff] }
  0xec   : >> { %9019 = vst [vmem:[#allocation101_spill] sm:$0xff] %v5640_v15  ;;  %v3582_v57 = vsel %vm8521_vm7, 1.0, %v8970_v43  ;;  %vm1202_vm10 = vcmp.gt.f32.partialorder %v5640_v15, %v1170_v51  ;;  %v801_v59 = vadd.s32 %v4805_v46, %v768_v21  ;;  %v767_v9 = vadd.s32 %v4790_v40, %v734_v7  ;;  %v585_v7 = vld [vmem:[%s4799_s28 + $0xb0] sm:$0xff] }
  0xed   : >> { %9020 = vst [vmem:[#allocation102_spill] sm:$0xff] %v5643_v61  ;;  %3654 = vmatpush.msk.msra.mxu2 %vm8615_vm8, %v3582_v57  ;;  %v1234_v22 = vsel %vm1202_vm10, 2, %v1138_v17  ;;  %v1266_v48 = vsel %vm1202_vm10, %v5640_v15, %v1170_v51  ;;  %v3517_v57 = vld [vmem:[%s4803_s7 + $0x630] sm:$0xff]  ;;  %v5674_v37 = vadd.s32 %v4805_v46, %v784_v4 }
  0xee   : >> { %9021 = vst [vmem:[#allocation103_spill] sm:$0xff] %v5646_v41  ;;  %vm1298_vm1 = vcmp.gt.f32.partialorder %v5643_v61, %v1266_v48  ;;  %vm833_vm2 = vcmp.lt.s32.totalorder %v801_v59, 640  ;;  %v750_v61 = vadd.s32 168, %v8918_v38  ;;  %v3483_v59 = vld [vmem:[%s4803_s7 + $0x428] sm:$0xff] }
  0xef   : >> { %v1330_v21 = vsel %vm1298_vm1, 3, %v1234_v22  ;;  %v865_v1 = vsel %vm833_vm2, %v569_v35, 4294967295  ;;  %v5679_v17 = vsel %vm833_vm2, %v602_v54, 0.0  ;;  %v5682_v51 = vsel %vm833_vm2, %v3451_v26, 0.0  ;;  %v618_v22 = vld [vmem:[%s4803_s7 + $0xb0] sm:$0xff] }
  0xf0   : >> { %9022 = vst [vmem:[#allocation104_spill] sm:$0xff] %v5682_v51  ;;  %v5685_v15 = vsel %vm850_vm3, %v1330_v21, 4294967295  ;;  %vm897_vm10 = vcmp.eq.s32.totalorder %v865_v1, 4  ;;  %v5688_v48 = vsel %vm833_vm2, %v3484_v52, 0.0  ;;  %v5691_v4 = vsel %vm833_vm2, %v3517_v57, 0.0 }
  0xf1   : >> { %9023 = vst [vmem:[#allocation105_spill] sm:$0xff] %v5685_v15  ;;  %vm8532_vm1 = vcmp.eq.s32.totalorder %v5685_v15, 0  ;;  %v5696_v35 = vsel %vm897_vm10, 3, %v865_v1  ;;  %vm1089_vm7 = vcmp.gt.f32.partialorder %v5682_v51, %v5679_v17  ;;  %vm849_vm3 = vcmp.lt.s32.totalorder %v5674_v37, 640  ;;  %v3500_v1 = vld [vmem:[%s4803_s7 + $0x4b0] sm:$0xff] }
  0xf2   : >> { %9024 = vst [vmem:[#allocation106_spill] sm:$0xff] %v5688_v48  ;;  %v3598_v52 = vsel %vm8532_vm1, 1.0, %v8970_v43  ;;  %v1121_v54 = vsel %vm1089_vm7, 1, %v8971_v34  ;;  %v1153_v26 = vsel %vm1089_vm7, %v5682_v51, %v5679_v17  ;;  %vm1377_vm12 = vcmp.eq.s32.totalorder %v5696_v35, 0 }
  0xf3   : >> { %9025 = vst [vmem:[#allocation107_spill] sm:$0xff] %v5691_v4  ;;  %3671 = vmatpush.msk.msra.mxu3 %vm8529_vm9, %v3598_v52  ;;  %vm1185_vm10 = vcmp.gt.f32.partialorder %v5688_v48, %v1153_v26  ;;  %v881_v57 = vsel %vm849_vm3, %v585_v7, 4294967295  ;;  %v5717_v21 = vsel %vm849_vm3, %v618_v22, 0.0  ;;  %3619 = vmatpush.msk.msra.mxu0 %vm1377_vm12, %v8964_v33  ;;  %v3533_v52 = vld [vmem:[%s4803_s7 + $0x6b0] sm:$0xff]  ;;  %v5727_v7 = vsel %vm849_vm3, %v3467_v31, 0.0 }
  0xf4   : >> { %9026 = vst [vmem:[#allocation108_spill] sm:$0xff] %v5696_v35  ;;  %v1217_v15 = vsel %vm1185_vm10, 2, %v1121_v54  ;;  %v1249_v41 = vsel %vm1185_vm10, %v5688_v48, %v1153_v26  ;;  %vm913_vm7 = vcmp.eq.s32.totalorder %v881_v57, 4  ;;  %v5734_v51 = vsel %vm849_vm3, %v3500_v1, 0.0  ;;  %v568_v48 = vld [vmem:[%s4799_s28 + $0x28] sm:$0xff] }
  0xf5   : >> { %9027 = vst [vmem:[#allocation109_spill] sm:$0xff] %v5717_v21  ;;  %vm1281_vm9 = vcmp.gt.f32.partialorder %v5691_v4, %v1249_v41  ;;  %v5730_v22 = vsel %vm913_vm7, 3, %v881_v57  ;;  %v733_v54 = vadd.s32 32, %v8918_v38  ;;  %vm1105_vm10 = vcmp.gt.f32.partialorder %v5727_v7, %v5717_v21  ;;  %v601_v4 = vld [vmem:[%s4803_s7 + $0x28] sm:$0xff] }
  0xf6   : >> { %9028 = vst [vmem:[#allocation110_spill] sm:$0xff] %v5727_v7  ;;  %v1313_v26 = vsel %vm1281_vm9, 3, %v1217_v15  ;;  %vm8562_vm1 = vcmp.eq.s32.totalorder %v5730_v22, 0  ;;  %v800_v31 = vadd.s32 %v4805_v46, %v767_v9  ;;  %v5747_v57 = vsel %vm849_vm3, %v3533_v52, 0.0 }
  0xf7   : >> { %9029 = vst [vmem:[#allocation111_spill] sm:$0xff] %v5730_v22  ;;  %v5743_v41 = vsel %vm833_vm2, %v1313_v26, 4294967295  ;;  %v1137_v1 = vsel %vm1105_vm10, 1, %v8971_v34  ;;  %v1169_v15 = vsel %vm1105_vm10, %v5727_v7, %v5717_v21  ;;  %3636 = vmatpush.msk.msra.mxu1 %vm8562_vm1, %v8964_v33  ;;  %v783_v9 = vadd.s32 %v4790_v40, %v750_v61  ;;  %v3515_v22 = vld [vmem:[%s4803_s7 + $0x620] sm:$0xff] }
  0xf8   : >> { %9030 = vst [vmem:[#allocation112_spill] sm:$0xff] %v5734_v51  ;;  %vm8550_vm9 = vcmp.eq.s32.totalorder %v5743_v41, 0  ;;  %vm1201_vm2 = vcmp.gt.f32.partialorder %v5734_v51, %v1169_v15  ;;  %vm832_vm7 = vcmp.lt.s32.totalorder %v800_v31, 640 }
  0xf9   : >> { %9031 = vst [vmem:[#allocation113_spill] sm:$0xff] %v5743_v41  ;;  %v3581_v52 = vsel %vm8550_vm9, 1.0, %v8970_v43  ;;  %v1233_v26 = vsel %vm1201_vm2, 2, %v1137_v1  ;;  %v1265_v7 = vsel %vm1201_vm2, %v5734_v51, %v1169_v15  ;;  %v864_v21 = vsel %vm832_vm7, %v568_v48, 4294967295  ;;  %v617_v15 = vld [vmem:[%s4803_s7 + $0xa8] sm:$0xff] }
  0xfa   : >> { %9032 = vst [vmem:[#allocation114_spill] sm:$0xff] %v5747_v57  ;;  %3655 = vmatpush.msk.msra.mxu2 %vm1377_vm12, %v3581_v52  ;;  %vm1297_vm10 = vcmp.gt.f32.partialorder %v5747_v57, %v1265_v7  ;;  %vm896_vm14 = vcmp.eq.s32.totalorder %v864_v21, 4  ;;  %v5771_v61 = vsel %vm832_vm7, %v601_v4, 0.0  ;;  %v5774_v58 = vsel %vm832_vm7, %v3450_v45, 0.0  ;;  %v584_v4 = vld [vmem:[%s4799_s28 + $0xa8] sm:$0xff] }
  0xfb   : >> { %9033 = vst [vmem:[#allocation115_spill] sm:$0xff] %v5774_v58  ;;  %v1329_v1 = vsel %vm1297_vm10, 3, %v1233_v26  ;;  %v5776_v14 = vsel %vm896_vm14, 3, %v864_v21  ;;  %v5779_v48 = vsel %vm832_vm7, %v3483_v59, 0.0  ;;  %vm1088_vm2 = vcmp.gt.f32.partialorder %v5774_v58, %v5771_v61  ;;  %v3466_v52 = vld [vmem:[%s4803_s7 + $0x2a8] sm:$0xff] }
  0xfc   : >> { %9034 = vst [vmem:[#allocation116_spill] sm:$0xff] %v5776_v14  ;;  %v5783_v7 = vsel %vm849_vm3, %v1329_v1, 4294967295  ;;  %vm1376_vm9 = vcmp.eq.s32.totalorder %v5776_v14, 0  ;;  %v816_v45 = vadd.s32 %v4805_v46, %v783_v9  ;;  %v5793_v21 = vsel %vm832_vm7, %v3516_v63, 0.0  ;;  %v3499_v26 = vld [vmem:[%s4803_s7 + $0x4a8] sm:$0xff] }
  0xfd   : >> { %9035 = vst [vmem:[#allocation117_spill] sm:$0xff] %v5779_v48  ;;  %vm8559_vm14 = vcmp.eq.s32.totalorder %v5783_v7, 0  ;;  %v1120_v59 = vsel %vm1088_vm2, 1, %v8971_v34  ;;  %v1152_v37 = vsel %vm1088_vm2, %v5774_v58, %v5771_v61  ;;  %3620 = vmatpush.msk.msra.mxu0 %vm1376_vm9, %v8964_v33  ;;  %v3532_v1 = vld [vmem:[%s4803_s7 + $0x6a8] sm:$0xff]  ;;  %v766_v63 = vadd.s32 %v4790_v40, %v733_v54 }
  0xfe   : >> { %9036 = vst [vmem:[#allocation118_spill] sm:$0xff] %v5783_v7  ;;  %v3597_v9 = vsel %vm8559_vm14, 1.0, %v8970_v43  ;;  %vm1184_vm3 = vcmp.gt.f32.partialorder %v5779_v48, %v1152_v37  ;;  %vm848_vm10 = vcmp.lt.s32.totalorder %v816_v45, 640  ;;  %v762_v41 = vadd.s32 %v4790_v40, %v8918_v38 }
  0xff   : >> { %9037 = vst [vmem:[#allocation119_spill] sm:$0xff] %v5793_v21  ;;  %3672 = vmatpush.msk.msra.mxu3 %vm8562_vm1, %v3597_v9  ;;  %v1216_v57 = vsel %vm1184_vm3, 2, %v1120_v59  ;;  %v1248_v51 = vsel %vm1184_vm3, %v5779_v48, %v1152_v37  ;;  %v880_v0 = vsel %vm848_vm10, %v584_v4, 4294967295  ;;  %v5814_v58 = vsel %vm848_vm10, %v617_v15, 0.0 }
 0x100   : >> { %9038 = vst [vmem:[#allocation120_spill] sm:$0xff] %v5814_v58  ;;  %vm1280_vm2 = vcmp.gt.f32.partialorder %v5793_v21, %v1248_v51  ;;  %vm912_vm14 = vcmp.eq.s32.totalorder %v880_v0, 4  ;;  %v5818_v7 = vsel %vm848_vm10, %v3466_v52, 0.0  ;;  %v5821_v54 = vsel %vm848_vm10, %v3499_v26, 0.0  ;;  %v3449_v52 = vld [vmem:[%s4803_s7 + $0x220] sm:$0xff] }
 0x101   : >> { %9039 = vst [vmem:[#allocation121_spill] sm:$0xff] %v5818_v7  ;;  %v1312_v59 = vsel %vm1280_vm2, 3, %v1216_v57  ;;  %v5823_v9 = vsel %vm912_vm14, 3, %v880_v0  ;;  %v5826_v4 = vsel %vm848_vm10, %v3532_v1, 0.0  ;;  %vm1104_vm3 = vcmp.gt.f32.partialorder %v5818_v7, %v5814_v58  ;;  %v567_v0 = vld [vmem:[%s4799_s28 + $0x20] sm:$0xff] }
 0x102   : >> { %9040 = vst [vmem:[#allocation122_spill] sm:$0xff] %v5821_v54  ;;  %v5831_v51 = vsel %vm832_vm7, %v1312_v59, 4294967295  ;;  %v1136_v15 = vsel %vm1104_vm3, 1, %v8971_v34  ;;  %v1168_v37 = vsel %vm1104_vm3, %v5818_v7, %v5814_v58  ;;  %vm8591_vm2 = vcmp.eq.s32.totalorder %v5823_v9, 0  ;;  %v600_v57 = vld [vmem:[%s4803_s7 + $0x20] sm:$0xff] }
 0x103   : >> { %9041 = vst [vmem:[#allocation123_spill] sm:$0xff] %v5823_v9  ;;  %vm8575_vm14 = vcmp.eq.s32.totalorder %v5831_v51, 0  ;;  %vm1200_vm1 = vcmp.gt.f32.partialorder %v5821_v54, %v1168_v37  ;;  %v799_v26 = vadd.s32 %v4805_v46, %v766_v63  ;;  %3637 = vmatpush.msk.msra.mxu1 %vm8591_vm2, %v8964_v33  ;;  %v3482_v7 = vld [vmem:[%s4803_s7 + $0x420] sm:$0xff]  ;;  %v749_v58 = vadd.s32 160, %v8918_v38 }
 0x104   : >> { %9042 = vst [vmem:[#allocation124_spill] sm:$0xff] %v5826_v4  ;;  %v3580_v31 = vsel %vm8575_vm14, 1.0, %v8970_v43  ;;  %v1232_v1 = vsel %vm1200_vm1, 2, %v1136_v15  ;;  %v1264_v59 = vsel %vm1200_vm1, %v5821_v54, %v1168_v37  ;;  %v732_v63 = vadd.s32 24, %v8918_v38  ;;  %v3498_v9 = vld [vmem:[%s4803_s7 + $0x4a0] sm:$0xff] }
 0x105   : >> { %9043 = vst [vmem:[#allocation125_spill] sm:$0xff] %v5831_v51  ;;  %3656 = vmatpush.msk.msra.mxu2 %vm1376_vm9, %v3580_v31  ;;  %vm1296_vm7 = vcmp.gt.f32.partialorder %v5826_v4, %v1264_v59  ;;  %vm831_vm3 = vcmp.lt.s32.totalorder %v799_v26, 640  ;;  %v748_v21 = vadd.s32 152, %v8918_v38  ;;  %v782_v45 = vadd.s32 %v4790_v40, %v749_v58  ;;  %v3465_v58 = vld [vmem:[%s4803_s7 + $0x2a0] sm:$0xff]  ;;  %v3448_v26 = vld [vmem:[%s4803_s7 + $0x218] sm:$0xff] }
 0x106   : >> { %v1328_v48 = vsel %vm1296_vm7, 3, %v1232_v1  ;;  %v863_v6 = vsel %vm831_vm3, %v567_v0, 4294967295  ;;  %v5860_v15 = vsel %vm831_vm3, %v600_v57, 0.0  ;;  %v5863_v37 = vsel %vm831_vm3, %v3449_v52, 0.0  ;;  %v616_v57 = vld [vmem:[%s4803_s7 + $0xa0] sm:$0xff]  ;;  %v3464_v51 = vld [vmem:[%s4803_s7 + $0x298] sm:$0xff] }
 0x107   : >> { %9044 = vst [vmem:[#allocation126_spill] sm:$0xff] %v5863_v37  ;;  %v5866_v31 = vsel %vm848_vm10, %v1328_v48, 4294967295  ;;  %vm895_vm1 = vcmp.eq.s32.totalorder %v863_v6, 4  ;;  %v5869_v59 = vsel %vm831_vm3, %v3482_v7, 0.0  ;;  %v5872_v1 = vsel %vm831_vm3, %v3515_v22, 0.0 }
 0x108   : >> { %9045 = vst [vmem:[#allocation127_spill] sm:$0xff] %v5866_v31  ;;  %vm8584_vm7 = vcmp.eq.s32.totalorder %v5866_v31, 0  ;;  %v5875_v0 = vsel %vm895_vm1, 3, %v863_v6  ;;  %vm1087_vm14 = vcmp.gt.f32.partialorder %v5863_v37, %v5860_v15  ;;  %v583_v6 = vld [vmem:[%s4799_s28 + $0xa0] sm:$0xff]  ;;  %v815_v52 = vadd.s32 %v4805_v46, %v782_v45 }
 0x109   : >> { %9046 = vst [vmem:[#allocation128_spill] sm:$0xff] %v5869_v59  ;;  %v3596_v48 = vsel %vm8584_vm7, 1.0, %v8970_v43  ;;  %v1119_v7 = vsel %vm1087_vm14, 1, %v8971_v34  ;;  %v1151_v22 = vsel %vm1087_vm14, %v5863_v37, %v5860_v15  ;;  %vm1375_vm10 = vcmp.eq.s32.totalorder %v5875_v0, 0 }
 0x10a   : >> { %9047 = vst [vmem:[#allocation129_spill] sm:$0xff] %v5872_v1  ;;  %3673 = vmatpush.msk.msra.mxu3 %vm8591_vm2, %v3596_v48  ;;  %vm1183_vm1 = vcmp.gt.f32.partialorder %v5869_v59, %v1151_v22  ;;  %v765_v4 = vadd.s32 %v4790_v40, %v732_v63  ;;  %3621 = vmatpush.msk.msra.mxu0 %vm1375_vm10, %v8964_v33  ;;  %v3531_v48 = vld [vmem:[%s4803_s7 + $0x6a0] sm:$0xff]  ;;  %vm847_vm7 = vcmp.lt.s32.totalorder %v815_v52, 640  ;;  %v3497_v52 = vld [vmem:[%s4803_s7 + $0x498] sm:$0xff]  ;;  %v730_v37 = vadd.s32 8, %v8918_v38 }
 0x10b   : >> { %9048 = vst [vmem:[#allocation130_spill] sm:$0xff] %v5875_v0  ;;  %v1215_v54 = vsel %vm1183_vm1, 2, %v1119_v7  ;;  %v1247_v31 = vsel %vm1183_vm1, %v5869_v59, %v1151_v22  ;;  %v781_v63 = vadd.s32 %v4790_v40, %v748_v21  ;;  %v879_v32 = vsel %vm847_vm7, %v583_v6, 4294967295  ;;  %v566_v21 = vld [vmem:[%s4799_s28 + $0x18] sm:$0xff] }
 0x10c   : >> { %vm1279_vm14 = vcmp.gt.f32.partialorder %v5872_v1, %v1247_v31  ;;  %v5903_v11 = vadd.s32 %v4805_v46, %v765_v4  ;;  %v5908_v7 = vsel %vm847_vm7, %v616_v57, 0.0  ;;  %v5911_v22 = vsel %vm847_vm7, %v3465_v58, 0.0 }
 0x10d   : >> { %v1311_v45 = vsel %vm1279_vm14, 3, %v1215_v54  ;;  %9049 = vst [vmem:[#allocation131_spill] sm:$0xff] %v5908_v7  ;;  %vm911_vm1 = vcmp.eq.s32.totalorder %v879_v32, 4  ;;  %v5917_v31 = vsel %vm847_vm7, %v3498_v9, 0.0  ;;  %v5920_v4 = vsel %vm847_vm7, %v3531_v48, 0.0  ;;  %v599_v54 = vld [vmem:[%s4803_s7 + $0x18] sm:$0xff] }
 0x10e   : >> { %9050 = vst [vmem:[#allocation132_spill] sm:$0xff] %v5911_v22  ;;  %v5914_v59 = vsel %vm831_vm3, %v1311_v45, 4294967295  ;;  %v5925_v6 = vsel %vm911_vm1, 3, %v879_v32  ;;  %vm1103_vm2 = vcmp.gt.f32.partialorder %v5911_v22, %v5908_v7  ;;  %vm830_vm3 = vcmp.lt.s32.totalorder %v5903_v11, 640  ;;  %v3481_v32 = vld [vmem:[%s4803_s7 + $0x418] sm:$0xff] }
 0x10f   : >> { %9051 = vst [vmem:[#allocation133_spill] sm:$0xff] %v5914_v59  ;;  %vm8599_vm14 = vcmp.eq.s32.totalorder %v5914_v59, 0  ;;  %v1135_v57 = vsel %vm1103_vm2, 1, %v8971_v34  ;;  %v1167_v58 = vsel %vm1103_vm2, %v5911_v22, %v5908_v7  ;;  %vm8629_vm5 = vcmp.eq.s32.totalorder %v5925_v6, 0 }
 0x110   : >> { %9052 = vst [vmem:[#allocation134_spill] sm:$0xff] %v5917_v31  ;;  %v3579_v9 = vsel %vm8599_vm14, 1.0, %v8970_v43  ;;  %vm1199_vm1 = vcmp.gt.f32.partialorder %v5917_v31, %v1167_v58  ;;  %v862_v48 = vsel %vm830_vm3, %v566_v21, 4294967295  ;;  %v5946_v45 = vsel %vm830_vm3, %v599_v54, 0.0  ;;  %3638 = vmatpush.msk.msra.mxu1 %vm8629_vm5, %v8964_v33 }
 0x111   : >> { %9053 = vst [vmem:[#allocation135_spill] sm:$0xff] %v5920_v4  ;;  %3657 = vmatpush.msk.msra.mxu2 %vm1375_vm10, %v3579_v9  ;;  %v731_v1 = vadd.s32 16, %v8918_v38  ;;  %v1231_v22 = vsel %vm1199_vm1, 2, %v1135_v57  ;;  %v1263_v7 = vsel %vm1199_vm1, %v5917_v31, %v1167_v58  ;;  %v3514_v9 = vld [vmem:[%s4803_s7 + $0x618] sm:$0xff]  ;;  %vm894_vm2 = vcmp.eq.s32.totalorder %v862_v48, 4 }
 0x112   : >> { %9054 = vst [vmem:[#allocation136_spill] sm:$0xff] %v5925_v6  ;;  %v5956_v21 = vsel %vm830_vm3, %v3448_v26, 0.0  ;;  %vm1295_vm14 = vcmp.gt.f32.partialorder %v5920_v4, %v1263_v7  ;;  %v5959_v54 = vsel %vm894_vm2, 3, %v862_v48  ;;  %v5963_v59 = vsel %vm830_vm3, %v3481_v32, 0.0  ;;  %v582_v31 = vld [vmem:[%s4799_s28 + $0x98] sm:$0xff] }
 0x113   : >> { %9055 = vst [vmem:[#allocation137_spill] sm:$0xff] %v5956_v21  ;;  %v747_v57 = vadd.s32 144, %v8918_v38  ;;  %v1327_v58 = vsel %vm1295_vm14, 3, %v1231_v22  ;;  %vm1086_vm1 = vcmp.gt.f32.partialorder %v5956_v21, %v5946_v45  ;;  %vm1374_vm4 = vcmp.eq.s32.totalorder %v5959_v54, 0  ;;  %v615_v4 = vld [vmem:[%s4803_s7 + $0x98] sm:$0xff] }
 0x114   : >> { %9056 = vst [vmem:[#allocation138_spill] sm:$0xff] %v5959_v54  ;;  %v814_v26 = vadd.s32 %v4805_v46, %v781_v63  ;;  %v5972_v7 = vsel %vm847_vm7, %v1327_v58, 4294967295  ;;  %v5976_v48 = vsel %vm830_vm3, %v3514_v9, 0.0  ;;  %v1118_v32 = vsel %vm1086_vm1, 1, %v8971_v34  ;;  %3622 = vmatpush.msk.msra.mxu0 %vm1374_vm4, %v8964_v33 }
 0x115   : >> { %9057 = vst [vmem:[#allocation139_spill] sm:$0xff] %v5963_v59  ;;  %v1150_v22 = vsel %vm1086_vm1, %v5956_v21, %v5946_v45  ;;  %vm8620_vm14 = vcmp.eq.s32.totalorder %v5972_v7, 0  ;;  %v764_v63 = vadd.s32 %v4790_v40, %v731_v1 }
 0x116   : >> { %9058 = vst [vmem:[#allocation140_spill] sm:$0xff] %v5972_v7  ;;  %vm1182_vm7 = vcmp.gt.f32.partialorder %v5963_v59, %v1150_v22  ;;  %vm846_vm2 = vcmp.lt.s32.totalorder %v814_v26, 640  ;;  %v3595_v9 = vsel %vm8620_vm14, 1.0, %v8970_v43 }
 0x117   : >> { %9059 = vst [vmem:[#allocation141_spill] sm:$0xff] %v5976_v48  ;;  %v1214_v58 = vsel %vm1182_vm7, 2, %v1118_v32  ;;  %v1246_v8 = vsel %vm1182_vm7, %v5963_v59, %v1150_v22  ;;  %v878_v24 = vsel %vm846_vm2, %v582_v31, 4294967295  ;;  %3674 = vmatpush.msk.msra.mxu3 %vm8629_vm5, %v3595_v9  ;;  %v6000_v1 = vsel %vm846_vm2, %v615_v4, 0.0  ;;  %v565_v4 = vld [vmem:[%s4799_s28 + $0x10] sm:$0xff] }
 0x118   : >> { %vm1278_vm1 = vcmp.gt.f32.partialorder %v5976_v48, %v1246_v8  ;;  %vm910_vm8 = vcmp.eq.s32.totalorder %v878_v24, 4  ;;  %9060 = vst [vmem:[#allocation142_spill] sm:$0xff] %v6000_v1  ;;  %v6003_v7 = vsel %vm846_vm2, %v3464_v51, 0.0  ;;  %v6008_v31 = vsel %vm846_vm2, %v3497_v52, 0.0  ;;  %v598_v22 = vld [vmem:[%s4803_s7 + $0x10] sm:$0xff] }
 0x119   : >> { %9061 = vst [vmem:[#allocation143_spill] sm:$0xff] %v6003_v7  ;;  %v1310_v32 = vsel %vm1278_vm1, 3, %v1214_v58  ;;  %v6005_v27 = vsel %vm910_vm8, 3, %v878_v24  ;;  %vm1102_vm7 = vcmp.gt.f32.partialorder %v6003_v7, %v6000_v1  ;;  %v797_v51 = vadd.s32 %v4805_v46, %v764_v63  ;;  %v3447_v9 = vld [vmem:[%s4803_s7 + $0x210] sm:$0xff] }
 0x11a   : >> { %9062 = vst [vmem:[#allocation144_spill] sm:$0xff] %v6005_v27  ;;  %v6012_v8 = vsel %vm830_vm3, %v1310_v32, 4294967295  ;;  %vm8656_vm14 = vcmp.eq.s32.totalorder %v6005_v27, 0  ;;  %v6022_v24 = vsel %vm846_vm2, %v3530_v50, 0.0  ;;  %v1134_v52 = vsel %vm1102_vm7, 1, %v8971_v34  ;;  %v3480_v58 = vld [vmem:[%s4803_s7 + $0x410] sm:$0xff] }
 0x11b   : >> { %9063 = vst [vmem:[#allocation145_spill] sm:$0xff] %v6008_v31  ;;  %vm8632_vm8 = vcmp.eq.s32.totalorder %v6012_v8, 0  ;;  %v1166_v11 = vsel %vm1102_vm7, %v6003_v7, %v6000_v1  ;;  %3639 = vmatpush.msk.msra.mxu1 %vm8656_vm14, %v8964_v33  ;;  %v3513_v32 = vld [vmem:[%s4803_s7 + $0x610] sm:$0xff]  ;;  %vm829_vm1 = vcmp.lt.s32.totalorder %v797_v51, 640  ;;  %v780_v50 = vadd.s32 %v4790_v40, %v747_v57 }
 0x11c   : >> { %9064 = vst [vmem:[#allocation146_spill] sm:$0xff] %v6012_v8  ;;  %v3578_v63 = vsel %vm8632_vm8, 1.0, %v8970_v43  ;;  %vm1198_vm3 = vcmp.gt.f32.partialorder %v6008_v31, %v1166_v11  ;;  %v861_v1 = vsel %vm829_vm1, %v565_v4, 4294967295  ;;  %v6043_v48 = vsel %vm829_vm1, %v598_v22, 0.0 }
 0x11d   : >> { %9065 = vst [vmem:[#allocation147_spill] sm:$0xff] %v6022_v24  ;;  %3658 = vmatpush.msk.msra.mxu2 %vm1374_vm4, %v3578_v63  ;;  %v1230_v7 = vsel %vm1198_vm3, 2, %v1134_v52  ;;  %v1262_v6 = vsel %vm1198_vm3, %v6008_v31, %v1166_v11  ;;  %vm893_vm5 = vcmp.eq.s32.totalorder %v861_v1, 4  ;;  %v6047_v8 = vsel %vm829_vm1, %v3447_v9, 0.0  ;;  %v3463_v9 = vld [vmem:[%s4803_s7 + $0x290] sm:$0xff] }
 0x11e   : >> { %vm1294_vm7 = vcmp.gt.f32.partialorder %v6022_v24, %v1262_v6  ;;  %9066 = vst [vmem:[#allocation148_spill] sm:$0xff] %v6047_v8  ;;  %v6050_v57 = vsel %vm829_vm1, %v3480_v58, 0.0  ;;  %v6052_v63 = vsel %vm893_vm5, 3, %v861_v1  ;;  %v6055_v4 = vsel %vm829_vm1, %v3513_v32, 0.0  ;;  %v614_v1 = vld [vmem:[%s4803_s7 + $0x90] sm:$0xff] }
 0x11f   : >> { %9067 = vst [vmem:[#allocation149_spill] sm:$0xff] %v6050_v57  ;;  %v1326_v52 = vsel %vm1294_vm7, 3, %v1230_v7  ;;  %vm1085_vm3 = vcmp.gt.f32.partialorder %v6047_v8, %v6043_v48  ;;  %vm1373_vm7 = vcmp.eq.s32.totalorder %v6052_v63, 0  ;;  %v581_v7 = vld [vmem:[%s4799_s28 + $0x90] sm:$0xff]  ;;  %v813_v58 = vadd.s32 %v4805_v46, %v780_v50 }
 0x120   : >> { %9068 = vst [vmem:[#allocation150_spill] sm:$0xff] %v6052_v63  ;;  %v6060_v6 = vsel %vm846_vm2, %v1326_v52, 4294967295  ;;  %v1117_v22 = vsel %vm1085_vm3, 1, %v8971_v34  ;;  %v1149_v11 = vsel %vm1085_vm3, %v6047_v8, %v6043_v48  ;;  %3623 = vmatpush.msk.msra.mxu0 %vm1373_vm7, %v8964_v33  ;;  %v3496_v24 = vld [vmem:[%s4803_s7 + $0x490] sm:$0xff]  ;;  %v746_v50 = vadd.s32 136, %v8918_v38 }
 0x121   : >> { %9069 = vst [vmem:[#allocation151_spill] sm:$0xff] %v6055_v4  ;;  %vm8645_vm5 = vcmp.eq.s32.totalorder %v6060_v6, 0  ;;  %vm1181_vm8 = vcmp.gt.f32.partialorder %v6050_v57, %v1149_v11  ;;  %v3529_v31 = vld [vmem:[%s4803_s7 + $0x690] sm:$0xff]  ;;  %vm845_vm3 = vcmp.lt.s32.totalorder %v813_v58, 640  ;;  %v763_v51 = vadd.s32 %v4790_v40, %v730_v37  ;;  %v597_v37 = vld [vmem:[%s4803_s7 + $0x8] sm:$0xff] }
 0x122   : >> { %9070 = vst [vmem:[#allocation152_spill] sm:$0xff] %v6060_v6  ;;  %v3594_v26 = vsel %vm8645_vm5, 1.0, %v8970_v43  ;;  %v1213_v32 = vsel %vm1181_vm8, 2, %v1117_v22  ;;  %v1245_v52 = vsel %vm1181_vm8, %v6050_v57, %v1149_v11  ;;  %v877_v22 = vsel %vm845_vm3, %v581_v7, 4294967295  ;;  %v3462_v58 = vld [vmem:[%s4803_s7 + $0x288] sm:$0xff] }
 0x123   : >> { %3675 = vmatpush.msk.msra.mxu3 %vm8656_vm14, %v3594_v26  ;;  %vm1277_vm2 = vcmp.gt.f32.partialorder %v6055_v4, %v1245_v52  ;;  %v6090_v11 = vsel %vm845_vm3, %v614_v1, 0.0  ;;  %v6093_v56 = vsel %vm845_vm3, %v3463_v9, 0.0  ;;  %vm909_vm8 = vcmp.eq.s32.totalorder %v877_v22, 4  ;;  %v564_v1 = vld [vmem:[%s4799_s28 + $0x8] sm:$0xff]  ;;  %v596_v4 = vld [vmem:[%s4803_s7] sm:$0xff] }
 0x124   : >> { %v1309_v6 = vsel %vm1277_vm2, 3, %v1213_v32  ;;  %9071 = vst [vmem:[#allocation153_spill] sm:$0xff] %v6090_v11  ;;  %v6099_v52 = vsel %vm845_vm3, %v3496_v24, 0.0  ;;  %v6102_v32 = vsel %vm845_vm3, %v3529_v31, 0.0  ;;  %v6105_v7 = vsel %vm909_vm8, 3, %v877_v22  ;;  %v3446_v9 = vld [vmem:[%s4803_s7 + $0x208] sm:$0xff] }
 0x125   : >> { %9072 = vst [vmem:[#allocation154_spill] sm:$0xff] %v6093_v56  ;;  %v6096_v26 = vsel %vm829_vm1, %v1309_v6, 4294967295  ;;  %vm1101_vm5 = vcmp.gt.f32.partialorder %v6093_v56, %v6090_v11  ;;  %vm8677_vm1 = vcmp.eq.s32.totalorder %v6105_v7, 0  ;;  %v796_v22 = vadd.s32 %v4805_v46, %v763_v51 }
 0x126   : >> { %9073 = vst [vmem:[#allocation155_spill] sm:$0xff] %v6096_v26  ;;  %vm8663_vm2 = vcmp.eq.s32.totalorder %v6096_v26, 0  ;;  %v1133_v24 = vsel %vm1101_vm5, 1, %v8971_v34  ;;  %v1165_v31 = vsel %vm1101_vm5, %v6093_v56, %v6090_v11  ;;  %v779_v27 = vadd.s32 %v4790_v40, %v746_v50  ;;  %3640 = vmatpush.msk.msra.mxu1 %vm8677_vm1, %v8964_v33  ;;  %v3479_v11 = vld [vmem:[%s4803_s7 + $0x408] sm:$0xff] }
 0x127   : >> { %9074 = vst [vmem:[#allocation156_spill] sm:$0xff] %v6099_v52  ;;  %v3577_v6 = vsel %vm8663_vm2, 1.0, %v8970_v43  ;;  %vm1197_vm8 = vcmp.gt.f32.partialorder %v6099_v52, %v1165_v31  ;;  %v6131_v56 = vsel %vm1373_vm7, %v6043_v48, 0.0  ;;  %vm828_vm14 = vcmp.lt.s32.totalorder %v796_v22, 640 }
 0x128   : >> { %9075 = vst [vmem:[#allocation157_spill] sm:$0xff] %v6102_v32  ;;  %3659 = vmatpush.msk.msra.mxu2 %vm1373_vm7, %v3577_v6  ;;  %v1229_v26 = vsel %vm1197_vm8, 2, %v1133_v24  ;;  %v1261_v6 = vsel %vm1197_vm8, %v6099_v52, %v1165_v31  ;;  %v6138_v50 = vadd.s32 %v4805_v46, %v779_v27  ;;  %v6141_v51 = vadd.s32 %v4805_v46, %v762_v41 }
 0x129   : >> { %9076 = vst [vmem:[#allocation158_spill] sm:$0xff] %v6105_v7  ;;  %vm1293_vm5 = vcmp.gt.f32.partialorder %v6102_v32, %v1261_v6  ;;  %v860_v55 = vsel %vm828_vm14, %v564_v1, 4294967295  ;;  %v6145_v24 = vsel %vm828_vm14, %v597_v37, 0.0  ;;  %v6148_v31 = vsel %vm828_vm14, %v3446_v9, 0.0  ;;  %v613_v32 = vld [vmem:[%s4803_s7 + $0x88] sm:$0xff] }
 0x12a   : >> { %v1325_v63 = vsel %vm1293_vm5, 3, %v1229_v26  ;;  %9077 = vst [vmem:[#allocation159_spill] sm:$0xff] %v6148_v31  ;;  %vm892_vm7 = vcmp.eq.s32.totalorder %v860_v55, 4  ;;  %v6154_v27 = vsel %vm828_vm14, %v3479_v11, 0.0  ;;  %v6157_v41 = vsel %vm828_vm14, %v3512_v53, 0.0  ;;  %v580_v26 = vld [vmem:[%s4799_s28 + $0x88] sm:$0xff] }
 0x12b   : >> { %v6151_v6 = vsel %vm845_vm3, %v1325_v63, 4294967295  ;;  %9079 = vst [vmem:[#allocation161_spill] sm:$0xff] %v6154_v27  ;;  %v6162_v1 = vsel %vm892_vm7, 3, %v860_v55  ;;  %vm1084_vm5 = vcmp.gt.f32.partialorder %v6148_v31, %v6145_v24  ;;  %vm844_vm3 = vcmp.lt.s32.totalorder %v6138_v50, 640  ;;  %v3495_v55 = vld [vmem:[%s4803_s7 + $0x488] sm:$0xff] }
 0x12c   : >> { %9078 = vst [vmem:[#allocation160_spill] sm:$0xff] %v6151_v6  ;;  %vm8670_vm8 = vcmp.eq.s32.totalorder %v6151_v6, 0  ;;  %v1116_v53 = vsel %vm1084_vm5, 1, %v8971_v34  ;;  %v1148_v11 = vsel %vm1084_vm5, %v6148_v31, %v6145_v24  ;;  %vm1372_vm2 = vcmp.eq.s32.totalorder %v6162_v1, 0  ;;  %v3528_v7 = vld [vmem:[%s4803_s7 + $0x688] sm:$0xff] }
 0x12d   : >> { %9080 = vst [vmem:[#allocation162_spill] sm:$0xff] %v6157_v41  ;;  %v3593_v63 = vsel %vm8670_vm8, 1.0, %v8970_v43  ;;  %vm1180_vm7 = vcmp.gt.f32.partialorder %v6154_v27, %v1148_v11  ;;  %v876_v37 = vsel %vm844_vm3, %v580_v26, 4294967295  ;;  %v6183_v9 = vsel %vm844_vm3, %v613_v32, 0.0  ;;  %3624 = vmatpush.msk.msra.mxu0 %vm1372_vm2, %v8964_v33 }
 0x12e   : >> { %3676 = vmatpush.msk.msra.mxu3 %vm8677_vm1, %v3593_v63  ;;  %9081 = vst [vmem:[#allocation163_spill] sm:$0xff] %v6183_v9  ;;  %v6186_v52 = vadd.s32 128, %v8918_v38  ;;  %v1212_v6 = vsel %vm1180_vm7, 2, %v1116_v53  ;;  %v1244_v63 = vsel %vm1180_vm7, %v6154_v27, %v1148_v11  ;;  %vm908_vm5 = vcmp.eq.s32.totalorder %v876_v37, 4  ;;  %v563_v11 = vld [vmem:[%s4799_s28] sm:$0xff]  ;;  %v9173_v38 = vld [vmem:[#allocation76_spill] sm:$0xff] }
 0x12f   : >> { %v6195_v26 = vsel %vm844_vm3, %v3462_v58, 0.0  ;;  %vm1276_vm8 = vcmp.gt.f32.partialorder %v6157_v41, %v1244_v63  ;;  %v1436_v32 = vsel %vm1372_vm2, %v6145_v24, 0.0  ;;  %v6201_v44 = vsel %vm908_vm5, 3, %v876_v37 }
 0x130   : >> { %9082 = vst [vmem:[#allocation164_spill] sm:$0xff] %v6195_v26  ;;  %v6205_v53 = vsel %vm844_vm3, %v3495_v55, 0.0  ;;  %v1308_v59 = vsel %vm1276_vm8, 3, %v1212_v6  ;;  %vm1100_vm7 = vcmp.gt.f32.partialorder %v6195_v26, %v6183_v9  ;;  %vm1388_vm1 = vcmp.eq.s32.totalorder %v6201_v44, 0  ;;  %v3445_v6 = vld [vmem:[%s4803_s7 + $0x200] sm:$0xff] }
 0x131   : >> { %9083 = vst [vmem:[#allocation165_spill] sm:$0xff] %v6205_v53  ;;  %vm827_vm15 = vcmp.lt.s32.totalorder %v6141_v51, 640  ;;  %v6214_v58 = vsel %vm828_vm14, %v1308_v59, 4294967295  ;;  %v6218_v37 = vsel %vm844_vm3, %v3528_v7, 0.0  ;;  %v1132_v55 = vsel %vm1100_vm7, 1, %v8971_v34  ;;  %3641 = vmatpush.msk.msra.mxu1 %vm1388_vm1, %v8964_v33  ;;  %v3511_v59 = vld [vmem:[%s4803_s7 + $0x600] sm:$0xff] }
 0x132   : >> { %9084 = vst [vmem:[#allocation166_spill] sm:$0xff] %v6214_v58  ;;  %v1164_v63 = vsel %vm1100_vm7, %v6195_v26, %v6183_v9  ;;  %vm1404_vm8 = vcmp.eq.s32.totalorder %v6214_v58, 0  ;;  %v859_v7 = vsel %vm827_vm15, %v563_v11, 4294967295  ;;  %v955_v22 = vsel %vm827_vm15, %v596_v4, 0.0 }
 0x133   : >> { %9085 = vst [vmem:[#allocation167_spill] sm:$0xff] %v6218_v37  ;;  %vm1196_vm14 = vcmp.gt.f32.partialorder %v6205_v53, %v1164_v63  ;;  %v3576_v26 = vsel %vm1404_vm8, 1.0, %v8970_v43  ;;  %vm891_vm5 = vcmp.eq.s32.totalorder %v859_v7, 4  ;;  %v6246_v11 = vsel %vm827_vm15, %v3445_v6, 0.0 }
 0x134   : >> { %v1228_v9 = vsel %vm1196_vm14, 2, %v1132_v55  ;;  %v1260_v49 = vsel %vm1196_vm14, %v6205_v53, %v1164_v63  ;;  %3660 = vmatpush.msk.msra.mxu2 %vm1372_vm2, %v3576_v26  ;;  %v6242_v30 = vsel %vm891_vm5, 3, %v859_v7  ;;  %9086 = vst [vmem:[#allocation168_spill] sm:$0xff] %v6246_v11  ;;  %v6250_v4 = vsel %vm827_vm15, %v3478_v28, 0.0 }
 0x135   : >> { %vm1292_vm7 = vcmp.gt.f32.partialorder %v6218_v37, %v1260_v49  ;;  %9087 = vst [vmem:[#allocation169_spill] sm:$0xff] %v6250_v4  ;;  %v6254_v55 = vsel %vm827_vm15, %v3511_v59, 0.0  ;;  %vm1083_vm14 = vcmp.gt.f32.partialorder %v6246_v11, %v955_v22  ;;  %vm1371_vm2 = vcmp.eq.s32.totalorder %v6242_v30, 0  ;;  %v9120_v37 = vld [vmem:[#allocation113_spill] sm:$0xff] }
 0x136   : >> { %v1324_v58 = vsel %vm1292_vm7, 3, %v1228_v9  ;;  %9088 = vst [vmem:[#allocation170_spill] sm:$0xff] %v6254_v55  ;;  %v1115_v26 = vsel %vm1083_vm14, 1, %v8971_v34  ;;  %v1147_v63 = vsel %vm1083_vm14, %v6246_v11, %v955_v22  ;;  %v1435_v28 = vsel %vm1371_vm2, %v955_v22, 0.0  ;;  %3625 = vmatpush.msk.msra.mxu0 %vm1371_vm2, %v8964_v33 }
 0x137   : >> { %v6260_v49 = vsel %vm844_vm3, %v1324_v58, 4294967295  ;;  %vm1179_vm7 = vcmp.gt.f32.partialorder %v6250_v4, %v1147_v63  ;;  %v1628_v9 = vadd.f32 %v1436_v32, %v1435_v28  ;;  %v1669_v50 = vadd.f32 %v6145_v24, %v955_v22  ;;  %3626 = vmatmul.msk.f32.vlgmr.msra.gmra.mxu0 %vm9089_vm0, %v8964_v33 }
 0x138   : >> { %vm8711_vm5 = vcmp.eq.s32.totalorder %v6260_v49, 0  ;;  %3682 = vmatpush.msk.msrb.mxu0 %vm1418_vm11, %v8964_v33  ;;  %v1438_v58 = vsel %vm1374_vm4, %v5946_v45, 0.0  ;;  %v1211_v59 = vsel %vm1179_vm7, 2, %v1115_v26  ;;  %v1243_v7 = vsel %vm1179_vm7, %v6250_v4, %v1147_v63 }
 0x139   : >> { %v3592_v6 = vsel %vm8711_vm5, 1.0, %v8970_v43  ;;  %vm1275_vm11 = vcmp.gt.f32.partialorder %v6254_v55, %v1243_v7  ;;  %v1629_v24 = vadd.f32 %v1628_v9, %v6131_v56  ;;  %v1670_v32 = vadd.f32 %v1669_v50, %v6043_v48  ;;  %v579_v50 = vld [vmem:[%s4799_s28 + $0x80] sm:$0xff] }
 0x13a   : >> { %3677 = vmatpush.msk.msra.mxu3 %vm1388_vm1, %v3592_v6  ;;  %v1439_v22 = vsel %vm1375_vm10, %v5860_v15, 0.0  ;;  %v1307_v26 = vsel %vm1275_vm11, 3, %v1211_v59  ;;  %v778_v63 = vadd.s32 %v4790_v40, %v6186_v52  ;;  %3683 = vmatpush.msk.msrb.mxu0 %vm1417_vm13, %v8964_v33  ;;  %v1440_v9 = vsel %vm1376_vm9, %v5771_v61, 0.0  ;;  %v3461_v59 = vld [vmem:[%s4803_s7 + $0x280] sm:$0xff] }
 0x13b   : >> { %v6300_v28 = vsel %vm827_vm15, %v1307_v26, 4294967295  ;;  %v1630_v56 = vadd.f32 %v1629_v24, %v1438_v58  ;;  %v1671_v48 = vadd.f32 %v1670_v32, %v5946_v45  ;;  %v1441_v58 = vsel %vm1377_vm12, %v5679_v17, 0.0  ;;  %v3494_v26 = vld [vmem:[%s4803_s7 + $0x480] sm:$0xff] }
 0x13c   : >> { %9090 = vst [vmem:[#allocation171_spill] sm:$0xff] %v6300_v28  ;;  %vm1403_vm4 = vcmp.eq.s32.totalorder %v6300_v28, 0  ;;  %v6309_v40 = vadd.s32 %v4805_v46, %v778_v63  ;;  %3684 = vmatpush.msk.msrb.mxu0 %vm1416_vm6, %v8964_v33  ;;  %v612_v46 = vld [vmem:[%s4803_s7 + $0x80] sm:$0xff]  ;;  %vm8735_vm6 = vcmp.eq.s32.totalorder %v4846_v5, 1  ;;  %vm9091_vm15 = vcmp.eq.s32.totalorder %v5179_v39, 0 }
 0x13d   : >> { %v3575_v52 = vsel %vm1403_vm4, 1.0, %v8970_v43  ;;  %v1631_v45 = vadd.f32 %v1630_v56, %v1439_v22  ;;  %v6318_v51 = vadd.f32 %v1671_v48, %v5860_v15  ;;  %v2139_v15 = vadd.f32 %v6148_v31, %v6246_v11  ;;  %v9115_v11 = vld [vmem:[#allocation40_spill] sm:$0xff]  ;;  %v9118_v31 = vld [vmem:[#allocation41_spill] sm:$0xff]  ;;  %v9204_v28 = vld [vmem:[#allocation103_spill] sm:$0xff] }
 0x13e   : >> { %3661 = vmatpush.msk.msra.mxu2 %vm1371_vm2, %v3575_v52  ;;  %vm843_vm13 = vcmp.lt.s32.totalorder %v6309_v40, 640  ;;  %3685 = vmatpush.msk.msrb.mxu0 %vm9091_vm15, %v8964_v33  ;;  %vm9092_vm12 = vcmp.eq.s32.totalorder %v5594_v42, 0  ;;  %vm9093_vm10 = vcmp.eq.s32.totalorder %v5285_v3, 0  ;;  %v2609_v22 = vadd.f32 %v6154_v27, %v6250_v4  ;;  %v9113_v4 = vld [vmem:[#allocation151_spill] sm:$0xff]  ;;  %v9131_v40 = vld [vmem:[#allocation128_spill] sm:$0xff] }
 0x13f   : >> { %v1632_v6 = vadd.f32 %v1631_v45, %v1440_v9  ;;  %v875_v7 = vsel %vm843_vm13, %v579_v50, 4294967295  ;;  %v1442_v24 = vsel %vm9092_vm12, %v5585_v20, 0.0  ;;  %3662 = vmatmul.msk.f32.vlgmr.msra.gmra.mxu2 %vm9089_vm0, %v8964_v33  ;;  %v6355_v56 = vsel %vm843_vm13, %v612_v46, 0.0  ;;  %v3527_v45 = vld [vmem:[%s4803_s7 + $0x680] sm:$0xff] }
 0x140   : >> { %3786 = vmatpush.msk.msrb.mxu2 %vm8735_vm6, %v8964_v33  ;;  %vm907_vm9 = vcmp.eq.s32.totalorder %v875_v7, 4  ;;  %3686 = vmatpush.msk.msrb.mxu0 %vm9093_vm10, %v8964_v33  ;;  %9095 = vst [vmem:[#allocation173_spill] sm:$0xff] %v6355_v56  ;;  %vm9096_vm3 = vcmp.eq.s32.totalorder %v5501_v16, 0  ;;  %v6362_v9 = vsel %vm843_vm13, %v3461_v59, 0.0  ;;  %vm9098_vm14 = vcmp.eq.s32.totalorder %v5373_v62, 0 }
 0x141   : >> { %v1633_v32 = vadd.f32 %v1632_v6, %v1441_v58  ;;  %v6351_v63 = vsel %vm907_vm9, 3, %v875_v7  ;;  %v1443_v48 = vsel %vm9096_vm3, %v5488_v2, 0.0  ;;  %9097 = vst [vmem:[#allocation174_spill] sm:$0xff] %v6362_v9  ;;  %v2140_v52 = vadd.f32 %v2139_v15, %v6047_v8  ;;  %v9117_v8 = vld [vmem:[#allocation18_spill] sm:$0xff] }
 0x142   : >> { %9094 = vst [vmem:[#allocation172_spill] sm:$0xff] %v6351_v63  ;;  %3687 = vmatpush.msk.msrb.mxu0 %vm9098_vm14, %v8964_v33  ;;  %vm9099_vm2 = vcmp.eq.s32.totalorder %v5417_v18, 0  ;;  %v6374_v46 = vsel %vm843_vm13, %v3494_v26, 0.0  ;;  %vm1099_vm7 = vcmp.gt.f32.partialorder %v6362_v9, %v6355_v56  ;;  %vm1387_vm11 = vcmp.eq.s32.totalorder %v6351_v63, 0  ;;  %v9177_v63 = vld [vmem:[#allocation158_spill] sm:$0xff] }
 0x143   : >> { %v1634_v50 = vadd.f32 %v1633_v32, %v1442_v24  ;;  %v1444_v58 = vsel %vm9099_vm2, %v5402_v19, 0.0  ;;  %9100 = vst [vmem:[#allocation175_spill] sm:$0xff] %v6374_v46  ;;  %vm9101_vm15 = vcmp.eq.s32.totalorder %v5456_v29, 0  ;;  %v2610_v15 = vadd.f32 %v2609_v22, %v6050_v57  ;;  %3642 = vmatpush.msk.msra.mxu1 %vm1387_vm11, %v8964_v33 }
 0x144   : >> { %3688 = vmatpush.msk.msrb.mxu0 %vm9101_vm15, %v8964_v33  ;;  %v3079_v59 = vadd.f32 %v6157_v41, %v6254_v55  ;;  %v1131_v7 = vsel %vm1099_vm7, 1, %v8971_v34  ;;  %vm9102_vm12 = vcmp.eq.s32.totalorder %v5318_v36, 0  ;;  %v6394_v32 = vsel %vm843_vm13, %v3527_v45, 0.0  ;;  %3643 = vmatmul.msk.f32.vlgmr.msra.gmra.mxu1 %vm9089_vm0, %v8964_v33  ;;  %v9108_v41 = vld [vmem:[#allocation29_spill] sm:$0xff] }
 0x145   : >> { %v1635_v6 = vadd.f32 %v1634_v50, %v1443_v48  ;;  %v1445_v24 = vsel %vm9102_vm12, %v5313_v23, 0.0  ;;  %9103 = vst [vmem:[#allocation176_spill] sm:$0xff] %v6394_v32  ;;  %v1163_v22 = vsel %vm1099_vm7, %v6362_v9, %v6355_v56  ;;  %vm9104_vm9 = vcmp.eq.s32.totalorder %v4934_v47, 0  ;;  %v9106_v48 = vld [vmem:[#allocation53_spill] sm:$0xff] }
 0x146   : >> { %3699 = vmatpush.msk.msrb.mxu1 %vm9104_vm9, %v8964_v33  ;;  %vm9105_vm10 = vcmp.eq.s32.totalorder %v5554_v12, 0  ;;  %v2141_v26 = vadd.f32 %v2140_v52, %v5956_v21  ;;  %vm1195_vm3 = vcmp.gt.f32.partialorder %v6374_v46, %v1163_v22  ;;  %vm9107_vm14 = vcmp.eq.s32.totalorder %v9106_v48, 0  ;;  %v9112_v52 = vld [vmem:[#allocation139_spill] sm:$0xff]  ;;  %v9114_v21 = vld [vmem:[#allocation37_spill] sm:$0xff] }
 0x147   : >> { %3689 = vmatpush.msk.msrb.mxu0 %vm9105_vm10, %v8964_v33  ;;  %v1636_v34 = vadd.f32 %v1635_v6, %v1444_v58  ;;  %v1446_v50 = vsel %vm9107_vm14, %v5221_v60, 0.0  ;;  %v1227_v45 = vsel %vm1195_vm3, 2, %v1131_v7  ;;  %v1259_v55 = vsel %vm1195_vm3, %v6374_v46, %v1163_v22  ;;  %v9110_v58 = vld [vmem:[#allocation100_spill] sm:$0xff]  ;;  %v9133_v46 = vld [vmem:[#allocation14_spill] sm:$0xff] }
 0x148   : >> { %vm9109_vm2 = vcmp.eq.s32.totalorder %v9108_v41, 0  ;;  %vm9111_vm7 = vcmp.eq.s32.totalorder %v9110_v58, 0  ;;  %v2611_v6 = vadd.f32 %v2610_v15, %v9112_v52  ;;  %v3080_v27 = vadd.f32 %v3079_v59, %v9113_v4  ;;  %v9122_v15 = vld [vmem:[#allocation126_spill] sm:$0xff]  ;;  %v9126_v52 = vld [vmem:[#allocation12_spill] sm:$0xff] }
 0x149   : >> { %3700 = vmatpush.msk.msrb.mxu1 %vm9109_vm2, %v8964_v33  ;;  %3690 = vmatpush.msk.msrb.mxu0 %vm9111_vm7, %v8964_v33  ;;  %vm1291_vm15 = vcmp.gt.f32.partialorder %v6394_v32, %v1259_v55  ;;  %v1637_v57 = vadd.f32 %v1636_v34, %v1445_v24  ;;  %vm9116_vm12 = vcmp.eq.s32.totalorder %v9115_v11, 0  ;;  %vm8741_vm9 = vcmp.eq.s32.totalorder %v9117_v8, 1  ;;  %v9123_v34 = vld [vmem:[#allocation25_spill] sm:$0xff] }
 0x14a   : >> { %v1447_v7 = vsel %vm9116_vm12, %v9114_v21, 0.0  ;;  %v1323_v22 = vsel %vm1291_vm15, 3, %v1227_v45  ;;  %vm9119_vm10 = vcmp.eq.s32.totalorder %v9118_v31, 0  ;;  %vm9121_vm3 = vcmp.eq.s32.totalorder %v9120_v37, 0  ;;  %3787 = vmatpush.msk.msrb.mxu2 %vm8741_vm9, %v8964_v33  ;;  %v9124_v45 = vld [vmem:[#allocation30_spill] sm:$0xff]  ;;  %v9141_v37 = vld [vmem:[#allocation35_spill] sm:$0xff] }
 0x14b   : >> { %3701 = vmatpush.msk.msrb.mxu1 %vm9119_vm10, %v8964_v33  ;;  %3691 = vmatpush.msk.msrb.mxu0 %vm9121_vm3, %v8964_v33  ;;  %v2142_v59 = vadd.f32 %v2141_v26, %v9122_v15  ;;  %v6435_v55 = vsel %vm843_vm13, %v1323_v22, 4294967295  ;;  %v1638_v24 = vadd.f32 %v1637_v57, %v1446_v50  ;;  %vm9125_vm14 = vcmp.eq.s32.totalorder %v9124_v45, 0  ;;  %v9127_v26 = vld [vmem:[#allocation50_spill] sm:$0xff]  ;;  %v9129_v57 = vld [vmem:[#allocation125_spill] sm:$0xff] }
 0x14c   : >> { %v1448_v4 = vsel %vm9125_vm14, %v9123_v34, 0.0  ;;  %vm8710_vm2 = vcmp.eq.s32.totalorder %v6435_v55, 0  ;;  %vm8712_vm7 = vcmp.eq.s32.totalorder %v9126_v52, 1  ;;  %vm8742_vm15 = vcmp.eq.s32.totalorder %v9124_v45, 1  ;;  %v9132_v22 = vld [vmem:[#allocation141_spill] sm:$0xff]  ;;  %v9190_v34 = vld [vmem:[#allocation142_spill] sm:$0xff] }
 0x14d   : >> { %vm9128_vm12 = vcmp.eq.s32.totalorder %v9127_v26, 0  ;;  %vm9130_vm13 = vcmp.eq.s32.totalorder %v9129_v57, 0  ;;  %v2612_v50 = vadd.f32 %v2611_v6, %v9131_v40  ;;  %v3081_v15 = vadd.f32 %v3080_v27, %v9132_v22  ;;  %3788 = vmatpush.msk.msrb.mxu2 %vm8742_vm15, %v8964_v33  ;;  %v9135_v57 = vld [vmem:[#allocation23_spill] sm:$0xff] }
 0x14e   : >> { %3702 = vmatpush.msk.msrb.mxu1 %vm9128_vm12, %v8964_v33  ;;  %3692 = vmatpush.msk.msrb.mxu0 %vm9130_vm13, %v8964_v33  ;;  %v3591_v32 = vsel %vm8710_vm2, 1.0, %v8970_v43  ;;  %v1639_v53 = vadd.f32 %v1638_v24, %v1447_v7  ;;  %vm9134_vm10 = vcmp.eq.s32.totalorder %v9117_v8, 0  ;;  %vm8713_vm3 = vcmp.eq.s32.totalorder %v9135_v57, 1  ;;  %v9136_v27 = vld [vmem:[#allocation63_spill] sm:$0xff] }
 0x14f   : >> { %v1449_v9 = vsel %vm9134_vm10, %v9133_v46, 0.0  ;;  %3678 = vmatpush.msk.msra.mxu3 %vm1387_vm11, %v3591_v32  ;;  %vm8746_vm14 = vcmp.eq.s32.totalorder %v9115_v11, 1  ;;  %vm9137_vm12 = vcmp.eq.s32.totalorder %v9136_v27, 0  ;;  %v1673_v6 = vadd.f32 %v6318_v51, %v5771_v61  ;;  %v9138_v7 = vld [vmem:[#allocation115_spill] sm:$0xff]  ;;  %v9139_v32 = vld [vmem:[#allocation4_spill] sm:$0xff] }
 0x150   : >> { %3703 = vmatpush.msk.msrb.mxu1 %vm9137_vm12, %v8964_v33  ;;  %v2143_v24 = vadd.f32 %v2142_v59, %v9138_v7  ;;  %v1640_v22 = vadd.f32 %v1639_v53, %v1448_v4  ;;  %3789 = vmatpush.msk.msrb.mxu2 %vm8746_vm14, %v8964_v33  ;;  %vm8714_vm13 = vcmp.eq.s32.totalorder %v9106_v48, 1  ;;  %vm9140_vm10 = vcmp.eq.s32.totalorder %v4846_v5, 0  ;;  %v9142_v61 = vld [vmem:[#allocation72_spill] sm:$0xff]  ;;  %v9144_v53 = vld [vmem:[#allocation133_spill] sm:$0xff] }
 0x151   : >> { %3803 = vmatpush.msk.msrb.mxu3 %vm8712_vm7, %v8964_v33  ;;  %v1450_v40 = vsel %vm9140_vm10, %v9139_v32, 0.0  ;;  %vm8723_vm12 = vcmp.eq.s32.totalorder %v9141_v37, 1  ;;  %vm8752_vm2 = vcmp.eq.s32.totalorder %v5318_v36, 1  ;;  %vm9143_vm5 = vcmp.eq.s32.totalorder %v9142_v61, 0  ;;  %v9146_v4 = vld [vmem:[#allocation117_spill] sm:$0xff]  ;;  %v9148_v32 = vld [vmem:[#allocation19_spill] sm:$0xff] }
 0x152   : >> { %3704 = vmatpush.msk.msrb.mxu1 %vm9143_vm5, %v8964_v33  ;;  %vm9145_vm7 = vcmp.eq.s32.totalorder %v9144_v53, 0  ;;  %v2613_v51 = vadd.f32 %v2612_v50, %v9146_v4  ;;  %v9147_v59 = vld [vmem:[#allocation129_spill] sm:$0xff]  ;;  %v1641_v27 = vadd.f32 %v1640_v22, %v1449_v9  ;;  %3790 = vmatpush.msk.msrb.mxu2 %vm8714_vm13, %v8964_v33  ;;  %vm9149_vm5 = vcmp.eq.s32.totalorder %v9135_v57, 0  ;;  %v9151_v4 = vld [vmem:[#allocation48_spill] sm:$0xff]  ;;  %v9156_v22 = vld [vmem:[#allocation43_spill] sm:$0xff] }
 0x153   : >> { %3693 = vmatpush.msk.msrb.mxu0 %vm9145_vm7, %v8964_v33  ;;  %v3082_v7 = vadd.f32 %v3081_v15, %v9147_v59  ;;  %3804 = vmatpush.msk.msrb.mxu3 %vm8713_vm3, %v8964_v33  ;;  %v6502_v61 = vsel %vm9149_vm5, %v9148_v32, 0.0  ;;  %v1451_v50 = vsel %vm1387_vm11, %v6355_v56, 0.0  ;;  %vm8722_vm7 = vcmp.eq.s32.totalorder %v9151_v4, 1  ;;  %v9152_v9 = vld [vmem:[#allocation85_spill] sm:$0xff]  ;;  %v9154_v15 = vld [vmem:[#allocation146_spill] sm:$0xff] }
 0x154   : >> { %9150 = vst [vmem:[#allocation37_spill] sm:$0xff] %v6502_v61  ;;  %vm8727_vm10 = vcmp.eq.s32.totalorder %v5417_v18, 1  ;;  %vm9153_vm3 = vcmp.eq.s32.totalorder %v9152_v9, 0  ;;  %vm9155_vm13 = vcmp.eq.s32.totalorder %v9154_v15, 0  ;;  %vm9157_vm5 = vcmp.eq.s32.totalorder %v9151_v4, 0  ;;  %v9159_v61 = vld [vmem:[#allocation104_spill] sm:$0xff]  ;;  %3791 = vmatpush.msk.msrb.mxu2 %vm8752_vm2, %v8964_v33  ;;  %3679 = vmatmul.msk.f32.vlgmr.msra.gmra.mxu3 %vm9089_vm0, %v8964_v33 }
 0x155   : >> { %3705 = vmatpush.msk.msrb.mxu1 %vm9153_vm3, %v8964_v33  ;;  %3694 = vmatpush.msk.msrb.mxu0 %vm9155_vm13, %v8964_v33  ;;  %v6518_v59 = vsel %vm9157_vm5, %v9156_v22, 0.0  ;;  %v1674_v32 = vadd.f32 %v1673_v6, %v5679_v17  ;;  %v2144_v53 = vadd.f32 %v2143_v24, %v9159_v61  ;;  %v1642_v56 = vadd.f32 %v1641_v27, %v1450_v40  ;;  %v9160_v15 = vld [vmem:[#allocation54_spill] sm:$0xff]  ;;  %v9161_v9 = vld [vmem:[#allocation56_spill] sm:$0xff]  ;;  %v9164_v22 = vld [vmem:[#allocation163_spill] sm:$0xff] }
 0x156   : >> { %9158 = vst [vmem:[#allocation30_spill] sm:$0xff] %v6518_v59  ;;  %3805 = vmatpush.msk.msrb.mxu3 %vm8723_vm12, %v8964_v33  ;;  %vm9162_vm11 = vcmp.eq.s32.totalorder %v9161_v9, 0  ;;  %v1452_v17 = vsel %vm1388_vm1, %v9164_v22, 0.0  ;;  %vm8728_vm3 = vcmp.eq.s32.totalorder %v9161_v9, 1  ;;  %vm8763_vm13 = vcmp.eq.s32.totalorder %v5501_v16, 1  ;;  %v9165_v40 = vld [vmem:[#allocation97_spill] sm:$0xff]  ;;  %3792 = vmatpush.msk.msrb.mxu2 %vm8727_vm10, %v8964_v33 }
 0x157   : >> { %v6531_v46 = vsel %vm9162_vm11, %v9160_v15, 0.0  ;;  %vm9166_vm5 = vcmp.eq.s32.totalorder %v9165_v40, 0  ;;  %v9167_v27 = vld [vmem:[#allocation65_spill] sm:$0xff]  ;;  %v9168_v6 = vld [vmem:[#allocation68_spill] sm:$0xff]  ;;  %v9171_v61 = vld [vmem:[#allocation106_spill] sm:$0xff]  ;;  %vm8732_vm0 = vcmp.eq.s32.totalorder %v5594_v42, 1 }
 0x158   : >> { %9163 = vst [vmem:[#allocation177_spill] sm:$0xff] %v6531_v46  ;;  %3706 = vmatpush.msk.msrb.mxu1 %vm9166_vm5, %v8964_v33  ;;  %vm9169_vm11 = vcmp.eq.s32.totalorder %v9168_v6, 0  ;;  %v2614_v15 = vadd.f32 %v2613_v51, %v9171_v61  ;;  %v9172_v22 = vld [vmem:[#allocation119_spill] sm:$0xff]  ;;  %v1643_v46 = vadd.f32 %v1642_v56, %v1451_v50  ;;  %3806 = vmatpush.msk.msrb.mxu3 %vm8722_vm7, %v8964_v33  ;;  %v9174_v40 = vld [vmem:[#allocation81_spill] sm:$0xff]  ;;  %vm9178_vm5 = vcmp.eq.s32.totalorder %v9177_v63, 0  ;;  %v9250_v16 = vld [vmem:[#allocation4_spill] sm:$0xff] }
 0x159   : >> { %v6547_v24 = vsel %vm9169_vm11, %v9167_v27, 0.0  ;;  %v3083_v59 = vadd.f32 %v3082_v7, %v9172_v22  ;;  %vm9175_vm1 = vcmp.eq.s32.totalorder %v9174_v40, 0  ;;  %v9176_v27 = vld [vmem:[#allocation153_spill] sm:$0xff]  ;;  %vm8731_vm11 = vcmp.eq.s32.totalorder %v9168_v6, 1  ;;  %v9181_v7 = vld [vmem:[#allocation155_spill] sm:$0xff]  ;;  %3793 = vmatpush.msk.msrb.mxu2 %vm8763_vm13, %v8964_v33 }
 0x15a   : >> { %9170 = vst [vmem:[#allocation178_spill] sm:$0xff] %v6547_v24  ;;  %v6560_v37 = vsel %vm9175_vm1, %v9173_v38, 0.0  ;;  %v1453_v51 = vsel %vm9178_vm5, %v9176_v27, 0.0  ;;  %v9179_v56 = vld [vmem:[#allocation105_spill] sm:$0xff]  ;;  %vm9182_vm12 = vcmp.eq.s32.totalorder %v9181_v7, 0  ;;  %v9183_v50 = vld [vmem:[#allocation87_spill] sm:$0xff]  ;;  %v1675_v38 = vadd.f32 %v1674_v32, %v5585_v20  ;;  %3807 = vmatpush.msk.msrb.mxu3 %vm8728_vm3, %v8964_v33 }
 0x15b   : >> { %vm9180_vm7 = vcmp.eq.s32.totalorder %v9179_v56, 0  ;;  %3695 = vmatpush.msk.msrb.mxu0 %vm9182_vm12, %v8964_v33  ;;  %v9184_v22 = vld [vmem:[#allocation89_spill] sm:$0xff]  ;;  %v1644_v18 = vadd.f32 %v1643_v46, %v1452_v17  ;;  %v9187_v7 = vld [vmem:[#allocation120_spill] sm:$0xff]  ;;  %v9188_v56 = vld [vmem:[#allocation123_spill] sm:$0xff]  ;;  %vm8736_vm5 = vcmp.eq.s32.totalorder %v9174_v40, 1  ;;  %3794 = vmatpush.msk.msrb.mxu2 %vm8732_vm0, %v8964_v33  ;;  %vm1885_vm0 = vcmp.eq.s32.totalorder %v5071_v13, 1 }
 0x15c   : >> { %3707 = vmatpush.msk.msrb.mxu1 %vm9180_vm7, %v8964_v33  ;;  %vm9185_vm1 = vcmp.eq.s32.totalorder %v9184_v22, 0  ;;  %v9186_v27 = vld [vmem:[#allocation93_spill] sm:$0xff]  ;;  %vm9189_vm12 = vcmp.eq.s32.totalorder %v9188_v56, 0  ;;  %v9193_v20 = vld [vmem:[#allocation118_spill] sm:$0xff]  ;;  %v9197_v17 = vld [vmem:[#allocation107_spill] sm:$0xff]  ;;  %3808 = vmatpush.msk.msrb.mxu3 %vm8731_vm11, %v8964_v33 }
 0x15d   : >> { %v6576_v61 = vsel %vm9185_vm1, %v9183_v50, 0.0  ;;  %v2145_v4 = vadd.f32 %v2144_v53, %v9186_v27  ;;  %v1456_v58 = vsel %vm9189_vm12, %v9187_v7, 0.0  ;;  %v9191_v50 = vld [vmem:[#allocation144_spill] sm:$0xff]  ;;  %vm8737_vm1 = vcmp.eq.s32.totalorder %v5696_v35, 1  ;;  %3696 = vmatpush.msk.msrb.mxu0 %vm1404_vm8, %v8964_v33  ;;  %v9196_v32 = vld [vmem:[#allocation94_spill] sm:$0xff]  ;;  %v9209_v5 = vld [vmem:[#allocation109_spill] sm:$0xff] }
 0x15e   : >> { %vm9192_vm7 = vcmp.eq.s32.totalorder %v9191_v50, 0  ;;  %vm9194_vm10 = vcmp.eq.s32.totalorder %v9193_v20, 0  ;;  %v2615_v53 = vadd.f32 %v2614_v15, %v9196_v32  ;;  %v3084_v27 = vadd.f32 %v3083_v59, %v9197_v17  ;;  %v9198_v20 = vld [vmem:[#allocation131_spill] sm:$0xff]  ;;  %3809 = vmatpush.msk.msrb.mxu3 %vm8736_vm5, %v8964_v33  ;;  %3795 = vmatpush.msk.msrb.mxu2 %vm8737_vm1, %v8964_v33 }
 0x15f   : >> { %v1454_v24 = vsel %vm9192_vm7, %v9190_v34, 0.0  ;;  %3708 = vmatpush.msk.msrb.mxu1 %vm9194_vm10, %v8964_v33  ;;  %v1645_v7 = vadd.f32 %v1644_v18, %v1453_v51  ;;  %vm1887_vm12 = vcmp.eq.s32.totalorder %v4887_v25, 1  ;;  %v9199_v34 = vld [vmem:[#allocation136_spill] sm:$0xff]  ;;  %vm8738_vm8 = vcmp.eq.s32.totalorder %v9184_v22, 1  ;;  %v9201_v18 = vld [vmem:[#allocation127_spill] sm:$0xff]  ;;  %3697 = vmatpush.msk.msrb.mxu0 %vm1403_vm4, %v8964_v33  ;;  %v9203_v51 = vld [vmem:[#allocation82_spill] sm:$0xff] }
 0x160   : >> { %vm9200_vm10 = vcmp.eq.s32.totalorder %v9199_v34, 0  ;;  %vm8739_vm7 = vcmp.eq.s32.totalorder %v5776_v14, 1  ;;  %vm9202_vm3 = vcmp.eq.s32.totalorder %v9201_v18, 0  ;;  %v3764_v59 = vsel %vm1887_vm12, 1.0, %v8970_v43  ;;  %v9205_v18 = vld [vmem:[#allocation140_spill] sm:$0xff]  ;;  %3810 = vmatpush.msk.msrb.mxu3 %vm8738_vm8, %v8964_v33 }
 0x161   : >> { %v1455_v46 = vsel %vm9200_vm10, %v9198_v20, 0.0  ;;  %3709 = vmatpush.msk.msrb.mxu1 %vm9202_vm3, %v8964_v33  ;;  %v1676_v15 = vadd.f32 %v1675_v38, %v5488_v2  ;;  %v2146_v17 = vadd.f32 %v2145_v4, %v9203_v51  ;;  %v1646_v32 = vadd.f32 %v1645_v7, %v1454_v24  ;;  %3822 = vmatpush.msk.msra.mxu0 %vm8735_vm6, %v3764_v59  ;;  %v9207_v2 = vld [vmem:[#allocation84_spill] sm:$0xff] }
 0x162   : >> { %vm1886_vm3 = vcmp.eq.s32.totalorder %v4979_v10, 1  ;;  %vm8743_vm4 = vcmp.eq.s32.totalorder %v9204_v28, 1  ;;  %vm8744_vm10 = vcmp.eq.s32.totalorder %v5875_v0, 1  ;;  %vm9206_vm11 = vcmp.eq.s32.totalorder %v9205_v18, 0  ;;  %v9208_v24 = vld [vmem:[#allocation96_spill] sm:$0xff]  ;;  %3796 = vmatpush.msk.msrb.mxu2 %vm8739_vm7, %v8964_v33  ;;  %v9210_v18 = vld [vmem:[#allocation111_spill] sm:$0xff] }
 0x163   : >> { %3710 = vmatpush.msk.msrb.mxu1 %vm9206_vm11, %v8964_v33  ;;  %v3763_v38 = vsel %vm1886_vm3, 1.0, %v8970_v43  ;;  %v2616_v4 = vadd.f32 %v2615_v53, %v9207_v2  ;;  %v3085_v7 = vadd.f32 %v3084_v27, %v9208_v24  ;;  %v1647_v51 = vadd.f32 %v1646_v32, %v1455_v46  ;;  %v9212_v27 = vld [vmem:[#allocation152_spill] sm:$0xff]  ;;  %v9214_v46 = vld [vmem:[#allocation98_spill] sm:$0xff]  ;;  %3811 = vmatpush.msk.msrb.mxu3 %vm8743_vm4, %v8964_v33 }
 0x164   : >> { %v3762_v59 = vsel %vm1885_vm0, 1.0, %v8970_v43  ;;  %vm9211_vm11 = vcmp.eq.s32.totalorder %v9210_v18, 0  ;;  %vm8745_vm6 = vcmp.eq.s32.totalorder %v9210_v18, 1  ;;  %vm8748_vm5 = vcmp.eq.s32.totalorder %v5959_v54, 1  ;;  %3823 = vmatpush.msk.msra.mxu0 %vm8741_vm9, %v3763_v38  ;;  %3797 = vmatpush.msk.msrb.mxu2 %vm8744_vm10, %v8964_v33  ;;  %v9216_v38 = vld [vmem:[#allocation71_spill] sm:$0xff] }
 0x165   : >> { %v1457_v20 = vsel %vm9211_vm11, %v9209_v5, 0.0  ;;  %vm9213_vm1 = vcmp.eq.s32.totalorder %v9212_v27, 0  ;;  %vm1884_vm8 = vcmp.eq.s32.totalorder %v5179_v39, 1  ;;  %vm9215_vm7 = vcmp.eq.s32.totalorder %v9204_v28, 0  ;;  %3812 = vmatpush.msk.msrb.mxu3 %vm8745_vm6, %v8964_v33 }
 0x166   : >> { %3711 = vmatpush.msk.msrb.mxu1 %vm9213_vm1, %v8964_v33  ;;  %v1458_v32 = vsel %vm9215_vm7, %v9214_v46, 0.0  ;;  %v1677_v53 = vadd.f32 %v1676_v15, %v5402_v19  ;;  %v1648_v24 = vadd.f32 %v1647_v51, %v1456_v58  ;;  %v3761_v2 = vsel %vm1884_vm8, 1.0, %v8970_v43  ;;  %v9217_v46 = vld [vmem:[#allocation150_spill] sm:$0xff]  ;;  %v9218_v19 = vld [vmem:[#allocation160_spill] sm:$0xff]  ;;  %3824 = vmatpush.msk.msra.mxu0 %vm8742_vm15, %v3762_v59  ;;  %v9220_v58 = vld [vmem:[#allocation73_spill] sm:$0xff] }
 0x167   : >> { %v2147_v8 = vadd.f32 %v2146_v17, %v9216_v38  ;;  %vm8747_vm1 = vcmp.eq.s32.totalorder %v9188_v56, 1  ;;  %vm8749_vm7 = vcmp.eq.s32.totalorder %v9217_v46, 1  ;;  %vm9219_vm11 = vcmp.eq.s32.totalorder %v9218_v19, 0  ;;  %v9221_v51 = vld [vmem:[#allocation86_spill] sm:$0xff]  ;;  %3798 = vmatpush.msk.msrb.mxu2 %vm8748_vm5, %v8964_v33 }
 0x168   : >> { %3712 = vmatpush.msk.msrb.mxu1 %vm9219_vm11, %v8964_v33  ;;  %vm8751_vm9 = vcmp.eq.s32.totalorder %v5285_v3, 1  ;;  %v2617_v15 = vadd.f32 %v2616_v4, %v9220_v58  ;;  %v3086_v27 = vadd.f32 %v3085_v7, %v9221_v51  ;;  %v1649_v5 = vadd.f32 %v1648_v24, %v1457_v20  ;;  %3825 = vmatpush.msk.msra.mxu0 %vm8746_vm14, %v3761_v2  ;;  %v9223_v2 = vld [vmem:[#allocation60_spill] sm:$0xff] }
 0x169   : >> { %v3760_v17 = vsel %vm8751_vm9, 1.0, %v8970_v43  ;;  %vm8757_vm11 = vcmp.eq.s32.totalorder %v9199_v34, 1  ;;  %vm8754_vm15 = vcmp.eq.s32.totalorder %v6162_v1, 1  ;;  %vm1903_vm4 = vcmp.eq.s32.totalorder %v4934_v47, 1  ;;  %3813 = vmatpush.msk.msrb.mxu3 %vm8747_vm1, %v8964_v33  ;;  %3799 = vmatpush.msk.msrb.mxu2 %vm8749_vm7, %v8964_v33  ;;  %v9236_v58 = vld [vmem:[#allocation64_spill] sm:$0xff] }
 0x16a   : >> { %vm9222_vm10 = vcmp.eq.s32.totalorder %v6260_v49, 0  ;;  %vm8750_vm6 = vcmp.eq.s32.totalorder %v5373_v62, 1  ;;  %v1650_v20 = vadd.f32 %v1649_v5, %v1458_v32  ;;  %v1678_v4 = vadd.f32 %v1677_v53, %v5313_v23  ;;  %v9226_v32 = vld [vmem:[#allocation74_spill] sm:$0xff] }
 0x16b   : >> { %3713 = vmatpush.msk.msrb.mxu1 %vm9222_vm10, %v8964_v33  ;;  %v3780_v24 = vsel %vm1903_vm4, 1.0, %v8970_v43  ;;  %v3759_v7 = vsel %vm8750_vm6, 1.0, %v8970_v43  ;;  %v2148_v5 = vadd.f32 %v2147_v8, %v9223_v2  ;;  %vm8753_vm10 = vcmp.eq.s32.totalorder %v9191_v50, 1  ;;  %3814 = vmatpush.msk.msrb.mxu3 %vm8757_vm11, %v8964_v33 }
 0x16c   : >> { %vm8755_vm14 = vcmp.eq.s32.totalorder %v6242_v30, 1  ;;  %vm1902_vm1 = vcmp.eq.s32.totalorder %v9108_v41, 1  ;;  %vm9224_vm5 = vcmp.eq.s32.totalorder %v6435_v55, 0  ;;  %vm9225_vm7 = vcmp.eq.s32.totalorder %v9106_v48, 1  ;;  %3800 = vmatpush.msk.msrb.mxu2 %vm8754_vm15, %v8964_v33  ;;  %v9255_v48 = vld [vmem:[#allocation52_spill] sm:$0xff] }
 0x16d   : >> { %3714 = vmatpush.msk.msrb.mxu1 %vm9224_vm5, %v8964_v33  ;;  %3826 = vmatpush.msk.msra.mxu0 %vm9225_vm7, %v3760_v17  ;;  %v1651_v23 = vadd.f32 %v1650_v20, %v6576_v61  ;;  %v1679_v59 = vadd.f32 %v1678_v4, %v5221_v60  ;;  %v3779_v8 = vsel %vm1902_vm1, 1.0, %v8970_v43  ;;  %vm1881_vm5 = vcmp.eq.s32.totalorder %v5456_v29, 1  ;;  %v9228_v20 = vld [vmem:[#allocation49_spill] sm:$0xff] }
 0x16e   : >> { %v3087_v53 = vadd.f32 %v3086_v27, %v9226_v32  ;;  %vm8756_vm7 = vcmp.eq.s32.totalorder %v9177_v63, 1  ;;  %vm1901_vm6 = vcmp.eq.s32.totalorder %v9118_v31, 1  ;;  %vm9227_vm9 = vcmp.eq.s32.totalorder %v9126_v52, 1  ;;  %3815 = vmatpush.msk.msrb.mxu3 %vm8753_vm10, %v8964_v33  ;;  %3801 = vmatpush.msk.msrb.mxu2 %vm8755_vm14, %v8964_v33  ;;  %v9233_v32 = vld [vmem:[#allocation75_spill] sm:$0xff] }
 0x16f   : >> { %3839 = vmatpush.msk.msra.mxu1 %vm9227_vm9, %v3780_v24  ;;  %3827 = vmatpush.msk.msra.mxu0 %vm8752_vm2, %v3759_v7  ;;  %v3758_v60 = vsel %vm1881_vm5, 1.0, %v8970_v43  ;;  %v1652_v61 = vadd.f32 %v1651_v23, %v6560_v37  ;;  %v1680_v17 = vadd.f32 %v1679_v59, %v9114_v21  ;;  %v3778_v27 = vsel %vm1901_vm6, 1.0, %v8970_v43  ;;  %v9230_v37 = vld [vmem:[#allocation178_spill] sm:$0xff]  ;;  %v9231_v7 = vld [vmem:[#allocation25_spill] sm:$0xff]  ;;  %v9232_v59 = vld [vmem:[#allocation100_spill] sm:$0xff] }
 0x170   : >> { %vm1880_vm9 = vcmp.eq.s32.totalorder %v5554_v12, 1  ;;  %v2149_v4 = vadd.f32 %v2148_v5, %v9228_v20  ;;  %vm8768_vm2 = vcmp.eq.s32.totalorder %v6201_v44, 1  ;;  %3858 = vmatpush.msk.msra.mxu2 %vm1887_vm12, %v8964_v33  ;;  %vm1900_vm10 = vcmp.eq.s32.totalorder %v9127_v26, 1  ;;  %3816 = vmatpush.msk.msrb.mxu3 %vm8756_vm7, %v8964_v33 }
 0x171   : >> { %vm9229_vm15 = vcmp.eq.s32.totalorder %v9135_v57, 1  ;;  %v3757_v21 = vsel %vm1880_vm9, 1.0, %v8970_v43  ;;  %v1653_v24 = vadd.f32 %v1652_v61, %v9230_v37  ;;  %v1681_v23 = vadd.f32 %v1680_v17, %v9231_v7  ;;  %v9237_v61 = vld [vmem:[#allocation172_spill] sm:$0xff]  ;;  %v9238_v17 = vld [vmem:[#allocation35_spill] sm:$0xff]  ;;  %v9240_v7 = vld [vmem:[#allocation177_spill] sm:$0xff] }
 0x172   : >> { %3840 = vmatpush.msk.msra.mxu1 %vm9229_vm15, %v3779_v8  ;;  %v3777_v5 = vsel %vm1900_vm10, 1.0, %v8970_v43  ;;  %vm1879_vm12 = vcmp.eq.s32.totalorder %v9232_v59, 1  ;;  %vm9234_vm15 = vcmp.eq.s32.totalorder %v9233_v32, 1  ;;  %v9235_v8 = vld [vmem:[#allocation62_spill] sm:$0xff]  ;;  %v3088_v20 = vadd.f32 %v3087_v53, %v9236_v58  ;;  %3859 = vmatpush.msk.msra.mxu2 %vm1886_vm3, %v8964_v33  ;;  %v9243_v53 = vld [vmem:[#allocation113_spill] sm:$0xff] }
 0x173   : >> { %3828 = vmatpush.msk.msra.mxu0 %vm9234_vm15, %v3758_v60  ;;  %v2618_v51 = vadd.f32 %v2617_v15, %v9235_v8  ;;  %vm8764_vm14 = vcmp.eq.s32.totalorder %v9237_v61, 1  ;;  %vm9239_vm7 = vcmp.eq.s32.totalorder %v9238_v17, 1  ;;  %v3756_v37 = vsel %vm1879_vm12, 1.0, %v8970_v43  ;;  %v9241_v60 = vld [vmem:[#allocation14_spill] sm:$0xff]  ;;  %3817 = vmatpush.msk.msrb.mxu3 %vm8768_vm2, %v8964_v33  ;;  %v9242_v15 = vld [vmem:[#allocation63_spill] sm:$0xff] }
 0x174   : >> { %3841 = vmatpush.msk.msra.mxu1 %vm9239_vm7, %v3778_v27  ;;  %v1654_v2 = vadd.f32 %v1653_v24, %v9240_v7  ;;  %v1682_v38 = vadd.f32 %v1681_v23, %v9241_v60  ;;  %vm1899_vm15 = vcmp.eq.s32.totalorder %v9242_v15, 1  ;;  %vm1878_vm11 = vcmp.eq.s32.totalorder %v9243_v53, 1  ;;  %v9244_v27 = vld [vmem:[#allocation31_spill] sm:$0xff]  ;;  %v9246_v8 = vld [vmem:[#allocation38_spill] sm:$0xff]  ;;  %3860 = vmatpush.msk.msra.mxu2 %vm1885_vm0, %v8964_v33  ;;  %v9247_v24 = vld [vmem:[#allocation48_spill] sm:$0xff] }
 0x175   : >> { %3829 = vmatpush.msk.msra.mxu0 %vm8763_vm13, %v3757_v21  ;;  %vm9245_vm3 = vcmp.eq.s32.totalorder %v9238_v17, 0  ;;  %v2150_v32 = vadd.f32 %v2149_v4, %v9246_v8  ;;  %vm9248_vm7 = vcmp.eq.s32.totalorder %v9247_v24, 1  ;;  %v3776_v23 = vsel %vm1899_vm15, 1.0, %v8970_v43  ;;  %v9249_v7 = vld [vmem:[#allocation30_spill] sm:$0xff]  ;;  %3818 = vmatpush.msk.msrb.mxu3 %vm8764_vm14, %v8964_v33  ;;  %v9251_v4 = vld [vmem:[#allocation72_spill] sm:$0xff]  ;;  %v9252_v8 = vld [vmem:[#allocation125_spill] sm:$0xff] }
 0x176   : >> { %v1464_v58 = vsel %vm9245_vm3, %v9244_v27, 0.0  ;;  %3842 = vmatpush.msk.msra.mxu1 %vm9248_vm7, %v3777_v5  ;;  %v3755_v21 = vsel %vm1878_vm11, 1.0, %v8970_v43  ;;  %v1655_v60 = vadd.f32 %v1654_v2, %v9249_v7  ;;  %v1683_v36 = vadd.f32 %v1682_v38, %v9250_v16  ;;  %v9254_v5 = vld [vmem:[#allocation51_spill] sm:$0xff]  ;;  %3861 = vmatpush.msk.msra.mxu2 %vm1884_vm8, %v8964_v33  ;;  %v9259_v7 = vld [vmem:[#allocation133_spill] sm:$0xff] }
 0x177   : >> { %vm1898_vm0 = vcmp.eq.s32.totalorder %v9251_v4, 1  ;;  %vm1877_vm3 = vcmp.eq.s32.totalorder %v9252_v8, 1  ;;  %vm9253_vm7 = vcmp.eq.s32.totalorder %v5594_v42, 1  ;;  %v2619_v27 = vadd.f32 %v2618_v51, %v9254_v5  ;;  %3875 = vmatpush.msk.msra.mxu3 %vm1903_vm4, %v8964_v33  ;;  %v9256_v51 = vld [vmem:[#allocation173_spill] sm:$0xff]  ;;  %v9263_v42 = vld [vmem:[#allocation26_spill] sm:$0xff]  ;;  %v9309_v8 = vld [vmem:[#allocation7_spill] sm:$0xff] }
 0x178   : >> { %3830 = vmatpush.msk.msra.mxu0 %vm9253_vm7, %v3756_v37  ;;  %v3089_v24 = vadd.f32 %v3088_v20, %v9255_v48  ;;  %v3775_v16 = vsel %vm1898_vm0, 1.0, %v8970_v43  ;;  %v3754_v38 = vsel %vm1877_vm3, 1.0, %v8970_v43  ;;  %v1656_v2 = vadd.f32 %v1655_v60, %v1464_v58  ;;  %v9257_v20 = vld [vmem:[#allocation85_spill] sm:$0xff]  ;;  %v9266_v60 = vld [vmem:[#allocation163_spill] sm:$0xff] }
 0x179   : >> { %v1684_v37 = vadd.f32 %v1683_v36, %v9256_v51  ;;  %vm1897_vm7 = vcmp.eq.s32.totalorder %v9257_v20, 1  ;;  %vm9258_vm13 = vcmp.eq.s32.totalorder %v9161_v9, 1  ;;  %vm1876_vm4 = vcmp.eq.s32.totalorder %v9259_v7, 1  ;;  %v9261_v48 = vld [vmem:[#allocation9_spill] sm:$0xff]  ;;  %3876 = vmatpush.msk.msra.mxu3 %vm1902_vm1, %v8964_v33  ;;  %v9272_v9 = vld [vmem:[#allocation42_spill] sm:$0xff] }
 0x17a   : >> { %3843 = vmatpush.msk.msra.mxu1 %vm9258_vm13, %v3776_v23  ;;  %vm9260_vm8 = vcmp.eq.s32.totalorder %v5696_v35, 1  ;;  %vm9262_vm14 = vcmp.eq.s32.totalorder %v9126_v52, 0  ;;  %v2151_v11 = vadd.f32 %v2150_v32, %v9263_v42  ;;  %vm9264_vm2 = vcmp.eq.s32.totalorder %v5285_v3, 1  ;;  %v9265_v23 = vld [vmem:[#allocation37_spill] sm:$0xff]  ;;  %v9269_v42 = vld [vmem:[#allocation146_spill] sm:$0xff]  ;;  %v9271_v35 = vld [vmem:[#allocation39_spill] sm:$0xff] }
 0x17b   : >> { %3831 = vmatpush.msk.msra.mxu0 %vm9260_vm8, %v3755_v21  ;;  %v1466_v5 = vsel %vm9262_vm14, %v9261_v48, 0.0  ;;  %3862 = vmatpush.msk.msra.mxu2 %vm9264_vm2, %v8964_v33  ;;  %v3774_v36 = vsel %vm1897_vm7, 1.0, %v8970_v43  ;;  %v3753_v58 = vsel %vm1876_vm4, 1.0, %v8970_v43  ;;  %v1657_v21 = vadd.f32 %v1656_v2, %v9265_v23  ;;  %v9267_v51 = vld [vmem:[#allocation97_spill] sm:$0xff]  ;;  %v9278_v23 = vld [vmem:[#allocation15_spill] sm:$0xff] }
 0x17c   : >> { %v1685_v32 = vadd.f32 %v1684_v37, %v9266_v60  ;;  %vm1896_vm14 = vcmp.eq.s32.totalorder %v9267_v51, 1  ;;  %vm9268_vm13 = vcmp.eq.s32.totalorder %v9168_v6, 1  ;;  %vm1875_vm1 = vcmp.eq.s32.totalorder %v9269_v42, 1  ;;  %3877 = vmatpush.msk.msra.mxu3 %vm1901_vm6, %v8964_v33  ;;  %v1627_v59 = vld [vmem:[%s4749_s29] sm:$0x1] }
 0x17d   : >> { %3844 = vmatpush.msk.msra.mxu1 %vm9268_vm13, %v3775_v16  ;;  %vm9270_vm2 = vcmp.eq.s32.totalorder %v5776_v14, 1  ;;  %v2620_v48 = vadd.f32 %v2619_v27, %v9271_v35  ;;  %v3090_v3 = vadd.f32 %v3089_v24, %v9272_v9  ;;  %vm9273_vm8 = vcmp.eq.s32.totalorder %v5373_v62, 1  ;;  %v9274_v27 = vld [vmem:[#allocation153_spill] sm:$0xff]  ;;  %v9284_v9 = vld [vmem:[#allocation28_spill] sm:$0xff] }
 0x17e   : >> { %3832 = vmatpush.msk.msra.mxu0 %vm9270_vm2, %v3754_v38  ;;  %3863 = vmatpush.msk.msra.mxu2 %vm9273_vm8, %v8964_v33  ;;  %v3773_v16 = vsel %vm1896_vm14, 1.0, %v8970_v43  ;;  %v3752_v38 = vsel %vm1875_vm1, 1.0, %v8970_v43  ;;  %v1658_v2 = vadd.f32 %v1657_v21, %v1466_v5  ;;  %v1686_v37 = vadd.f32 %v1685_v32, %v9274_v27  ;;  %v9275_v24 = vld [vmem:[#allocation105_spill] sm:$0xff]  ;;  %v9279_v32 = vld [vmem:[#allocation142_spill] sm:$0xff] }
 0x17f   : >> { %vm1895_vm13 = vcmp.eq.s32.totalorder %v9275_v24, 1  ;;  %vm9276_vm2 = vcmp.eq.s32.totalorder %v9174_v40, 1  ;;  %vm9277_vm6 = vcmp.eq.s32.totalorder %v5875_v0, 1  ;;  %v2152_v60 = vadd.f32 %v2151_v11, %v9278_v23  ;;  %3878 = vmatpush.msk.msra.mxu3 %vm1900_vm10, %v8964_v33  ;;  %v9280_v27 = vld [vmem:[#allocation118_spill] sm:$0xff]  ;;  %v9283_v11 = vld [vmem:[#allocation27_spill] sm:$0xff]  ;;  %v9298_v14 = vld [vmem:[#allocation17_spill] sm:$0xff] }
 0x180   : >> { %3845 = vmatpush.msk.msra.mxu1 %vm9276_vm2, %v3774_v36  ;;  %3833 = vmatpush.msk.msra.mxu0 %vm9277_vm6, %v3753_v58  ;;  %v3772_v5 = vsel %vm1895_vm13, 1.0, %v8970_v43  ;;  %v1659_v21 = vrot.slane %v1658_v2, 4  ;;  %v1687_v36 = vadd.f32 %v1686_v37, %v9279_v32  ;;  %vm1894_vm8 = vcmp.eq.s32.totalorder %v9280_v27, 1  ;;  %v9285_v32 = vld [vmem:[#allocation131_spill] sm:$0xff] }
 0x181   : >> { %3864 = vmatpush.msk.msra.mxu2 %vm1881_vm5, %v8964_v33  ;;  %vm9281_vm2 = vcmp.eq.s32.totalorder %v9184_v22, 1  ;;  %vm9282_vm6 = vcmp.eq.s32.totalorder %v5959_v54, 1  ;;  %v2621_v58 = vadd.f32 %v2620_v48, %v9283_v11  ;;  %v3091_v35 = vadd.f32 %v3090_v3, %v9284_v9  ;;  %3879 = vmatpush.msk.msra.mxu3 %vm1899_vm15, %v8964_v33  ;;  %v9288_v3 = vld [vmem:[#allocation155_spill] sm:$0xff]  ;;  %v9291_v9 = vld [vmem:[#allocation5_spill] sm:$0xff]  ;;  %v9297_v54 = vld [vmem:[#allocation16_spill] sm:$0xff] }
 0x182   : >> { %3846 = vmatpush.msk.msra.mxu1 %vm9281_vm2, %v3773_v16  ;;  %3834 = vmatpush.msk.msra.mxu0 %vm9282_vm6, %v3752_v38  ;;  %v3771_v37 = vsel %vm1894_vm8, 1.0, %v8970_v43  ;;  %v1660_v16 = vadd.f32 %v1659_v21, %v1658_v2  ;;  %v1688_v23 = vadd.f32 %v1687_v36, %v9285_v32  ;;  %v9286_v38 = vld [vmem:[#allocation127_spill] sm:$0xff]  ;;  %vm9287_vm5 = vcmp.eq.s32.totalorder %v9204_v28, 1  ;;  %v9292_v36 = vld [vmem:[#allocation120_spill] sm:$0xff] }
 0x183   : >> { %3865 = vmatpush.msk.msra.mxu2 %vm1880_vm9, %v8964_v33  ;;  %vm1893_vm10 = vcmp.eq.s32.totalorder %v9286_v38, 1  ;;  %vm1874_vm2 = vcmp.eq.s32.totalorder %v9288_v3, 1  ;;  %v9289_v48 = vld [vmem:[#allocation3_spill] sm:$0xff]  ;;  %v2153_v11 = vadd.f32 %v2152_v60, %v9291_v9  ;;  %3880 = vmatpush.msk.msra.mxu3 %vm1898_vm0, %v8964_v33  ;;  %v9293_v60 = vld [vmem:[#allocation140_spill] sm:$0xff]  ;;  %vm9294_vm6 = vcmp.eq.s32.totalorder %v9210_v18, 1  ;;  %v9295_v9 = vld [vmem:[#allocation166_spill] sm:$0xff] }
 0x184   : >> { %3847 = vmatpush.msk.msra.mxu1 %vm9287_vm5, %v3772_v5  ;;  %vm9290_vm15 = vcmp.eq.s32.totalorder %v9289_v48, 0  ;;  %v3770_v2 = vsel %vm1893_vm10, 1.0, %v8970_v43  ;;  %v3751_v5 = vsel %vm1874_vm2, 1.0, %v8970_v43  ;;  %v1661_v21 = vrot.slane %v1660_v16, 2 }
 0x185   : >> { %3802 = vmatmul.msk.f32.vlgmr.msrb.gmra.mxu2 %vm9290_vm15, %v8964_v33  ;;  %v1689_v32 = vadd.f32 %v1688_v23, %v9292_v36  ;;  %vm1892_vm9 = vcmp.eq.s32.totalorder %v9293_v60, 1  ;;  %vm1873_vm0 = vcmp.eq.s32.totalorder %v9295_v9, 1  ;;  %v2622_v0 = vadd.f32 %v2621_v58, %v9297_v54  ;;  %3881 = vmatpush.msk.msra.mxu3 %vm1897_vm7, %v8964_v33  ;;  %v9299_v58 = vld [vmem:[#allocation109_spill] sm:$0xff] }
 0x186   : >> { %3866 = vmatpush.msk.msra.mxu2 %vm1879_vm12, %v8964_v33  ;;  %3848 = vmatpush.msk.msra.mxu1 %vm9294_vm6, %v3771_v37  ;;  %vm9296_vm12 = vmmov %vm9290_vm15  ;;  %v3092_v28 = vadd.f32 %v3091_v35, %v9298_v14  ;;  %v3769_v23 = vsel %vm1892_vm9, 1.0, %v8970_v43  ;;  %v3750_v37 = vsel %vm1873_vm0, 1.0, %v8970_v43  ;;  %v1662_v36 = vadd.f32 %v1661_v21, %v1660_v16  ;;  %v9300_v35 = vld [vmem:[#allocation152_spill] sm:$0xff]  ;;  %v9302_v14 = vld [vmem:[#allocation171_spill] sm:$0xff] }
 0x187   : >> { %3819 = vmatmul.msk.f32.vlgmr.msrb.gmra.mxu3 %vm9296_vm12, %v8964_v33  ;;  %v1690_v54 = vadd.f32 %v1689_v32, %v9299_v58  ;;  %vm1891_vm5 = vcmp.eq.s32.totalorder %v9300_v35, 1  ;;  %vm9301_vm15 = vcmp.eq.s32.totalorder %v9188_v56, 1  ;;  %vm1872_vm7 = vcmp.eq.s32.totalorder %v9302_v14, 1  ;;  %v9304_v32 = vld [vmem:[#allocation98_spill] sm:$0xff] }
 0x188   : >> { %3867 = vmatpush.msk.msra.mxu2 %vm1878_vm11, %v8964_v33  ;;  %3849 = vmatpush.msk.msra.mxu1 %vm9301_vm15, %v3770_v2  ;;  %vm9303_vm11 = vcmp.eq.s32.totalorder %v9217_v46, 1  ;;  %v3768_v16 = vsel %vm1891_vm5, 1.0, %v8970_v43  ;;  %v3749_v2 = vsel %vm1872_vm7, 1.0, %v8970_v43  ;;  %v1663_v21 = vrot.slane %v1662_v36, 1  ;;  %v9308_v56 = vld [vmem:[#allocation6_spill] sm:$0xff] }
 0x189   : >> { %3835 = vmatpush.msk.msra.mxu0 %vm9303_vm11, %v3751_v5  ;;  %3882 = vmatpush.msk.msra.mxu3 %vm1896_vm14, %v8964_v33  ;;  %v1691_v58 = vadd.f32 %v1690_v54, %v9304_v32  ;;  %v9305_v5 = vld [vmem:[#allocation174_spill] sm:$0xff]  ;;  %vm1890_vm6 = vcmp.eq.s32.totalorder %v9218_v19, 1  ;;  %vm9306_vm14 = vcmp.eq.s32.totalorder %v9199_v34, 1  ;;  %v6991_v18 = vadd.f32 %v2622_v0, %v9308_v56 }
 0x18a   : >> { %3868 = vmatpush.msk.msra.mxu2 %vm1877_vm3, %v8964_v33  ;;  %v2154_v46 = vadd.f32 %v2153_v11, %v9305_v5  ;;  %3850 = vmatpush.msk.msra.mxu1 %vm9306_vm14, %v3769_v23  ;;  %vm9307_vm3 = vcmp.eq.s32.totalorder %v6162_v1, 1  ;;  %v6994_v53 = vadd.f32 %v3092_v28, %v9309_v8  ;;  %vm1889_vm12 = vcmp.eq.s32.totalorder %v6260_v49, 1  ;;  %v9310_v11 = vld [vmem:[#allocation87_spill] sm:$0xff]  ;;  %v9311_v28 = vld [vmem:[#allocation164_spill] sm:$0xff]  ;;  %v9316_v32 = vld [vmem:[#allocation154_spill] sm:$0xff] }
 0x18b   : >> { %3836 = vmatpush.msk.msra.mxu0 %vm9307_vm3, %v3750_v37  ;;  %3883 = vmatpush.msk.msra.mxu3 %vm1895_vm13, %v8964_v33  ;;  %v3767_v54 = vsel %vm1890_vm6, 1.0, %v8970_v43  ;;  %v1664_v0 = vadd.f32 %v1663_v21, %v1662_v36  ;;  %v1692_v23 = vadd.f32 %v1691_v58, %v9310_v11  ;;  %vm9312_vm15 = vcmp.eq.s32.totalorder %v9191_v50, 1  ;;  %v9314_v36 = vld [vmem:[#allocation8_spill] sm:$0xff]  ;;  %v9334_v5 = vld [vmem:[#allocation110_spill] sm:$0xff] }
 0x18c   : >> { %3869 = vmatpush.msk.msra.mxu2 %vm1876_vm4, %v8964_v33  ;;  %v2155_v37 = vadd.f32 %v2154_v46, %v9311_v28  ;;  %3851 = vmatpush.msk.msra.mxu1 %vm9312_vm15, %v3768_v16  ;;  %vm8787_vm13 = vcmp.eq.s32.totalorder %v4887_v25, 2  ;;  %vm9313_vm11 = vcmp.eq.s32.totalorder %v6242_v30, 1  ;;  %vm1888_vm4 = vcmp.eq.s32.totalorder %v6435_v55, 1 }
 0x18d   : >> { %3837 = vmatpush.msk.msra.mxu0 %vm9313_vm11, %v3749_v2  ;;  %3884 = vmatpush.msk.msra.mxu3 %vm1894_vm8, %v8964_v33  ;;  %vm8791_vm14 = vcmp.eq.s32.totalorder %v9314_v36, 2  ;;  %vm2373_vm3 = vcmp.eq.s32.totalorder %v4934_v47, 2  ;;  %v3766_v46 = vsel %vm1889_vm12, 1.0, %v8970_v43  ;;  %v1665_v16 = vadd.f32 %v1664_v0, %v1627_v59  ;;  %v9315_v2 = vld [vmem:[#allocation76_spill] sm:$0xff]  ;;  %v9319_v0 = vld [vmem:[#allocation65_spill] sm:$0xff] }
 0x18e   : >> { %3870 = vmatpush.msk.msra.mxu2 %vm1875_vm1, %v8964_v33  ;;  %v1693_v21 = vadd.f32 %v1692_v23, %v9315_v2  ;;  %v2156_v58 = vadd.f32 %v2155_v37, %v9316_v32  ;;  %vm9317_vm8 = vcmp.eq.s32.totalorder %v9177_v63, 1  ;;  %vm8788_vm1 = vcmp.eq.s32.totalorder %v4979_v10, 2  ;;  %v9320_v23 = vld [vmem:[#allocation143_spill] sm:$0xff]  ;;  %v9329_v32 = vld [vmem:[#allocation58_spill] sm:$0xff] }
 0x18f   : >> { %3852 = vmatpush.msk.msra.mxu1 %vm9317_vm8, %v3767_v54  ;;  %vm9318_vm15 = vcmp.eq.s32.totalorder %v9289_v48, 0  ;;  %3885 = vmatpush.msk.msra.mxu3 %vm1893_vm10, %v8964_v33  ;;  %v3940_v59 = vsel %vm8787_vm13, 1.0, %v8970_v43  ;;  %vm8811_vm11 = vcmp.eq.s32.totalorder %v9126_v52, 2  ;;  %vm8793_vm8 = vcmp.eq.s32.totalorder %v9108_v41, 2  ;;  %1666 = vst [vmem:[%s4749_s29] sm:$0x1] %v1665_v16  ;;  %v9322_v16 = vld [vmem:[#allocation18_spill] sm:$0xff] }
 0x190   : >> { %3698 = vmatmul.msk.f32.vlgmr.msrb.gmra.mxu0 %vm9318_vm15, %v8964_v33  ;;  %3871 = vmatpush.msk.msra.mxu2 %vm1874_vm2, %v8964_v33  ;;  %v3765_v54 = vsel %vm1888_vm4, 1.0, %v8970_v43  ;;  %v1694_v11 = vadd.f32 %v1693_v21, %v9319_v0  ;;  %v2157_v37 = vadd.f32 %v2156_v58, %v9320_v23  ;;  %vm9321_vm10 = vcmp.eq.s32.totalorder %v6201_v44, 1  ;;  %v9323_v21 = vld [vmem:[#allocation54_spill] sm:$0xff]  ;;  %v9324_v0 = vld [vmem:[#allocation132_spill] sm:$0xff]  ;;  %v9339_v10 = vld [vmem:[#allocation175_spill] sm:$0xff] }
 0x191   : >> { %3853 = vmatpush.msk.msra.mxu1 %vm9321_vm10, %v3766_v46  ;;  %vm8789_vm2 = vcmp.eq.s32.totalorder %v5071_v13, 2  ;;  %vm8790_vm15 = vcmp.eq.s32.totalorder %v9118_v31, 2  ;;  %3962 = vmatpush.msk.msrb.mxu0 %vm8791_vm14, %v8964_v33  ;;  %v3956_v46 = vsel %vm2373_vm3, 1.0, %v8970_v43  ;;  %vm8794_vm10 = vcmp.eq.s32.totalorder %v9322_v16, 2  ;;  %v9338_v13 = vld [vmem:[#allocation99_spill] sm:$0xff] }
 0x192   : >> { %3886 = vmatpush.msk.msra.mxu3 %vm1892_vm9, %v8964_v33  ;;  %3872 = vmatpush.msk.msra.mxu2 %vm1873_vm0, %v8964_v33  ;;  %v3939_v2 = vsel %vm8788_vm1, 1.0, %v8970_v43  ;;  %vm8814_vm13 = vcmp.eq.s32.totalorder %v9135_v57, 2  ;;  %v1695_v58 = vadd.f32 %v1694_v11, %v9323_v21  ;;  %v2158_v8 = vadd.f32 %v2157_v37, %v9324_v0  ;;  %v9326_v37 = vld [vmem:[#allocation43_spill] sm:$0xff]  ;;  %v9327_v0 = vld [vmem:[#allocation121_spill] sm:$0xff] }
 0x193   : >> { %v3955_v56 = vsel %vm8793_vm8, 1.0, %v8970_v43  ;;  %vm9325_vm9 = vcmp.eq.s32.totalorder %v9237_v61, 1  ;;  %vm8795_vm0 = vcmp.eq.s32.totalorder %v5179_v39, 2  ;;  %3963 = vmatpush.msk.msrb.mxu0 %vm8794_vm10, %v8964_v33  ;;  %vm8804_vm1 = vcmp.eq.s32.totalorder %v9124_v45, 2 }
 0x194   : >> { %3854 = vmatpush.msk.msra.mxu1 %vm9325_vm9, %v3765_v54  ;;  %3887 = vmatpush.msk.msra.mxu3 %vm1891_vm5, %v8964_v33  ;;  %v3938_v54 = vsel %vm8789_vm2, 1.0, %v8970_v43  ;;  %vm8820_vm9 = vcmp.eq.s32.totalorder %v9238_v17, 2  ;;  %v7097_v11 = vsel %vm8790_vm15, 1.0, %v8970_v43  ;;  %v1696_v21 = vadd.f32 %v1695_v58, %v9326_v37  ;;  %v9331_v58 = vld [vmem:[#allocation48_spill] sm:$0xff]  ;;  %v9332_v37 = vld [vmem:[#allocation53_spill] sm:$0xff] }
 0x195   : >> { %3873 = vmatpush.msk.msra.mxu2 %vm1872_vm7, %v8964_v33  ;;  %v2159_v23 = vadd.f32 %v2158_v8, %v9327_v0  ;;  %vm9328_vm5 = vcmp.eq.s32.totalorder %v9289_v48, 0  ;;  %vm2370_vm7 = vcmp.eq.s32.totalorder %v9127_v26, 2  ;;  %vm8805_vm2 = vcmp.eq.s32.totalorder %v9329_v32, 2  ;;  %v9330_v8 = vld [vmem:[#allocation40_spill] sm:$0xff]  ;;  %v9333_v0 = vld [vmem:[#allocation31_spill] sm:$0xff]  ;;  %3964 = vmatpush.msk.msrb.mxu0 %vm8804_vm1, %v8964_v33 }
 0x196   : >> { %3715 = vmatmul.msk.f32.vlgmr.msrb.gmra.mxu1 %vm9328_vm5, %v8964_v33  ;;  %3888 = vmatpush.msk.msra.mxu3 %vm1890_vm6, %v8964_v33  ;;  %vm8812_vm15 = vcmp.eq.s32.totalorder %v9330_v8, 2  ;;  %vm8829_vm5 = vcmp.eq.s32.totalorder %v9331_v58, 2  ;;  %v1697_v28 = vadd.f32 %v1696_v21, %v9333_v0  ;;  %vm8810_vm6 = vcmp.eq.s32.totalorder %v9242_v15, 2  ;;  %v9336_v21 = vld [vmem:[#allocation61_spill] sm:$0xff] }
 0x197   : >> { %3998 = vmatpush.msk.msrb.mxu2 %vm8791_vm14, %v3940_v59  ;;  %3979 = vmatpush.msk.msrb.mxu1 %vm8811_vm11, %v8964_v33  ;;  %v3937_v59 = vsel %vm8795_vm0, 1.0, %v8970_v43  ;;  %vm8816_vm14 = vcmp.eq.s32.totalorder %v9332_v37, 2  ;;  %v2160_v31 = vadd.f32 %v2159_v23, %v9334_v5  ;;  %vm8809_vm8 = vcmp.eq.s32.totalorder %v5373_v62, 2  ;;  %v9337_v5 = vld [vmem:[#allocation19_spill] sm:$0xff] }
 0x198   : >> { %3889 = vmatpush.msk.msra.mxu3 %vm1889_vm12, %v8964_v33  ;;  %v3953_v0 = vsel %vm2370_vm7, 1.0, %v8970_v43  ;;  %v3936_v23 = vsel %vm8805_vm2, 1.0, %v8970_v43  ;;  %vm8821_vm0 = vcmp.eq.s32.totalorder %v9336_v21, 2  ;;  %v1698_v39 = vadd.f32 %v1697_v28, %v9337_v5  ;;  %3965 = vmatpush.msk.msrb.mxu0 %vm8812_vm15, %v8964_v33  ;;  %v9340_v5 = vld [vmem:[#allocation9_spill] sm:$0xff] }
 0x199   : >> { %3999 = vmatpush.msk.msrb.mxu2 %vm8794_vm10, %v3939_v2  ;;  %3980 = vmatpush.msk.msrb.mxu1 %vm8814_vm13, %v8964_v33  ;;  %v9335_v2 = vld [vmem:[#allocation56_spill] sm:$0xff]  ;;  %v2161_v41 = vadd.f32 %v2160_v31, %v9338_v13  ;;  %v2624_v26 = vadd.f32 %v6991_v18, %v9339_v10  ;;  %vm8813_vm12 = vcmp.eq.s32.totalorder %v9251_v4, 2  ;;  %v3952_v31 = vsel %vm8810_vm6, 1.0, %v8970_v43  ;;  %v9342_v13 = vld [vmem:[#allocation165_spill] sm:$0xff] }
 0x19a   : >> { %vm8832_vm10 = vcmp.eq.s32.totalorder %v9335_v2, 2  ;;  %3890 = vmatpush.msk.msra.mxu3 %vm1888_vm4, %v8964_v33  ;;  %v3935_v18 = vsel %vm8809_vm8, 1.0, %v8970_v43  ;;  %vm8827_vm2 = vcmp.eq.s32.totalorder %v5456_v29, 2  ;;  %v1699_v28 = vadd.f32 %v1698_v39, %v9340_v5  ;;  %v9343_v39 = vld [vmem:[#allocation75_spill] sm:$0xff]  ;;  %3966 = vmatpush.msk.msrb.mxu0 %vm8816_vm14, %v8964_v33 }
 0x19b   : >> { %4000 = vmatpush.msk.msrb.mxu2 %vm8804_vm1, %v3938_v54  ;;  %3981 = vmatpush.msk.msrb.mxu1 %vm8820_vm9, %v8964_v33  ;;  %vm8842_vm1 = vcmp.eq.s32.totalorder %v9168_v6, 2  ;;  %v9341_v54 = vld [vmem:[#allocation88_spill] sm:$0xff]  ;;  %v2625_v32 = vadd.f32 %v2624_v26, %v9342_v13  ;;  %vm8819_vm4 = vcmp.eq.s32.totalorder %v9257_v20, 2  ;;  %v3951_v62 = vsel %vm8813_vm12, 1.0, %v8970_v43  ;;  %v9344_v26 = vld [vmem:[#allocation77_spill] sm:$0xff] }
 0x19c   : >> { %v2162_v10 = vadd.f32 %v2161_v41, %v9341_v54  ;;  %4015 = vmatpush.msk.msrb.mxu3 %vm8811_vm11, %v3956_v46  ;;  %vm8831_vm8 = vcmp.eq.s32.totalorder %v9343_v39, 2  ;;  %vm8845_vm6 = vcmp.eq.s32.totalorder %v9174_v40, 2  ;;  %vm8826_vm11 = vcmp.eq.s32.totalorder %v5554_v12, 2  ;;  %3967 = vmatpush.msk.msrb.mxu0 %vm8821_vm0, %v8964_v33  ;;  %v9349_v20 = vld [vmem:[#allocation100_spill] sm:$0xff]  ;;  %v9354_v12 = vld [vmem:[#allocation103_spill] sm:$0xff] }
 0x19d   : >> { %4001 = vmatpush.msk.msrb.mxu2 %vm8812_vm15, %v3937_v59  ;;  %3982 = vmatpush.msk.msrb.mxu1 %vm8829_vm5, %v8964_v33  ;;  %v1700_v41 = vrot.slane %v1699_v28, 4  ;;  %v9345_v59 = vld [vmem:[#allocation156_spill] sm:$0xff]  ;;  %vm8825_vm15 = vcmp.eq.s32.totalorder %v9267_v51, 2  ;;  %v3934_v13 = vsel %vm8827_vm2, 1.0, %v8970_v43  ;;  %v3950_v54 = vsel %vm8819_vm4, 1.0, %v8970_v43 }
 0x19e   : >> { %v2163_v46 = vadd.f32 %v2162_v10, %v9344_v26  ;;  %v2626_v5 = vadd.f32 %v2625_v32, %v9345_v59  ;;  %4016 = vmatpush.msk.msrb.mxu3 %vm8814_vm13, %v3955_v56  ;;  %v9346_v10 = vld [vmem:[#allocation83_spill] sm:$0xff]  ;;  %vm8848_vm13 = vcmp.eq.s32.totalorder %v9184_v22, 2  ;;  %v9347_v32 = vld [vmem:[#allocation66_spill] sm:$0xff]  ;;  %v9348_v59 = vld [vmem:[#allocation145_spill] sm:$0xff]  ;;  %v3933_v29 = vsel %vm8826_vm11, 1.0, %v8970_v43  ;;  %3968 = vmatpush.msk.msrb.mxu0 %vm8831_vm8, %v8964_v33 }
 0x19f   : >> { %4002 = vmatpush.msk.msrb.mxu2 %vm8816_vm14, %v3936_v23  ;;  %3983 = vmatpush.msk.msrb.mxu1 %vm8832_vm10, %v8964_v33  ;;  %vm8833_vm12 = vcmp.eq.s32.totalorder %v9346_v10, 2  ;;  %v1701_v56 = vadd.f32 %v1700_v41, %v1699_v28  ;;  %vm2349_vm14 = vcmp.eq.s32.totalorder %v9349_v20, 2  ;;  %v3949_v28 = vsel %vm8825_vm15, 1.0, %v8970_v43  ;;  %v9350_v41 = vld [vmem:[#allocation95_spill] sm:$0xff]  ;;  %v9358_v20 = vld [vmem:[#allocation125_spill] sm:$0xff] }
 0x1a0   : >> { %v2164_v23 = vadd.f32 %v2163_v46, %v9347_v32  ;;  %v2627_v26 = vadd.f32 %v2626_v5, %v9348_v59  ;;  %4017 = vmatpush.msk.msrb.mxu3 %vm8820_vm9, %v7097_v11  ;;  %vm8843_vm4 = vcmp.eq.s32.totalorder %v9350_v41, 2  ;;  %vm8838_vm9 = vcmp.eq.s32.totalorder %v9275_v24, 2  ;;  %v9352_v5 = vld [vmem:[#allocation134_spill] sm:$0xff]  ;;  %v9353_v32 = vld [vmem:[#allocation113_spill] sm:$0xff]  ;;  %3969 = vmatpush.msk.msrb.mxu0 %vm8833_vm12, %v8964_v33 }
 0x1a1   : >> { %4003 = vmatpush.msk.msrb.mxu2 %vm8821_vm0, %v3935_v18  ;;  %3984 = vmatpush.msk.msrb.mxu1 %vm8842_vm1, %v8964_v33  ;;  %v1702_v11 = vrot.slane %v1701_v56, 2  ;;  %v9351_v18 = vld [vmem:[#allocation55_spill] sm:$0xff]  ;;  %vm8837_vm0 = vcmp.eq.s32.totalorder %v9353_v32, 2  ;;  %v3932_v51 = vsel %vm2349_vm14, 1.0, %v8970_v43  ;;  %vm8850_vm15 = vcmp.eq.s32.totalorder %v9354_v12, 2  ;;  %v9367_v41 = vld [vmem:[#allocation130_spill] sm:$0xff] }
 0x1a2   : >> { %v2165_v46 = vadd.f32 %v2164_v23, %v9351_v18  ;;  %v2628_v59 = vadd.f32 %v2627_v26, %v9352_v5  ;;  %4018 = vmatpush.msk.msrb.mxu3 %vm8829_vm5, %v3953_v0  ;;  %v9355_v23 = vld [vmem:[#allocation108_spill] sm:$0xff]  ;;  %vm2364_vm2 = vcmp.eq.s32.totalorder %v9280_v27, 2  ;;  %v9357_v5 = vld [vmem:[#allocation122_spill] sm:$0xff]  ;;  %vm8844_vm5 = vcmp.eq.s32.totalorder %v9358_v20, 2  ;;  %3970 = vmatpush.msk.msrb.mxu0 %vm8843_vm4, %v8964_v33  ;;  %v3607_v32 = vld [vmem:[%s4749_s29 + $0x20] sm:$0x1] }
 0x1a3   : >> { %4004 = vmatpush.msk.msrb.mxu2 %vm8831_vm8, %v3934_v13  ;;  %3985 = vmatpush.msk.msrb.mxu1 %vm8845_vm6, %v8964_v33  ;;  %vm8846_vm11 = vcmp.eq.s32.totalorder %v9355_v23, 2  ;;  %v1703_v13 = vadd.f32 %v1702_v11, %v1701_v56  ;;  %v9356_v0 = vld [vmem:[#allocation44_spill] sm:$0xff]  ;;  %v3948_v4 = vsel %vm8838_vm9, 1.0, %v8970_v43  ;;  %v3931_v56 = vsel %vm8837_vm0, 1.0, %v8970_v43  ;;  %v9359_v11 = vld [vmem:[#allocation111_spill] sm:$0xff] }
 0x1a4   : >> { %v2166_v26 = vadd.f32 %v2165_v46, %v9356_v0  ;;  %v2629_v18 = vadd.f32 %v2628_v59, %v9357_v5  ;;  %4019 = vmatpush.msk.msrb.mxu3 %vm8832_vm10, %v3952_v31  ;;  %vm8854_vm8 = vcmp.eq.s32.totalorder %v9359_v11, 2  ;;  %v9360_v31 = vld [vmem:[#allocation116_spill] sm:$0xff]  ;;  %v3947_v24 = vsel %vm2364_vm2, 1.0, %v8970_v43  ;;  %3971 = vmatpush.msk.msrb.mxu0 %vm8846_vm11, %v8964_v33 }
 0x1a5   : >> { %4005 = vmatpush.msk.msrb.mxu2 %vm8833_vm12, %v3933_v29  ;;  %3986 = vmatpush.msk.msrb.mxu1 %vm8848_vm13, %v8964_v33  ;;  %vm8849_vm10 = vcmp.eq.s32.totalorder %v9360_v31, 2  ;;  %v1704_v29 = vrot.slane %v1703_v13, 1  ;;  %v9361_v59 = vld [vmem:[#allocation32_spill] sm:$0xff]  ;;  %vm8847_vm12 = vcmp.eq.s32.totalorder %v9259_v7, 2  ;;  %v3930_v15 = vsel %vm8844_vm5, 1.0, %v8970_v43 }
 0x1a6   : >> { %v2167_v46 = vadd.f32 %v2166_v26, %v9361_v59  ;;  %v9362_v5 = vld [vmem:[#allocation112_spill] sm:$0xff]  ;;  %4020 = vmatpush.msk.msrb.mxu3 %vm8842_vm1, %v3951_v62  ;;  %v9363_v26 = vld [vmem:[#allocation123_spill] sm:$0xff]  ;;  %vm2363_vm9 = vcmp.eq.s32.totalorder %v9286_v38, 2  ;;  %vm8851_vm1 = vcmp.eq.s32.totalorder %v9367_v41, 2  ;;  %vm8852_vm5 = vcmp.eq.s32.totalorder %v9269_v42, 2  ;;  %3972 = vmatpush.msk.msrb.mxu0 %vm8849_vm10, %v8964_v33 }
 0x1a7   : >> { %v2630_v0 = vadd.f32 %v2629_v18, %v9362_v5  ;;  %4006 = vmatpush.msk.msrb.mxu2 %vm8843_vm4, %v3932_v51  ;;  %vm8857_vm0 = vcmp.eq.s32.totalorder %v9363_v26, 2  ;;  %3987 = vmatpush.msk.msrb.mxu1 %vm8850_vm15, %v8964_v33  ;;  %v1705_v62 = vadd.f32 %v1704_v29, %v1703_v13  ;;  %v9364_v51 = vld [vmem:[#allocation20_spill] sm:$0xff]  ;;  %v9365_v5 = vld [vmem:[#allocation101_spill] sm:$0xff]  ;;  %v3929_v13 = vsel %vm8847_vm12, 1.0, %v8970_v43  ;;  %v9369_v29 = vld [vmem:[#allocation90_spill] sm:$0xff] }
 0x1a8   : >> { %v2168_v18 = vadd.f32 %v2167_v46, %v9364_v51  ;;  %v9366_v27 = vld [vmem:[#allocation176_spill] sm:$0xff]  ;;  %4021 = vmatpush.msk.msrb.mxu3 %vm8845_vm6, %v3950_v54  ;;  %vm8853_vm4 = vcmp.eq.s32.totalorder %v9293_v60, 2  ;;  %v9368_v54 = vld [vmem:[#allocation10_spill] sm:$0xff]  ;;  %v9370_v46 = vld [vmem:[#allocation167_spill] sm:$0xff]  ;;  %vm8860_vm6 = vcmp.eq.s32.totalorder %v9199_v34, 2  ;;  %vm8856_vm12 = vcmp.eq.s32.totalorder %v9288_v3, 2  ;;  %3973 = vmatpush.msk.msrb.mxu0 %vm8851_vm1, %v8964_v33 }
 0x1a9   : >> { %v2631_v59 = vadd.f32 %v2630_v0, %v9365_v5  ;;  %v3094_v20 = vadd.f32 %v6994_v53, %v9366_v27  ;;  %4007 = vmatpush.msk.msrb.mxu2 %vm8846_vm11, %v3931_v56  ;;  %3988 = vmatpush.msk.msrb.mxu1 %vm8854_vm8, %v8964_v33  ;;  %v1706_v53 = vadd.f32 %v3607_v32, %v1705_v62  ;;  %v3946_v5 = vsel %vm2363_vm9, 1.0, %v8970_v43  ;;  %v9371_v51 = vld [vmem:[#allocation138_spill] sm:$0xff]  ;;  %v9372_v32 = vld [vmem:[#allocation79_spill] sm:$0xff] }
 0x1aa   : >> { %v2169_v0 = vadd.f32 %v2168_v18, %v9368_v54  ;;  %4022 = vmatpush.msk.msrb.mxu3 %vm8848_vm13, %v3949_v28  ;;  %vm8855_vm11 = vcmp.eq.s32.totalorder %v9371_v51, 2  ;;  %v3928_v62 = vsel %vm8852_vm5, 1.0, %v8970_v43  ;;  %v3945_v18 = vsel %vm8853_vm4, 1.0, %v8970_v43  ;;  %v9413_v54 = vld [vmem:[#allocation137_spill] sm:$0xff] }
 0x1ab   : >> { %v2632_v56 = vadd.f32 %v2631_v59, %v9369_v29  ;;  %v3095_v27 = vadd.f32 %v3094_v20, %v9370_v46  ;;  %4008 = vmatpush.msk.msrb.mxu2 %vm8849_vm10, %v3930_v15  ;;  %3608 = vst [vmem:[%s4749_s29 + $0x20] sm:$0x1] %v1706_v53  ;;  %v9373_v59 = vld [vmem:[#allocation157_spill] sm:$0xff]  ;;  %3989 = vmatpush.msk.msrb.mxu1 %vm8857_vm0, %v8964_v33  ;;  %vm8859_vm13 = vcmp.eq.s32.totalorder %v9300_v35, 2  ;;  %v9375_v53 = vld [vmem:[#allocation67_spill] sm:$0xff]  ;;  %vm2360_vm5 = vcmp.eq.s32.totalorder %v9218_v19, 2 }
 0x1ac   : >> { %v2170_v20 = vrot.slane %v2169_v0, 4  ;;  %4023 = vmatpush.msk.msrb.mxu3 %vm8850_vm15, %v3948_v4  ;;  %vm8858_vm15 = vcmp.eq.s32.totalorder %v9295_v9, 2  ;;  %vm8863_vm4 = vcmp.eq.s32.totalorder %v6162_v1, 2  ;;  %3974 = vmatpush.msk.msrb.mxu0 %vm8855_vm11, %v8964_v33  ;;  %v3959_v29 = vld [vmem:[%s4749_s29 + $0x30] sm:$0x1] }
 0x1ad   : >> { %v2633_v28 = vadd.f32 %v2632_v56, %v9372_v32  ;;  %v3096_v15 = vadd.f32 %v3095_v27, %v9373_v59  ;;  %4009 = vmatpush.msk.msrb.mxu2 %vm8851_vm1, %v3929_v13  ;;  %v9374_v27 = vld [vmem:[#allocation150_spill] sm:$0xff]  ;;  %v9376_v59 = vld [vmem:[#allocation147_spill] sm:$0xff]  ;;  %v3927_v13 = vsel %vm8856_vm12, 1.0, %v8970_v43  ;;  %3990 = vmatpush.msk.msrb.mxu1 %vm8860_vm6, %v8964_v33  ;;  %vm8862_vm1 = vcmp.eq.s32.totalorder %v9191_v50, 2 }
 0x1ae   : >> { %vm8861_vm10 = vcmp.eq.s32.totalorder %v9374_v27, 2  ;;  %v2171_v4 = vadd.f32 %v2170_v20, %v2169_v0  ;;  %4024 = vmatpush.msk.msrb.mxu3 %vm8854_vm8, %v3947_v24  ;;  %vm2342_vm8 = vcmp.eq.s32.totalorder %v9302_v14, 2  ;;  %v9377_v0 = vld [vmem:[#allocation57_spill] sm:$0xff]  ;;  %vm8865_vm12 = vcmp.eq.s32.totalorder %v6242_v30, 2 }
 0x1af   : >> { %v2634_v56 = vadd.f32 %v2633_v28, %v9375_v53  ;;  %v3097_v46 = vadd.f32 %v3096_v15, %v9376_v59  ;;  %4010 = vmatpush.msk.msrb.mxu2 %vm8855_vm11, %v3928_v62  ;;  %v9378_v28 = vld [vmem:[#allocation135_spill] sm:$0xff]  ;;  %v3926_v62 = vsel %vm8858_vm15, 1.0, %v8970_v43  ;;  %3991 = vmatpush.msk.msrb.mxu1 %vm8862_vm1, %v8964_v33  ;;  %v3944_v59 = vsel %vm8859_vm13, 1.0, %v8970_v43 }
 0x1b0   : >> { %v2172_v24 = vrot.slane %v2171_v4, 2  ;;  %4025 = vmatpush.msk.msrb.mxu3 %vm8857_vm0, %v3946_v5  ;;  %vm2359_vm11 = vcmp.eq.s32.totalorder %v6260_v49, 2  ;;  %vm9379_vm0 = vcmp.eq.s32.totalorder %v9289_v48, 0  ;;  %vm8864_vm13 = vcmp.eq.s32.totalorder %v9177_v63, 2  ;;  %3975 = vmatpush.msk.msrb.mxu0 %vm8861_vm10, %v8964_v33 }
 0x1b1   : >> { %v2635_v20 = vadd.f32 %v2634_v56, %v9377_v0  ;;  %v3098_v15 = vadd.f32 %v3097_v46, %v9378_v28  ;;  %4011 = vmatpush.msk.msrb.mxu2 %vm8861_vm10, %v3927_v13  ;;  %3891 = vmatmul.msk.f32.vlgmr.msra.gmra.mxu3 %vm9379_vm0, %v8964_v33  ;;  %v9380_v46 = vld [vmem:[#allocation46_spill] sm:$0xff]  ;;  %v9381_v28 = vld [vmem:[#allocation124_spill] sm:$0xff]  ;;  %v3925_v13 = vsel %vm2342_vm8, 1.0, %v8970_v43  ;;  %vm9382_vm15 = vmmov %vm9379_vm0  ;;  %vm8869_vm0 = vcmp.eq.s32.totalorder %v9314_v36, 3 }
 0x1b2   : >> { %v2173_v5 = vadd.f32 %v2172_v24, %v2171_v4  ;;  %4026 = vmatpush.msk.msrb.mxu3 %vm8860_vm6, %v3945_v18  ;;  %3874 = vmatmul.msk.f32.vlgmr.msra.gmra.mxu2 %vm9382_vm15, %v8964_v33  ;;  %v3943_v4 = vsel %vm2360_vm5, 1.0, %v8970_v43  ;;  %v9383_v24 = vld [vmem:[#allocation33_spill] sm:$0xff]  ;;  %vm8876_vm15 = vcmp.eq.s32.totalorder %v6435_v55, 2  ;;  %vm8866_vm6 = vcmp.eq.s32.totalorder %v6201_v44, 2 }
 0x1b3   : >> { %v2636_v56 = vadd.f32 %v2635_v20, %v9380_v46  ;;  %v3099_v0 = vadd.f32 %v3098_v15, %v9381_v28  ;;  %4012 = vmatpush.msk.msrb.mxu2 %vm8863_vm4, %v3926_v62  ;;  %v9384_v15 = vld [vmem:[#allocation114_spill] sm:$0xff]  ;;  %3992 = vmatpush.msk.msrb.mxu1 %vm8864_vm13, %v8964_v33  ;;  %v3783_v62 = vld [vmem:[%s4749_s29 + $0x28] sm:$0x1]  ;;  %v3942_v46 = vsel %vm2359_vm11, 1.0, %v8970_v43  ;;  %vm8867_vm10 = vcmp.eq.s32.totalorder %v9322_v16, 3 }
 0x1b4   : >> { %v2174_v18 = vrot.slane %v2173_v5, 1  ;;  %4027 = vmatpush.msk.msrb.mxu3 %vm8862_vm1, %v3944_v59  ;;  %3976 = vmatpush.msk.msrb.mxu0 %vm8863_vm4, %v8964_v33  ;;  %vm8868_vm1 = vcmp.eq.s32.totalorder %v9237_v61, 2  ;;  %vm8870_vm4 = vcmp.eq.s32.totalorder %v9124_v45, 3 }
 0x1b5   : >> { %v2637_v20 = vadd.f32 %v2636_v56, %v9383_v24  ;;  %v3100_v28 = vadd.f32 %v3099_v0, %v9384_v15  ;;  %4013 = vmatpush.msk.msrb.mxu2 %vm8865_vm12, %v3925_v13  ;;  %v9385_v0 = vld [vmem:[#allocation21_spill] sm:$0xff]  ;;  %v9386_v15 = vld [vmem:[#allocation102_spill] sm:$0xff]  ;;  %v3941_v13 = vsel %vm8876_vm15, 1.0, %v8970_v43  ;;  %3993 = vmatpush.msk.msrb.mxu1 %vm8866_vm6, %v8964_v33  ;;  %vm9408_vm15 = vcmp.eq.s32.totalorder %v6242_v30, 1 }
 0x1b6   : >> { %v2175_v59 = vadd.f32 %v2174_v18, %v2173_v5  ;;  %4028 = vmatpush.msk.msrb.mxu3 %vm8864_vm13, %v3943_v4  ;;  %3977 = vmatpush.msk.msrb.mxu0 %vm8865_vm12, %v8964_v33  ;;  %v9387_v5 = vld [vmem:[#allocation11_spill] sm:$0xff]  ;;  %v9388_v18 = vld [vmem:[#allocation92_spill] sm:$0xff]  ;;  %vm8871_vm13 = vcmp.eq.s32.totalorder %v9126_v52, 3  ;;  %vm9389_vm12 = vcmp.eq.s32.totalorder %v9289_v48, 0 }
 0x1b7   : >> { %v2638_v56 = vadd.f32 %v2637_v20, %v9385_v0  ;;  %v3101_v24 = vadd.f32 %v3100_v28, %v9386_v15  ;;  %4138 = vmatpush.msk.msra.mxu2 %vm8869_vm0, %v8964_v33  ;;  %3994 = vmatpush.msk.msrb.mxu1 %vm8868_vm1, %v8964_v33  ;;  %vm9392_vm0 = vcmp.eq.s32.totalorder %v4887_v25, 2  ;;  %v9401_v15 = vld [vmem:[#allocation34_spill] sm:$0xff]  ;;  %v9405_v0 = vld [vmem:[#allocation148_spill] sm:$0xff] }
 0x1b8   : >> { %v2176_v28 = vadd.f32 %v3783_v62, %v2175_v59  ;;  %4029 = vmatpush.msk.msrb.mxu3 %vm8866_vm6, %v3942_v46  ;;  %3838 = vmatmul.msk.f32.vlgmr.msra.gmra.mxu0 %vm9389_vm12, %v8964_v33  ;;  %vm8875_vm6 = vcmp.eq.s32.totalorder %v9135_v57, 3  ;;  %v9421_v57 = vld [vmem:[#allocation126_spill] sm:$0xff] }
 0x1b9   : >> { %v2639_v4 = vadd.f32 %v2638_v56, %v9387_v5  ;;  %v3102_v20 = vadd.f32 %v3101_v24, %v9388_v18  ;;  %4139 = vmatpush.msk.msra.mxu2 %vm8867_vm10, %v8964_v33  ;;  %v9390_v24 = vld [vmem:[#allocation80_spill] sm:$0xff]  ;;  %vm8872_vm10 = vcmp.eq.s32.totalorder %v9330_v8, 3  ;;  %3855 = vmatmul.msk.f32.vlgmr.msra.gmra.mxu1 %vm9389_vm12, %v8964_v33  ;;  %v9391_v56 = vld [vmem:[#allocation69_spill] sm:$0xff]  ;;  %vm8909_vm12 = vcmp.eq.s32.totalorder %v9331_v58, 3 }
 0x1ba   : >> { %3784 = vst [vmem:[%s4749_s29 + $0x28] sm:$0x1] %v2176_v28  ;;  %4030 = vmatpush.msk.msrb.mxu3 %vm8868_vm1, %v3941_v13  ;;  %vm8873_vm1 = vcmp.eq.s32.totalorder %v9238_v17, 3  ;;  %4034 = vmatpush.msk.msra.mxu0 %vm9392_vm0, %v8964_v33  ;;  %v9403_v5 = vld [vmem:[#allocation41_spill] sm:$0xff]  ;;  %v9416_v17 = vld [vmem:[#allocation58_spill] sm:$0xff] }
 0x1bb   : >> { %v2640_v62 = vrot.slane %v2639_v4, 4  ;;  %v3103_v59 = vadd.f32 %v3102_v20, %v9390_v24  ;;  %4140 = vmatpush.msk.msra.mxu2 %vm8870_vm4, %v8964_v33  ;;  %4051 = vmatpush.msk.msra.mxu1 %vm2373_vm3, %v8964_v33  ;;  %vm8874_vm4 = vcmp.eq.s32.totalorder %v9332_v37, 3  ;;  %v9399_v24 = vld [vmem:[#allocation159_spill] sm:$0xff] }
 0x1bc   : >> { %4155 = vmatpush.msk.msra.mxu3 %vm8871_vm13, %v8964_v33  ;;  %vm8884_vm13 = vcmp.eq.s32.totalorder %v9336_v21, 3 }
 0x1bd   : >> { %v2641_v46 = vadd.f32 %v2640_v62, %v2639_v4  ;;  %v3104_v28 = vadd.f32 %v3103_v59, %v9391_v56  ;;  %4141 = vmatpush.msk.msra.mxu2 %vm8872_vm10, %v8964_v33  ;;  %v9393_v4 = vld [vmem:[#allocation59_spill] sm:$0xff]  ;;  %v9394_v62 = vld [vmem:[#allocation22_spill] sm:$0xff]  ;;  %v9396_v59 = vld [vmem:[#allocation29_spill] sm:$0xff]  ;;  %vm2807_vm10 = vcmp.eq.s32.totalorder %v9335_v2, 3 }
 0x1be   : >> { %4156 = vmatpush.msk.msra.mxu3 %vm8875_vm6, %v8964_v33  ;;  %vm9395_vm0 = vcmp.eq.s32.totalorder %v9394_v62, 2  ;;  %vm9397_vm3 = vcmp.eq.s32.totalorder %v9396_v59, 2  ;;  %vm9406_vm6 = vcmp.eq.s32.totalorder %v9374_v27, 1  ;;  %v9420_v2 = vld [vmem:[#allocation95_spill] sm:$0xff] }
 0x1bf   : >> { %v2642_v13 = vrot.slane %v2641_v46, 2  ;;  %v3105_v20 = vadd.f32 %v3104_v28, %v9393_v4  ;;  %4035 = vmatpush.msk.msra.mxu0 %vm9395_vm0, %v8964_v33  ;;  %4052 = vmatpush.msk.msra.mxu1 %vm9397_vm3, %v8964_v33  ;;  %v9398_v4 = vld [vmem:[#allocation47_spill] sm:$0xff]  ;;  %vm9400_vm0 = vcmp.eq.s32.totalorder %v6162_v1, 1  ;;  %vm9402_vm3 = vcmp.eq.s32.totalorder %v9401_v15, 2 }
 0x1c0   : >> { %4157 = vmatpush.msk.msra.mxu3 %vm8873_vm1, %v8964_v33  ;;  %4142 = vmatpush.msk.msra.mxu2 %vm8874_vm4, %v8964_v33  ;;  %v1905_v18 = vsel %vm9400_vm0, %v9399_v24, 0.0  ;;  %vm9404_vm1 = vcmp.eq.s32.totalorder %v9403_v5, 2  ;;  %vm8881_vm4 = vcmp.eq.s32.totalorder %v9343_v39, 3  ;;  %vm9414_vm0 = vcmp.eq.s32.totalorder %v9371_v51, 1 }
 0x1c1   : >> { %v2643_v28 = vadd.f32 %v2642_v13, %v2641_v46  ;;  %v3106_v56 = vadd.f32 %v3105_v20, %v9398_v4  ;;  %4036 = vmatpush.msk.msra.mxu0 %vm9402_vm3, %v8964_v33  ;;  %4053 = vmatpush.msk.msra.mxu1 %vm9404_vm1, %v8964_v33  ;;  %v1906_v46 = vsel %vm9406_vm6, %v9405_v0, 0.0  ;;  %v9407_v13 = vld [vmem:[#allocation168_spill] sm:$0xff]  ;;  %vm8883_vm1 = vcmp.eq.s32.totalorder %v9168_v6, 3  ;;  %v9410_v0 = vld [vmem:[#allocation45_spill] sm:$0xff] }
 0x1c2   : >> { %v1904_v20 = vsel %vm9408_vm15, %v9407_v13, 0.0  ;;  %4158 = vmatpush.msk.msra.mxu3 %vm8909_vm12, %v8964_v33  ;;  %4143 = vmatpush.msk.msra.mxu2 %vm8884_vm13, %v8964_v33  ;;  %v9409_v4 = vld [vmem:[#allocation36_spill] sm:$0xff]  ;;  %vm9411_vm6 = vcmp.eq.s32.totalorder %v9410_v0, 2  ;;  %v9412_v13 = vld [vmem:[#allocation50_spill] sm:$0xff]  ;;  %vm8886_vm15 = vcmp.eq.s32.totalorder %v9346_v10, 3  ;;  %v1907_v58 = vsel %vm9414_vm0, %v9413_v54, 0.0 }
 0x1c3   : >> { %v2644_v24 = vrot.slane %v2643_v28, 1  ;;  %v3107_v53 = vadd.f32 %v3106_v56, %v9409_v4  ;;  %v2098_v32 = vadd.f32 %v1905_v18, %v1904_v20  ;;  %4037 = vmatpush.msk.msra.mxu0 %vm9411_vm6, %v8964_v33  ;;  %4054 = vmatpush.msk.msra.mxu1 %vm2370_vm7, %v8964_v33  ;;  %vm8887_vm3 = vcmp.eq.s32.totalorder %v9174_v40, 3  ;;  %v9415_v56 = vld [vmem:[#allocation24_spill] sm:$0xff]  ;;  %v9418_v54 = vld [vmem:[#allocation63_spill] sm:$0xff] }
 0x1c4   : >> { %4159 = vmatpush.msk.msra.mxu3 %vm2807_vm10, %v8964_v33  ;;  %4144 = vmatpush.msk.msra.mxu2 %vm8881_vm4, %v8964_v33  ;;  %vm9417_vm7 = vcmp.eq.s32.totalorder %v9416_v17, 2  ;;  %vm9419_vm6 = vcmp.eq.s32.totalorder %v9418_v54, 2  ;;  %vm8888_vm0 = vcmp.eq.s32.totalorder %v9420_v2, 3  ;;  %vm9422_vm4 = vcmp.eq.s32.totalorder %v9367_v41, 1 }
 0x1c5   : >> { %v2645_v18 = vadd.f32 %v2644_v24, %v2643_v28  ;;  %v3108_v20 = vadd.f32 %v3107_v53, %v9415_v56  ;;  %v2099_v4 = vadd.f32 %v2098_v32, %v1906_v46  ;;  %4038 = vmatpush.msk.msra.mxu0 %vm9417_vm7, %v8964_v33  ;;  %4055 = vmatpush.msk.msra.mxu1 %vm9419_vm6, %v8964_v33  ;;  %v1908_v52 = vsel %vm9422_vm4, %v9421_v57, 0.0  ;;  %v9423_v53 = vld [vmem:[#allocation13_spill] sm:$0xff]  ;;  %v9424_v24 = vld [vmem:[#allocation70_spill] sm:$0xff]  ;;  %v9426_v57 = vld [vmem:[#allocation72_spill] sm:$0xff] }
 0x1c6   : >> { %4160 = vmatpush.msk.msra.mxu3 %vm8883_vm1, %v8964_v33  ;;  %4145 = vmatpush.msk.msra.mxu2 %vm8886_vm15, %v8964_v33  ;;  %vm8889_vm7 = vcmp.eq.s32.totalorder %v9184_v22, 3  ;;  %vm9425_vm6 = vcmp.eq.s32.totalorder %v9424_v24, 2  ;;  %vm9427_vm4 = vcmp.eq.s32.totalorder %v9426_v57, 2  ;;  %vm8891_vm1 = vcmp.eq.s32.totalorder %v9355_v23, 3  ;;  %v9428_v56 = vld [vmem:[#allocation115_spill] sm:$0xff] }
 0x1c7   : >> { %v2646_v32 = vadd.f32 %v3959_v29, %v2645_v18  ;;  %v3109_v28 = vadd.f32 %v3108_v20, %v9423_v53  ;;  %v2100_v46 = vadd.f32 %v2099_v4, %v1907_v58  ;;  %4039 = vmatpush.msk.msra.mxu0 %vm9425_vm6, %v8964_v33  ;;  %4056 = vmatpush.msk.msra.mxu1 %vm9427_vm4, %v8964_v33  ;;  %vm9429_vm13 = vcmp.eq.s32.totalorder %v9360_v31, 1  ;;  %v9430_v4 = vld [vmem:[#allocation78_spill] sm:$0xff]  ;;  %v9432_v18 = vld [vmem:[#allocation85_spill] sm:$0xff] }
 0x1c8   : >> { %v1909_v6 = vsel %vm9429_vm13, %v9428_v56, 0.0  ;;  %4161 = vmatpush.msk.msra.mxu3 %vm8887_vm3, %v8964_v33  ;;  %4146 = vmatpush.msk.msra.mxu2 %vm8888_vm0, %v8964_v33  ;;  %vm2803_vm6 = vcmp.eq.s32.totalorder %v9354_v12, 3  ;;  %vm9431_vm4 = vcmp.eq.s32.totalorder %v9430_v4, 2  ;;  %vm9433_vm13 = vcmp.eq.s32.totalorder %v9432_v18, 2  ;;  %v9434_v56 = vld [vmem:[#allocation104_spill] sm:$0xff]  ;;  %v9438_v53 = vld [vmem:[#allocation97_spill] sm:$0xff] }
 0x1c9   : >> { %3960 = vst [vmem:[%s4749_s29 + $0x30] sm:$0x1] %v2646_v32  ;;  %v3110_v58 = vrot.slane %v3109_v28, 4  ;;  %v2101_v29 = vadd.f32 %v2100_v46, %v1908_v52  ;;  %4040 = vmatpush.msk.msra.mxu0 %vm9431_vm4, %v8964_v33  ;;  %4057 = vmatpush.msk.msra.mxu1 %vm9433_vm13, %v8964_v33  ;;  %vm8895_vm15 = vcmp.eq.s32.totalorder %v9360_v31, 3  ;;  %vm9435_vm3 = vcmp.eq.s32.totalorder %v9355_v23, 1  ;;  %v9436_v46 = vld [vmem:[#allocation91_spill] sm:$0xff] }
 0x1ca   : >> { %v1910_v20 = vsel %vm9435_vm3, %v9434_v56, 0.0  ;;  %4162 = vmatpush.msk.msra.mxu3 %vm8889_vm7, %v8964_v33  ;;  %4147 = vmatpush.msk.msra.mxu2 %vm8891_vm1, %v8964_v33  ;;  %vm2802_vm4 = vcmp.eq.s32.totalorder %v9359_v11, 3  ;;  %vm9437_vm13 = vcmp.eq.s32.totalorder %v9436_v46, 2  ;;  %vm9439_vm0 = vcmp.eq.s32.totalorder %v9438_v53, 2  ;;  %v9440_v56 = vld [vmem:[#allocation93_spill] sm:$0xff] }
 0x1cb   : >> { %v3111_v52 = vadd.f32 %v3110_v58, %v3109_v28  ;;  %v2102_v32 = vadd.f32 %v2101_v29, %v1909_v6  ;;  %4041 = vmatpush.msk.msra.mxu0 %vm9437_vm13, %v8964_v33  ;;  %4058 = vmatpush.msk.msra.mxu1 %vm9439_vm0, %v8964_v33  ;;  %vm8897_vm3 = vcmp.eq.s32.totalorder %v9367_v41, 3  ;;  %vm9441_vm7 = vcmp.eq.s32.totalorder %v9420_v2, 1  ;;  %v9442_v58 = vld [vmem:[#allocation100_spill] sm:$0xff]  ;;  %v9443_v29 = vld [vmem:[#allocation105_spill] sm:$0xff]  ;;  %v9449_v2 = vld [vmem:[#allocation118_spill] sm:$0xff] }
 0x1cc   : >> { %v1911_v22 = vsel %vm9441_vm7, %v9440_v56, 0.0  ;;  %4163 = vmatpush.msk.msra.mxu3 %vm2803_vm6, %v8964_v33  ;;  %4148 = vmatpush.msk.msra.mxu2 %vm8895_vm15, %v8964_v33  ;;  %vm2801_vm13 = vcmp.eq.s32.totalorder %v9363_v26, 3  ;;  %vm9444_vm0 = vcmp.eq.s32.totalorder %v9443_v29, 2  ;;  %vm8899_vm7 = vcmp.eq.s32.totalorder %v9371_v51, 3  ;;  %v9445_v56 = vld [vmem:[#allocation82_spill] sm:$0xff]  ;;  %v9447_v31 = vld [vmem:[#allocation113_spill] sm:$0xff] }
 0x1cd   : >> { %v3112_v6 = vrot.slane %v3111_v52, 2  ;;  %v2103_v28 = vadd.f32 %v2102_v32, %v1910_v20  ;;  %4042 = vmatpush.msk.msra.mxu0 %vm2349_vm14, %v8964_v33  ;;  %4059 = vmatpush.msk.msra.mxu1 %vm9444_vm0, %v8964_v33  ;;  %vm9446_vm1 = vcmp.eq.s32.totalorder %v9346_v10, 1  ;;  %vm8900_vm14 = vcmp.eq.s32.totalorder %v9199_v34, 3 }
 0x1ce   : >> { %v1912_v23 = vsel %vm9446_vm1, %v9445_v56, 0.0  ;;  %4164 = vmatpush.msk.msra.mxu3 %vm2802_vm4, %v8964_v33  ;;  %4149 = vmatpush.msk.msra.mxu2 %vm8897_vm3, %v8964_v33  ;;  %vm9448_vm0 = vcmp.eq.s32.totalorder %v9447_v31, 2  ;;  %vm8902_vm1 = vcmp.eq.s32.totalorder %v9374_v27, 3  ;;  %v9450_v56 = vld [vmem:[#allocation71_spill] sm:$0xff]  ;;  %vm9451_vm15 = vcmp.eq.s32.totalorder %v9343_v39, 1 }
 0x1cf   : >> { %v3113_v20 = vadd.f32 %v3112_v6, %v3111_v52  ;;  %v2104_v32 = vadd.f32 %v2103_v28, %v1911_v22  ;;  %4043 = vmatpush.msk.msra.mxu0 %vm9448_vm0, %v8964_v33  ;;  %4060 = vmatpush.msk.msra.mxu1 %vm2364_vm2, %v8964_v33  ;;  %v1913_v41 = vsel %vm9451_vm15, %v9450_v56, 0.0  ;;  %vm8903_vm0 = vcmp.eq.s32.totalorder %v9191_v50, 3  ;;  %v9452_v6 = vld [vmem:[#allocation125_spill] sm:$0xff]  ;;  %v4135_v28 = vld [vmem:[%s4749_s29 + $0x38] sm:$0x1]  ;;  %v9454_v56 = vld [vmem:[#allocation60_spill] sm:$0xff] }
 0x1d0   : >> { %4165 = vmatpush.msk.msra.mxu3 %vm2801_vm13, %v8964_v33  ;;  %4150 = vmatpush.msk.msra.mxu2 %vm8899_vm7, %v8964_v33  ;;  %vm9453_vm2 = vcmp.eq.s32.totalorder %v9452_v6, 2  ;;  %vm8904_vm15 = vcmp.eq.s32.totalorder %v6162_v1, 3  ;;  %vm9455_vm3 = vcmp.eq.s32.totalorder %v9336_v21, 1  ;;  %vm8906_vm7 = vcmp.eq.s32.totalorder %v6242_v30, 3 }
 0x1d1   : >> { %v3114_v22 = vrot.slane %v3113_v20, 1  ;;  %v2105_v52 = vadd.f32 %v2104_v32, %v1912_v23  ;;  %4044 = vmatpush.msk.msra.mxu0 %vm9453_vm2, %v8964_v33  ;;  %4061 = vmatpush.msk.msra.mxu1 %vm2363_vm9, %v8964_v33  ;;  %v1914_v51 = vsel %vm9455_vm3, %v9454_v56, 0.0  ;;  %vm8905_vm2 = vcmp.eq.s32.totalorder %v9177_v63, 3  ;;  %v9458_v56 = vld [vmem:[#allocation49_spill] sm:$0xff] }
 0x1d2   : >> { %4166 = vmatpush.msk.msra.mxu3 %vm8900_vm14, %v8964_v33  ;;  %4151 = vmatpush.msk.msra.mxu2 %vm8902_vm1, %v8964_v33  ;;  %vm9456_vm9 = vcmp.eq.s32.totalorder %v9259_v7, 2  ;;  %vm9457_vm3 = vcmp.eq.s32.totalorder %v9293_v60, 2  ;;  %vm9459_vm14 = vcmp.eq.s32.totalorder %v9332_v37, 1  ;;  %vm9461_vm1 = vcmp.eq.s32.totalorder %v9300_v35, 2 }
 0x1d3   : >> { %v3115_v23 = vadd.f32 %v3114_v22, %v3113_v20  ;;  %v2106_v32 = vadd.f32 %v2105_v52, %v1913_v41  ;;  %4045 = vmatpush.msk.msra.mxu0 %vm9456_vm9, %v8964_v33  ;;  %4062 = vmatpush.msk.msra.mxu1 %vm9457_vm3, %v8964_v33  ;;  %v1915_v27 = vsel %vm9459_vm14, %v9458_v56, 0.0  ;;  %vm8908_vm9 = vcmp.eq.s32.totalorder %v6201_v44, 3  ;;  %v9462_v22 = vld [vmem:[#allocation38_spill] sm:$0xff] }
 0x1d4   : >> { %4167 = vmatpush.msk.msra.mxu3 %vm8903_vm0, %v8964_v33  ;;  %4152 = vmatpush.msk.msra.mxu2 %vm8904_vm15, %v8964_v33  ;;  %vm9460_vm3 = vcmp.eq.s32.totalorder %v9269_v42, 2  ;;  %vm2827_vm14 = vcmp.eq.s32.totalorder %v4887_v25, 3  ;;  %vm9463_vm0 = vcmp.eq.s32.totalorder %v9330_v8, 1 }
 0x1d5   : >> { %v3116_v41 = vadd.f32 %v4135_v28, %v3115_v23  ;;  %v2107_v20 = vadd.f32 %v2106_v32, %v1914_v51  ;;  %4046 = vmatpush.msk.msra.mxu0 %vm9460_vm3, %v8964_v33  ;;  %4063 = vmatpush.msk.msra.mxu1 %vm9461_vm1, %v8964_v33  ;;  %v1916_v52 = vsel %vm9463_vm0, %v9462_v22, 0.0  ;;  %vm8907_vm3 = vcmp.eq.s32.totalorder %v9237_v61, 3  ;;  %v9466_v28 = vld [vmem:[#allocation26_spill] sm:$0xff]  ;;  %v9469_v32 = vld [vmem:[#allocation15_spill] sm:$0xff] }
 0x1d6   : >> { %4168 = vmatpush.msk.msra.mxu3 %vm8905_vm2, %v8964_v33  ;;  %4153 = vmatpush.msk.msra.mxu2 %vm8906_vm7, %v8964_v33  ;;  %vm9464_vm1 = vcmp.eq.s32.totalorder %v9289_v48, 0  ;;  %vm2826_vm0 = vcmp.eq.s32.totalorder %v9394_v62, 3  ;;  %vm9467_vm2 = vcmp.eq.s32.totalorder %v9124_v45, 1  ;;  %vm9470_vm7 = vcmp.eq.s32.totalorder %v9322_v16, 1 }
 0x1d7   : >> { %4136 = vst [vmem:[%s4749_s29 + $0x38] sm:$0x1] %v3116_v41  ;;  %v2108_v51 = vadd.f32 %v2107_v20, %v1915_v27  ;;  %4014 = vmatmul.msk.f32.vlgmr.msrb.gmra.mxu2 %vm9464_vm1, %v8964_v33  ;;  %vm9465_vm15 = vmmov %vm9464_vm1  ;;  %v1917_v23 = vsel %vm9467_vm2, %v9466_v28, 0.0  ;;  %vm2843_vm1 = vcmp.eq.s32.totalorder %v4934_v47, 3  ;;  %4064 = vmatpush.msk.msra.mxu1 %vm2360_vm5, %v8964_v33  ;;  %vm2825_vm2 = vcmp.eq.s32.totalorder %v9401_v15, 3  ;;  %v9472_v20 = vld [vmem:[#allocation5_spill] sm:$0xff] }
 0x1d8   : >> { %4031 = vmatmul.msk.f32.vlgmr.msrb.gmra.mxu3 %vm9465_vm15, %v8964_v33  ;;  %4210 = vmatpush.msk.msrb.mxu2 %vm2827_vm14, %v8964_v33  ;;  %vm9468_vm15 = vcmp.eq.s32.totalorder %v9288_v3, 2  ;;  %v1918_v56 = vsel %vm9470_vm7, %v9469_v32, 0.0  ;;  %vm9471_vm5 = vcmp.eq.s32.totalorder %v9295_v9, 2  ;;  %vm9473_vm7 = vcmp.eq.s32.totalorder %v9314_v36, 1 }
 0x1d9   : >> { %4169 = vmatpush.msk.msra.mxu3 %vm8908_vm9, %v8964_v33  ;;  %v2109_v27 = vadd.f32 %v2108_v51, %v1916_v52  ;;  %4047 = vmatpush.msk.msra.mxu0 %vm9468_vm15, %v8964_v33  ;;  %vm2842_vm15 = vcmp.eq.s32.totalorder %v9396_v59, 3  ;;  %v1919_v22 = vsel %vm9473_vm7, %v9472_v20, 0.0  ;;  %v4116_v51 = vsel %vm2827_vm14, 1.0, %v8970_v43  ;;  %v9482_v20 = vld [vmem:[#allocation12_spill] sm:$0xff] }
 0x1da   : >> { %4211 = vmatpush.msk.msrb.mxu2 %vm2826_vm0, %v8964_v33  ;;  %4065 = vmatpush.msk.msra.mxu1 %vm2359_vm11, %v8964_v33  ;;  %v4132_v28 = vsel %vm2843_vm1, 1.0, %v8970_v43  ;;  %vm9475_vm11 = vcmp.eq.s32.totalorder %v9237_v61, 1  ;;  %vm9477_vm7 = vcmp.eq.s32.totalorder %v9289_v48, 0  ;;  %vm2840_vm14 = vcmp.eq.s32.totalorder %v9412_v13, 3 }
 0x1db   : >> { %4170 = vmatpush.msk.msra.mxu3 %vm8907_vm3, %v8964_v33  ;;  %v2110_v41 = vadd.f32 %v2109_v27, %v1917_v23  ;;  %4048 = vmatpush.msk.msra.mxu0 %vm9471_vm5, %v8964_v33  ;;  %vm2841_vm3 = vcmp.eq.s32.totalorder %v9403_v5, 3  ;;  %v9474_v23 = vld [vmem:[#allocation174_spill] sm:$0xff]  ;;  %vm9476_vm5 = vcmp.eq.s32.totalorder %v6435_v55, 2  ;;  %v4115_v47 = vsel %vm2826_vm0, 1.0, %v8970_v43 }
 0x1dc   : >> { %4212 = vmatpush.msk.msrb.mxu2 %vm2825_vm2, %v8964_v33  ;;  %v1920_v27 = vsel %vm9475_vm11, %v9474_v23, 0.0  ;;  %4066 = vmatpush.msk.msra.mxu1 %vm9476_vm5, %v8964_v33  ;;  %v4131_v32 = vsel %vm2842_vm15, 1.0, %v8970_v43  ;;  %vm9480_vm11 = vcmp.eq.s32.totalorder %v6201_v44, 1  ;;  %vm9481_vm5 = vcmp.eq.s32.totalorder %v9314_v36, 3 }
 0x1dd   : >> { %4227 = vmatpush.msk.msrb.mxu3 %vm2843_vm1, %v8964_v33  ;;  %v2111_v52 = vadd.f32 %v2110_v41, %v1918_v56  ;;  %4049 = vmatpush.msk.msra.mxu0 %vm2342_vm8, %v8964_v33  ;;  %vm2824_vm8 = vcmp.eq.s32.totalorder %v9410_v0, 3  ;;  %vm9478_vm1 = vmmov %vm9477_vm7  ;;  %v9479_v56 = vld [vmem:[#allocation164_spill] sm:$0xff]  ;;  %vm2839_vm9 = vcmp.eq.s32.totalorder %v9418_v54, 3  ;;  %v4114_v59 = vsel %vm2825_vm2, 1.0, %v8970_v43 }
 0x1de   : >> { %3978 = vmatmul.msk.f32.vlgmr.msrb.gmra.mxu0 %vm9477_vm7, %v8964_v33  ;;  %3995 = vmatmul.msk.f32.vlgmr.msrb.gmra.mxu1 %vm9478_vm1, %v8964_v33  ;;  %v1921_v41 = vsel %vm9480_vm11, %v9479_v56, 0.0  ;;  %vm9483_vm7 = vcmp.eq.s32.totalorder %v9482_v20, 3  ;;  %vm2823_vm1 = vcmp.eq.s32.totalorder %v9416_v17, 3  ;;  %vm9485_vm0 = vcmp.eq.s32.totalorder %v9177_v63, 1  ;;  %v9492_v56 = vld [vmem:[#allocation35_spill] sm:$0xff] }
 0x1df   : >> { %4228 = vmatpush.msk.msrb.mxu3 %vm2842_vm15, %v8964_v33  ;;  %v2112_v25 = vadd.f32 %v2111_v52, %v1919_v22  ;;  %4174 = vmatpush.msk.msrb.mxu0 %vm9481_vm5, %v4116_v51  ;;  %v4130_v22 = vsel %vm2841_vm3, 1.0, %v8970_v43  ;;  %v9484_v52 = vld [vmem:[#allocation154_spill] sm:$0xff]  ;;  %vm9486_vm15 = vcmp.eq.s32.totalorder %v9322_v16, 3  ;;  %vm2822_vm5 = vcmp.eq.s32.totalorder %v9424_v24, 3 }
 0x1e0   : >> { %4191 = vmatpush.msk.msrb.mxu1 %vm9483_vm7, %v4132_v28  ;;  %4213 = vmatpush.msk.msrb.mxu2 %vm2824_vm8, %v8964_v33  ;;  %v1922_v51 = vsel %vm9485_vm0, %v9484_v52, 0.0  ;;  %v9487_v28 = vld [vmem:[#allocation23_spill] sm:$0xff]  ;;  %vm2838_vm7 = vcmp.eq.s32.totalorder %v9426_v57, 3  ;;  %v4113_v5 = vsel %vm2824_vm8, 1.0, %v8970_v43  ;;  %v4129_v23 = vsel %vm2840_vm14, 1.0, %v8970_v43  ;;  %v9494_v52 = vld [vmem:[#allocation132_spill] sm:$0xff] }
 0x1e1   : >> { %4229 = vmatpush.msk.msrb.mxu3 %vm2841_vm3, %v8964_v33  ;;  %v2113_v62 = vadd.f32 %v2112_v25, %v1920_v27  ;;  %4175 = vmatpush.msk.msrb.mxu0 %vm9486_vm15, %v4115_v47  ;;  %vm9488_vm11 = vcmp.eq.s32.totalorder %v9487_v28, 3  ;;  %v1727_v27 = vpop.f32.mrf.mxu0  ;;  %v1747_v25 = vpop.f32.mrf.mxu1  ;;  %v9489_v47 = vld [vmem:[#allocation143_spill] sm:$0xff]  ;;  %vm9490_vm3 = vcmp.eq.s32.totalorder %v9191_v50, 1  ;;  %vm9491_vm2 = vcmp.eq.s32.totalorder %v9124_v45, 3 }
 0x1e2   : >> { %4192 = vmatpush.msk.msrb.mxu1 %vm9488_vm11, %v4131_v32  ;;  %4214 = vmatpush.msk.msrb.mxu2 %vm2823_vm1, %v8964_v33  ;;  %v1923_v32 = vsel %vm9490_vm3, %v9489_v47, 0.0  ;;  %vm9493_vm0 = vcmp.eq.s32.totalorder %v9492_v56, 3  ;;  %vm2821_vm15 = vcmp.eq.s32.totalorder %v9430_v4, 3  ;;  %vm2837_vm8 = vcmp.eq.s32.totalorder %v9432_v18, 3  ;;  %v9498_v47 = vld [vmem:[#allocation121_spill] sm:$0xff] }
 0x1e3   : >> { %4230 = vmatpush.msk.msrb.mxu3 %vm2840_vm14, %v8964_v33  ;;  %v2114_v15 = vadd.f32 %v2113_v62, %v1921_v41  ;;  %4176 = vmatpush.msk.msrb.mxu0 %vm9491_vm2, %v4114_v59  ;;  %v1748_v0 = vadd.f32 %v1747_v25, %v1727_v27  ;;  %v4112_v13 = vsel %vm2823_vm1, 1.0, %v8970_v43  ;;  %v4128_v62 = vsel %vm2839_vm9, 1.0, %v8970_v43  ;;  %v3609_v59 = vld [vmem:[%s4749_s29 + $0x40] sm:$0xff]  ;;  %v1791_v25 = vpop.f32.mrf.mxu3 }
 0x1e4   : >> { %4193 = vmatpush.msk.msrb.mxu1 %vm9493_vm0, %v4130_v22  ;;  %4215 = vmatpush.msk.msrb.mxu2 %vm2822_vm5, %v8964_v33  ;;  %v1771_v22 = vpop.f32.mrf.mxu2  ;;  %vm9495_vm14 = vcmp.eq.s32.totalorder %v9199_v34, 1  ;;  %vm9496_vm11 = vcmp.eq.s32.totalorder %v9330_v8, 3  ;;  %vm2820_vm3 = vcmp.eq.s32.totalorder %v9436_v46, 3  ;;  %vm2836_vm1 = vcmp.eq.s32.totalorder %v9438_v53, 3  ;;  %v3645_v27 = vld [vmem:[%s4749_s29 + $0x60] sm:$0xff] }
 0x1e5   : >> { %4231 = vmatpush.msk.msrb.mxu3 %vm2839_vm9, %v8964_v33  ;;  %v2115_v41 = vadd.f32 %v2114_v15, %v1922_v51  ;;  %v1924_v51 = vsel %vm9495_vm14, %v9494_v52, 0.0  ;;  %4177 = vmatpush.msk.msrb.mxu0 %vm9496_vm11, %v4113_v5  ;;  %v9497_v15 = vld [vmem:[#allocation48_spill] sm:$0xff]  ;;  %v1750_v17 = vadd.f32 %v3609_v59, %v1748_v0  ;;  %v4111_v5 = vsel %vm2822_vm5, 1.0, %v8970_v43 }
 0x1e6   : >> { %4194 = vmatpush.msk.msrb.mxu1 %vm8909_vm12, %v4129_v23  ;;  %4216 = vmatpush.msk.msrb.mxu2 %vm2821_vm15, %v8964_v33  ;;  %v4127_v23 = vsel %vm2838_vm7, 1.0, %v8970_v43  ;;  %vm9499_vm9 = vcmp.eq.s32.totalorder %v9363_v26, 1  ;;  %vm9500_vm2 = vcmp.eq.s32.totalorder %v9332_v37, 3  ;;  %v9501_v0 = vld [vmem:[#allocation56_spill] sm:$0xff]  ;;  %vm2819_vm0 = vcmp.eq.s32.totalorder %v9442_v58, 3 }
 0x1e7   : >> { %4232 = vmatpush.msk.msrb.mxu3 %vm2838_vm7, %v8964_v33  ;;  %v2116_v54 = vadd.f32 %v2115_v41, %v1923_v32  ;;  %v1925_v32 = vsel %vm9499_vm9, %v9498_v47, 0.0  ;;  %4178 = vmatpush.msk.msrb.mxu0 %vm9500_vm2, %v4112_v13  ;;  %vm2835_vm5 = vcmp.eq.s32.totalorder %v9443_v29, 3  ;;  %3644 = vst [vmem:[%s4749_s29 + $0x40] sm:$0xff] %v1750_v17  ;;  %v1792_v24 = vadd.f32 %v1791_v25, %v1771_v22  ;;  %v9505_v22 = vld [vmem:[#allocation68_spill] sm:$0xff]  ;;  %v9507_v17 = vld [vmem:[#allocation99_spill] sm:$0xff]  ;;  %v9516_v29 = vld [vmem:[#allocation77_spill] sm:$0xff] }
 0x1e8   : >> { %4195 = vmatpush.msk.msrb.mxu1 %vm2807_vm10, %v4128_v62  ;;  %4217 = vmatpush.msk.msrb.mxu2 %vm2820_vm3, %v8964_v33  ;;  %v4110_v41 = vsel %vm2821_vm15, 1.0, %v8970_v43  ;;  %v4126_v13 = vsel %vm2837_vm8, 1.0, %v8970_v43  ;;  %v9502_v62 = vld [vmem:[#allocation110_spill] sm:$0xff]  ;;  %vm9503_vm7 = vcmp.eq.s32.totalorder %v9359_v11, 1  ;;  %vm9504_vm14 = vcmp.eq.s32.totalorder %v9336_v21, 3 }
 0x1e9   : >> { %4233 = vmatpush.msk.msrb.mxu3 %vm2837_vm8, %v8964_v33  ;;  %v2117_v57 = vadd.f32 %v2116_v54, %v1924_v51  ;;  %v1926_v59 = vsel %vm9503_vm7, %v9502_v62, 0.0  ;;  %4179 = vmatpush.msk.msrb.mxu0 %vm9504_vm14, %v4111_v5  ;;  %vm9506_vm11 = vcmp.eq.s32.totalorder %v9505_v22, 3  ;;  %vm2818_vm9 = vcmp.eq.s32.totalorder %v9447_v31, 3 }
 0x1ea   : >> { %4196 = vmatpush.msk.msrb.mxu1 %vm9506_vm11, %v4127_v23  ;;  %vm2834_vm2 = vcmp.eq.s32.totalorder %v9449_v2, 3  ;;  %v1794_v4 = vadd.f32 %v3645_v27, %v1792_v24  ;;  %4218 = vmatpush.msk.msrb.mxu2 %vm2819_vm0, %v8964_v33  ;;  %v4109_v18 = vsel %vm2820_vm3, 1.0, %v8970_v43  ;;  %v4125_v51 = vsel %vm2836_vm1, 1.0, %v8970_v43  ;;  %v9511_v23 = vld [vmem:[#allocation88_spill] sm:$0xff]  ;;  %v9512_v27 = vld [vmem:[#allocation89_spill] sm:$0xff] }
 0x1eb   : >> { %4234 = vmatpush.msk.msrb.mxu3 %vm2836_vm1, %v8964_v33  ;;  %v2118_v52 = vadd.f32 %v2117_v57, %v1925_v32  ;;  %vm9508_vm15 = vcmp.eq.s32.totalorder %v9354_v12, 1  ;;  %vm9509_vm8 = vcmp.eq.s32.totalorder %v9343_v39, 3  ;;  %vm9510_vm7 = vcmp.eq.s32.totalorder %v9174_v40, 3  ;;  %v9518_v32 = vld [vmem:[#allocation95_spill] sm:$0xff] }
 0x1ec   : >> { %v1927_v54 = vsel %vm9508_vm15, %v9507_v17, 0.0  ;;  %4180 = vmatpush.msk.msrb.mxu0 %vm9509_vm8, %v4110_v41  ;;  %4197 = vmatpush.msk.msrb.mxu1 %vm9510_vm7, %v4126_v13  ;;  %vm2817_vm14 = vcmp.eq.s32.totalorder %v9452_v6, 3  ;;  %vm2833_vm11 = vcmp.eq.s32.totalorder %v9286_v38, 3  ;;  %3680 = vst [vmem:[%s4749_s29 + $0x60] sm:$0xff] %v1794_v4  ;;  %v4108_v53 = vsel %vm2819_vm0, 1.0, %v8970_v43  ;;  %v9520_v13 = vld [vmem:[#allocation66_spill] sm:$0xff] }
 0x1ed   : >> { %4235 = vmatpush.msk.msrb.mxu3 %vm2835_vm5, %v8964_v33  ;;  %v2119_v46 = vadd.f32 %v2118_v52, %v1926_v59  ;;  %4219 = vmatpush.msk.msrb.mxu2 %vm2818_vm9, %v8964_v33  ;;  %v4124_v5 = vsel %vm2835_vm5, 1.0, %v8970_v43  ;;  %vm9513_vm3 = vcmp.eq.s32.totalorder %v9512_v27, 1  ;;  %vm9514_vm1 = vcmp.eq.s32.totalorder %v9346_v10, 3  ;;  %v9524_v4 = vld [vmem:[#allocation108_spill] sm:$0xff]  ;;  %v9526_v52 = vld [vmem:[#allocation55_spill] sm:$0xff] }
 0x1ee   : >> { %v1928_v25 = vsel %vm9513_vm3, %v9511_v23, 0.0  ;;  %4181 = vmatpush.msk.msrb.mxu0 %vm9514_vm1, %v4109_v18  ;;  %vm9515_vm15 = vcmp.eq.s32.totalorder %v9512_v27, 3  ;;  %vm2816_vm8 = vcmp.eq.s32.totalorder %v9259_v7, 3  ;;  %vm2832_vm7 = vcmp.eq.s32.totalorder %v9293_v60, 3  ;;  %v9528_v17 = vld [vmem:[#allocation116_spill] sm:$0xff]  ;;  %v9533_v23 = vld [vmem:[#allocation150_spill] sm:$0xff] }
 0x1ef   : >> { %4236 = vmatpush.msk.msrb.mxu3 %vm2834_vm2, %v8964_v33  ;;  %4198 = vmatpush.msk.msrb.mxu1 %vm9515_vm15, %v4125_v51  ;;  %v2120_v58 = vadd.f32 %v2119_v46, %v1927_v54  ;;  %vm9517_vm0 = vcmp.eq.s32.totalorder %v9174_v40, 1  ;;  %vm9519_vm5 = vcmp.eq.s32.totalorder %v9518_v32, 3  ;;  %v4107_v24 = vsel %vm2818_vm9, 1.0, %v8970_v43  ;;  %v9530_v54 = vld [vmem:[#allocation44_spill] sm:$0xff] }
 0x1f0   : >> { %4220 = vmatpush.msk.msrb.mxu2 %vm2817_vm14, %v8964_v33  ;;  %v1929_v47 = vsel %vm9517_vm0, %v9516_v29, 0.0  ;;  %4182 = vmatpush.msk.msrb.mxu0 %vm9519_vm5, %v4108_v53  ;;  %v4123_v57 = vsel %vm2834_vm2, 1.0, %v8970_v43  ;;  %vm2815_vm3 = vcmp.eq.s32.totalorder %v9269_v42, 3  ;;  %vm2831_vm1 = vcmp.eq.s32.totalorder %v9300_v35, 3  ;;  %v9542_v42 = vld [vmem:[#allocation32_spill] sm:$0xff] }
 0x1f1   : >> { %4237 = vmatpush.msk.msrb.mxu3 %vm2833_vm11, %v8964_v33  ;;  %4199 = vmatpush.msk.msrb.mxu1 %vm2803_vm6, %v4124_v5  ;;  %v2121_v41 = vadd.f32 %v2120_v58, %v1928_v25  ;;  %vm9521_vm9 = vcmp.eq.s32.totalorder %v9505_v22, 1  ;;  %vm9522_vm2 = vcmp.eq.s32.totalorder %v9289_v48, 0  ;;  %v4106_v2 = vsel %vm2817_vm14, 1.0, %v8970_v43  ;;  %v9532_v5 = vld [vmem:[#allocation149_spill] sm:$0xff] }
 0x1f2   : >> { %4221 = vmatpush.msk.msrb.mxu2 %vm2816_vm8, %v8964_v33  ;;  %v1930_v31 = vsel %vm9521_vm9, %v9520_v13, 0.0  ;;  %vm9523_vm15 = vmmov %vm9522_vm2  ;;  %v4122_v62 = vsel %vm2833_vm11, 1.0, %v8970_v43  ;;  %vm9525_vm0 = vcmp.eq.s32.totalorder %v9524_v4, 3  ;;  %vm2814_vm5 = vcmp.eq.s32.totalorder %v9288_v3, 3  ;;  %v9535_v58 = vld [vmem:[#allocation161_spill] sm:$0xff] }
 0x1f3   : >> { %4238 = vmatpush.msk.msrb.mxu3 %vm2832_vm7, %v8964_v33  ;;  %4154 = vmatmul.msk.f32.vlgmr.msra.gmra.mxu2 %vm9522_vm2, %v8964_v33  ;;  %v2122_v59 = vadd.f32 %v2121_v41, %v1929_v47  ;;  %vm2830_vm9 = vcmp.eq.s32.totalorder %v9218_v19, 3  ;;  %vm9527_vm2 = vcmp.eq.s32.totalorder %v9501_v0, 1  ;;  %v4105_v38 = vsel %vm2816_vm8, 1.0, %v8970_v43  ;;  %v9537_v47 = vld [vmem:[#allocation169_spill] sm:$0xff] }
 0x1f4   : >> { %4171 = vmatmul.msk.f32.vlgmr.msra.gmra.mxu3 %vm9523_vm15, %v8964_v33  ;;  %4183 = vmatpush.msk.msrb.mxu0 %vm9525_vm0, %v4107_v24  ;;  %v1931_v6 = vsel %vm9527_vm2, %v9526_v52, 0.0  ;;  %v4121_v18 = vsel %vm2832_vm7, 1.0, %v8970_v43  ;;  %vm9529_vm14 = vcmp.eq.s32.totalorder %v9528_v17, 3  ;;  %vm2813_vm11 = vcmp.eq.s32.totalorder %v9295_v9, 3 }
 0x1f5   : >> { %4200 = vmatpush.msk.msrb.mxu1 %vm2802_vm4, %v4123_v57  ;;  %4222 = vmatpush.msk.msrb.mxu2 %vm2815_vm3, %v8964_v33  ;;  %v2123_v51 = vadd.f32 %v2122_v59, %v1930_v31  ;;  %vm2829_vm15 = vcmp.eq.s32.totalorder %v6260_v49, 3  ;;  %vm9531_vm0 = vcmp.eq.s32.totalorder %v9497_v15, 1  ;;  %v4104_v60 = vsel %vm2815_vm3, 1.0, %v8970_v43  ;;  %v9539_v57 = vld [vmem:[#allocation130_spill] sm:$0xff]  ;;  %v9544_v31 = vld [vmem:[#allocation139_spill] sm:$0xff]  ;;  %v9549_v59 = vld [vmem:[#allocation20_spill] sm:$0xff] }
 0x1f6   : >> { %4239 = vmatpush.msk.msrb.mxu3 %vm2831_vm1, %v8964_v33  ;;  %4184 = vmatpush.msk.msrb.mxu0 %vm9529_vm14, %v4106_v2  ;;  %v1932_v7 = vsel %vm9531_vm0, %v9530_v54, 0.0  ;;  %v4120_v46 = vsel %vm2831_vm1, 1.0, %v8970_v43  ;;  %vm9534_vm8 = vcmp.eq.s32.totalorder %v9533_v23, 2  ;;  %vm9536_vm7 = vcmp.eq.s32.totalorder %v6162_v1, 2  ;;  %v9545_v2 = vld [vmem:[#allocation138_spill] sm:$0xff]  ;;  %v9553_v54 = vld [vmem:[#allocation128_spill] sm:$0xff] }
 0x1f7   : >> { %4201 = vmatpush.msk.msrb.mxu1 %vm2801_vm13, %v4122_v62  ;;  %4223 = vmatpush.msk.msrb.mxu2 %vm2814_vm5, %v8964_v33  ;;  %v2124_v53 = vadd.f32 %v2123_v51, %v1931_v6  ;;  %v2376_v25 = vsel %vm9534_vm8, %v9532_v5, 0.0  ;;  %v2375_v29 = vsel %vm9536_vm7, %v9535_v58, 0.0  ;;  %vm9538_vm2 = vcmp.eq.s32.totalorder %v6242_v30, 2 }
 0x1f8   : >> { %4240 = vmatpush.msk.msrb.mxu3 %vm2830_vm9, %v8964_v33  ;;  %v2374_v24 = vsel %vm9538_vm2, %v9537_v47, 0.0  ;;  %vm9540_vm14 = vcmp.eq.s32.totalorder %v9539_v57, 3  ;;  %vm9541_vm3 = vcmp.eq.s32.totalorder %v9199_v34, 3  ;;  %vm9543_vm1 = vcmp.eq.s32.totalorder %v9492_v56, 1 }
 0x1f9   : >> { %4185 = vmatpush.msk.msrb.mxu0 %vm9540_vm14, %v4105_v38  ;;  %4202 = vmatpush.msk.msrb.mxu1 %vm9541_vm3, %v4121_v18  ;;  %v1933_v35 = vsel %vm9543_vm1, %v9542_v42, 0.0  ;;  %v2568_v41 = vadd.f32 %v2375_v29, %v2374_v24  ;;  %vm2812_vm0 = vcmp.eq.s32.totalorder %v9302_v14, 3  ;;  %vm2828_vm8 = vcmp.eq.s32.totalorder %v6435_v55, 3  ;;  %v9563_v24 = vld [vmem:[#allocation106_spill] sm:$0xff] }
 0x1fa   : >> { %4224 = vmatpush.msk.msrb.mxu2 %vm2813_vm11, %v8964_v33  ;;  %4241 = vmatpush.msk.msrb.mxu3 %vm2829_vm15, %v8964_v33  ;;  %v2125_v13 = vadd.f32 %v2124_v53, %v1932_v7  ;;  %vm9546_vm7 = vcmp.eq.s32.totalorder %v9545_v2, 2  ;;  %vm9547_vm2 = vcmp.eq.s32.totalorder %v9289_v48, 0  ;;  %vm9550_vm3 = vcmp.eq.s32.totalorder %v9487_v28, 1 }
 0x1fb   : >> { %v2377_v62 = vsel %vm9546_vm7, %v9544_v31, 0.0  ;;  %4050 = vmatmul.msk.f32.vlgmr.msra.gmra.mxu0 %vm9547_vm2, %v8964_v33  ;;  %vm9548_vm14 = vmmov %vm9547_vm2  ;;  %v1934_v52 = vsel %vm9550_vm3, %v9549_v59, 0.0  ;;  %v2569_v6 = vadd.f32 %v2568_v41, %v2376_v25  ;;  %vm9551_vm1 = vcmp.eq.s32.totalorder %v9545_v2, 3  ;;  %v9559_v25 = vld [vmem:[#allocation117_spill] sm:$0xff]  ;;  %v9572_v31 = vld [vmem:[#allocation84_spill] sm:$0xff] }
 0x1fc   : >> { %4067 = vmatmul.msk.f32.vlgmr.msra.gmra.mxu1 %vm9548_vm14, %v8964_v33  ;;  %4186 = vmatpush.msk.msrb.mxu0 %vm9551_vm1, %v4104_v60  ;;  %vm9552_vm12 = vcmp.eq.s32.totalorder %v9191_v50, 3  ;;  %v4103_v38 = vsel %vm2814_vm5, 1.0, %v8970_v43  ;;  %v4119_v18 = vsel %vm2830_vm9, 1.0, %v8970_v43  ;;  %v2126_v51 = vadd.f32 %v2125_v13, %v1933_v35  ;;  %v9555_v60 = vld [vmem:[#allocation10_spill] sm:$0xff]  ;;  %vm9557_vm5 = vmmov %vm9547_vm2 }
 0x1fd   : >> { %4203 = vmatpush.msk.msrb.mxu1 %vm9552_vm12, %v4120_v46  ;;  %vm9554_vm7 = vcmp.eq.s32.totalorder %v9539_v57, 2  ;;  %4225 = vmatpush.msk.msrb.mxu2 %vm2812_vm0, %v8964_v33  ;;  %vm9556_vm12 = vcmp.eq.s32.totalorder %v9482_v20, 1  ;;  %v2570_v46 = vadd.f32 %v2569_v6, %v2377_v62  ;;  %vm9558_vm9 = vmmov %vm9547_vm2  ;;  %v4102_v19 = vsel %vm2813_vm11, 1.0, %v8970_v43  ;;  %v9567_v13 = vld [vmem:[#allocation94_spill] sm:$0xff]  ;;  %v9574_v6 = vld [vmem:[#allocation73_spill] sm:$0xff] }
 0x1fe   : >> { %v2378_v7 = vsel %vm9554_vm7, %v9553_v54, 0.0  ;;  %4242 = vmatpush.msk.msrb.mxu3 %vm2828_vm8, %v8964_v33  ;;  %v1935_v3 = vsel %vm9556_vm12, %v9555_v60, 0.0  ;;  %4226 = vmatmul.msk.f32.vlgmr.msrb.gmra.mxu2 %vm9557_vm5, %v8964_v33  ;;  %v4118_v53 = vsel %vm2829_vm15, 1.0, %v8970_v43  ;;  %v2127_v5 = vadd.f32 %v2126_v51, %v1934_v52  ;;  %vm9571_vm12 = vmmov %vm9557_vm5  ;;  %v9576_v54 = vld [vmem:[#allocation62_spill] sm:$0xff]  ;;  %v9578_v60 = vld [vmem:[#allocation51_spill] sm:$0xff] }
 0x1ff   : >> { %4243 = vmatmul.msk.f32.vlgmr.msrb.gmra.mxu3 %vm9558_vm9, %v8964_v33  ;;  %vm9560_vm2 = vcmp.eq.s32.totalorder %v9528_v17, 2  ;;  %vm9561_vm14 = vcmp.eq.s32.totalorder %v9533_v23, 3  ;;  %vm9562_vm3 = vcmp.eq.s32.totalorder %v9177_v63, 3  ;;  %v2571_v29 = vadd.f32 %v2570_v46, %v2378_v7  ;;  %v3781_v46 = vld [vmem:[%s4749_s29 + $0x8] sm:$0x1] }
 0x200   : >> { %v2379_v58 = vsel %vm9560_vm2, %v9559_v25, 0.0  ;;  %4187 = vmatpush.msk.msrb.mxu0 %vm9561_vm14, %v4103_v38  ;;  %4204 = vmatpush.msk.msrb.mxu1 %vm9562_vm3, %v4119_v18  ;;  %v4101_v9 = vsel %vm2812_vm0, 1.0, %v8970_v43  ;;  %v4117_v49 = vsel %vm2828_vm8, 1.0, %v8970_v43  ;;  %v2128_v47 = vadd.f32 %v2127_v5, %v1935_v3  ;;  %v9580_v25 = vld [vmem:[#allocation39_spill] sm:$0xff] }
 0x201   : >> { %vm9564_vm11 = vcmp.eq.s32.totalorder %v9524_v4, 2  ;;  %vm9565_vm15 = vcmp.eq.s32.totalorder %v6162_v1, 3  ;;  %vm9566_vm1 = vcmp.eq.s32.totalorder %v6201_v44, 3  ;;  %v2572_v35 = vadd.f32 %v2571_v29, %v2379_v58 }
 0x202   : >> { %v2380_v42 = vsel %vm9564_vm11, %v9563_v24, 0.0  ;;  %4188 = vmatpush.msk.msrb.mxu0 %vm9565_vm15, %v4102_v19  ;;  %4205 = vmatpush.msk.msrb.mxu1 %vm9566_vm1, %v4118_v53  ;;  %v2129_v41 = vrot.slane %v2128_v47, 4  ;;  %vm9568_vm0 = vcmp.eq.s32.totalorder %v9518_v32, 2  ;;  %vm9569_vm7 = vcmp.eq.s32.totalorder %v6242_v30, 3  ;;  %v9582_v24 = vld [vmem:[#allocation27_spill] sm:$0xff] }
 0x203   : >> { %v2381_v14 = vsel %vm9568_vm0, %v9567_v13, 0.0  ;;  %vm9570_vm8 = vcmp.eq.s32.totalorder %v9237_v61, 3  ;;  %v2573_v43 = vadd.f32 %v2572_v35, %v2380_v42  ;;  %vm9573_vm9 = vcmp.eq.s32.totalorder %v9346_v10, 2  ;;  %v9584_v13 = vld [vmem:[#allocation16_spill] sm:$0xff] }
 0x204   : >> { %4189 = vmatpush.msk.msrb.mxu0 %vm9569_vm7, %v4101_v9  ;;  %4206 = vmatpush.msk.msrb.mxu1 %vm9570_vm8, %v4117_v49  ;;  %v2130_v55 = vadd.f32 %v2129_v41, %v2128_v47  ;;  %v2382_v62 = vsel %vm9573_vm9, %v9572_v31, 0.0  ;;  %vm9575_vm2 = vcmp.eq.s32.totalorder %v9343_v39, 2  ;;  %vm9577_vm14 = vcmp.eq.s32.totalorder %v9336_v21, 2  ;;  %v3785_v9 = vld [vmem:[%s4749_s29 + $0x48] sm:$0xff]  ;;  %v9586_v31 = vld [vmem:[#allocation6_spill] sm:$0xff] }
 0x205   : >> { %4190 = vmatmul.msk.f32.vlgmr.msrb.gmra.mxu0 %vm9571_vm12, %v8964_v33  ;;  %4207 = vmatmul.msk.f32.vlgmr.msrb.gmra.mxu1 %vm9557_vm5, %v8964_v33  ;;  %v2574_v59 = vadd.f32 %v2573_v43, %v2381_v14  ;;  %v2383_v38 = vsel %vm9575_vm2, %v9574_v6, 0.0  ;;  %v2384_v7 = vsel %vm9577_vm14, %v9576_v54, 0.0  ;;  %vm9579_vm3 = vcmp.eq.s32.totalorder %v9332_v37, 2  ;;  %v9588_v6 = vld [vmem:[#allocation175_spill] sm:$0xff] }
 0x206   : >> { %v2131_v52 = vrot.slane %v2130_v55, 2  ;;  %v2385_v3 = vsel %vm9579_vm3, %v9578_v60, 0.0  ;;  %vm9581_vm11 = vcmp.eq.s32.totalorder %v9330_v8, 2  ;;  %vm9583_vm15 = vcmp.eq.s32.totalorder %v9124_v45, 2 }
 0x207   : >> { %v2575_v18 = vadd.f32 %v2574_v59, %v2382_v62  ;;  %v2386_v58 = vsel %vm9581_vm11, %v9580_v25, 0.0  ;;  %v2387_v42 = vsel %vm9583_vm15, %v9582_v24, 0.0  ;;  %vm9585_vm1 = vcmp.eq.s32.totalorder %v9322_v16, 2  ;;  %v9596_v25 = vld [vmem:[#allocation156_spill] sm:$0xff] }
 0x208   : >> { %v2132_v51 = vadd.f32 %v2131_v52, %v2130_v55  ;;  %v2197_v53 = vpop.f32.mrf.mxu2  ;;  %v2388_v14 = vsel %vm9585_vm1, %v9584_v13, 0.0  ;;  %vm9587_vm0 = vcmp.eq.s32.totalorder %v9314_v36, 2  ;;  %vm9589_vm7 = vcmp.eq.s32.totalorder %v9237_v61, 2 }
 0x209   : >> { %v2576_v33 = vadd.f32 %v2575_v18, %v2383_v38  ;;  %v2389_v62 = vsel %vm9587_vm0, %v9586_v31, 0.0  ;;  %v2390_v38 = vsel %vm9589_vm7, %v9588_v6, 0.0  ;;  %vm9591_vm8 = vcmp.eq.s32.totalorder %v6201_v44, 2  ;;  %v9610_v6 = vld [vmem:[#allocation119_spill] sm:$0xff] }
 0x20a   : >> { %v2133_v48 = vrot.slane %v2132_v51, 1  ;;  %v2217_v49 = vpop.f32.mrf.mxu3  ;;  %vm9593_vm12 = vcmp.eq.s32.totalorder %v6162_v1, 3  ;;  %vm9595_vm5 = vcmp.eq.s32.totalorder %v6242_v30, 3  ;;  %vm9597_vm9 = vcmp.eq.s32.totalorder %v9177_v63, 2  ;;  %v9600_v1 = vld [vmem:[#allocation145_spill] sm:$0xff] }
 0x20b   : >> { %v2577_v19 = vadd.f32 %v2576_v33, %v2384_v7  ;;  %v2218_v35 = vadd.f32 %v2217_v49, %v2197_v53  ;;  %v9590_v7 = vld [vmem:[#allocation165_spill] sm:$0xff]  ;;  %vm9599_vm2 = vcmp.eq.s32.totalorder %v9533_v23, 3  ;;  %vm9601_vm14 = vcmp.eq.s32.totalorder %v9191_v50, 2 }
 0x20c   : >> { %v2134_v5 = vadd.f32 %v2133_v48, %v2132_v51  ;;  %v3681_v51 = vld [vmem:[%s4749_s29 + $0x80] sm:$0xff]  ;;  %v2391_v33 = vsel %vm9591_vm8, %v9590_v7, 0.0  ;;  %v9592_v48 = vld [vmem:[#allocation162_spill] sm:$0xff]  ;;  %v9602_v30 = vld [vmem:[#allocation141_spill] sm:$0xff]  ;;  %vm9603_vm3 = vcmp.eq.s32.totalorder %v9545_v2, 3  ;;  %vm9605_vm11 = vcmp.eq.s32.totalorder %v9199_v34, 2 }
 0x20d   : >> { %v2578_v29 = vadd.f32 %v2577_v19, %v2385_v3  ;;  %v2220_v43 = vadd.f32 %v3785_v9, %v2218_v35  ;;  %v1815_v52 = vpop.f32.mrf.mxu0  ;;  %v2845_v60 = vsel %vm9593_vm12, %v9592_v48, 0.0  ;;  %v9594_v3 = vld [vmem:[#allocation170_spill] sm:$0xff]  ;;  %v2847_v35 = vsel %vm9603_vm3, %v9602_v30, 0.0  ;;  %v9606_v23 = vld [vmem:[#allocation129_spill] sm:$0xff]  ;;  %v9614_v7 = vld [vmem:[#allocation107_spill] sm:$0xff] }
 0x20e   : >> { %v2135_v47 = vadd.f32 %v3781_v46, %v2134_v5  ;;  %v2844_v46 = vsel %vm9595_vm5, %v9594_v3, 0.0  ;;  %vm9607_vm15 = vcmp.eq.s32.totalorder %v9539_v57, 3  ;;  %vm9609_vm1 = vcmp.eq.s32.totalorder %v9363_v26, 2  ;;  %v9616_v48 = vld [vmem:[#allocation101_spill] sm:$0xff]  ;;  %v9667_v26 = vld [vmem:[#allocation80_spill] sm:$0xff] }
 0x20f   : >> { %v2579_v41 = vadd.f32 %v2578_v29, %v2386_v58  ;;  %3820 = vst [vmem:[%s4749_s29 + $0x48] sm:$0xff] %v2220_v43  ;;  %v3038_v5 = vadd.f32 %v2845_v60, %v2844_v46  ;;  %v2392_v58 = vsel %vm9597_vm9, %v9596_v25, 0.0  ;;  %v9598_v29 = vld [vmem:[#allocation151_spill] sm:$0xff]  ;;  %vm9611_vm0 = vcmp.eq.s32.totalorder %v9528_v17, 3  ;;  %v9628_v30 = vld [vmem:[#allocation57_spill] sm:$0xff] }
 0x210   : >> { %3782 = vst [vmem:[%s4749_s29 + $0x8] sm:$0x1] %v2135_v47  ;;  %v2846_v9 = vsel %vm9599_vm2, %v9598_v29, 0.0  ;;  %v2849_v2 = vsel %vm9611_vm0, %v9610_v6, 0.0  ;;  %vm9613_vm7 = vcmp.eq.s32.totalorder %v9359_v11, 2  ;;  %vm9615_vm8 = vcmp.eq.s32.totalorder %v9524_v4, 3 }
 0x211   : >> { %v2580_v55 = vadd.f32 %v2579_v41, %v2387_v42  ;;  %v3039_v24 = vadd.f32 %v3038_v5, %v2846_v9  ;;  %v2393_v42 = vsel %vm9601_vm14, %v9600_v1, 0.0  ;;  %v2850_v57 = vsel %vm9615_vm8, %v9614_v7, 0.0  ;;  %v9638_v6 = vld [vmem:[#allocation52_spill] sm:$0xff] }
 0x212   : >> { %vm9617_vm12 = vcmp.eq.s32.totalorder %v9354_v12, 2  ;;  %vm9619_vm5 = vcmp.eq.s32.totalorder %v9512_v27, 2  ;;  %vm9621_vm9 = vcmp.eq.s32.totalorder %v9518_v32, 3  ;;  %vm9623_vm2 = vcmp.eq.s32.totalorder %v9174_v40, 2 }
 0x213   : >> { %v2581_v59 = vadd.f32 %v2580_v55, %v2388_v14  ;;  %v1835_v54 = vpop.f32.mrf.mxu1  ;;  %v3040_v13 = vadd.f32 %v3039_v24, %v2847_v35  ;;  %v9604_v14 = vld [vmem:[#allocation134_spill] sm:$0xff]  ;;  %v2848_v55 = vsel %vm9607_vm15, %v9606_v23, 0.0  ;;  %v2397_v60 = vsel %vm9617_vm12, %v9616_v48, 0.0 }
 0x214   : >> { %v1836_v19 = vadd.f32 %v1835_v54, %v1815_v52  ;;  %v2394_v43 = vsel %vm9605_vm11, %v9604_v14, 0.0  ;;  %vm9625_vm14 = vcmp.eq.s32.totalorder %v9505_v22, 2  ;;  %v9626_v24 = vld [vmem:[#allocation86_spill] sm:$0xff]  ;;  %vm9627_vm3 = vcmp.eq.s32.totalorder %v9346_v10, 3 }
 0x215   : >> { %v2582_v18 = vadd.f32 %v2581_v59, %v2389_v62  ;;  %v3041_v62 = vadd.f32 %v3040_v13, %v2848_v55  ;;  %v9608_v59 = vld [vmem:[#allocation122_spill] sm:$0xff]  ;;  %v2852_v1 = vsel %vm9627_vm3, %v9626_v24, 0.0  ;;  %vm9629_vm11 = vcmp.eq.s32.totalorder %v9501_v0, 2  ;;  %v9634_v55 = vld [vmem:[#allocation64_spill] sm:$0xff] }
 0x216   : >> { %v1838_v49 = vadd.f32 %v3681_v51, %v1836_v19  ;;  %v2395_v52 = vsel %vm9609_vm1, %v9608_v59, 0.0  ;;  %v9612_v51 = vld [vmem:[#allocation112_spill] sm:$0xff]  ;;  %v9618_v19 = vld [vmem:[#allocation90_spill] sm:$0xff]  ;;  %v2401_v32 = vsel %vm9629_vm11, %v9628_v30, 0.0  ;;  %vm9631_vm15 = vcmp.eq.s32.totalorder %v9343_v39, 3  ;;  %v9636_v59 = vld [vmem:[#allocation33_spill] sm:$0xff] }
 0x217   : >> { %v2583_v53 = vadd.f32 %v2582_v18, %v2390_v38  ;;  %v3042_v18 = vadd.f32 %v3041_v62, %v2849_v2  ;;  %v2396_v54 = vsel %vm9613_vm7, %v9612_v51, 0.0  ;;  %v2398_v17 = vsel %vm9619_vm5, %v9618_v19, 0.0  ;;  %v9630_v35 = vld [vmem:[#allocation74_spill] sm:$0xff]  ;;  %v9648_v19 = vld [vmem:[#allocation17_spill] sm:$0xff]  ;;  %v9654_v30 = vld [vmem:[#allocation167_spill] sm:$0xff] }
 0x218   : >> { %3716 = vst [vmem:[%s4749_s29 + $0x80] sm:$0xff] %v1838_v49  ;;  %v9624_v49 = vld [vmem:[#allocation67_spill] sm:$0xff]  ;;  %vm9633_vm1 = vcmp.eq.s32.totalorder %v9497_v15, 2  ;;  %vm9635_vm0 = vcmp.eq.s32.totalorder %v9336_v21, 3  ;;  %vm9637_vm7 = vcmp.eq.s32.totalorder %v9492_v56, 2  ;;  %vm9639_vm8 = vcmp.eq.s32.totalorder %v9332_v37, 3 }
 0x219   : >> { %v2584_v47 = vadd.f32 %v2583_v53, %v2391_v33  ;;  %v3043_v46 = vadd.f32 %v3042_v18, %v2850_v57  ;;  %v9620_v53 = vld [vmem:[#allocation96_spill] sm:$0xff]  ;;  %v2854_v10 = vsel %vm9635_vm0, %v9634_v55, 0.0  ;;  %v2855_v39 = vsel %vm9639_vm8, %v9638_v6, 0.0  ;;  %v9640_v18 = vld [vmem:[#allocation21_spill] sm:$0xff] }
 0x21a   : >> { %v2851_v5 = vsel %vm9621_vm9, %v9620_v53, 0.0  ;;  %vm9641_vm12 = vcmp.eq.s32.totalorder %v9487_v28, 2  ;;  %vm9643_vm5 = vcmp.eq.s32.totalorder %v9330_v8, 3  ;;  %vm9645_vm9 = vcmp.eq.s32.totalorder %v9482_v20, 2  ;;  %v3957_v6 = vld [vmem:[%s4749_s29 + $0x10] sm:$0x1] }
 0x21b   : >> { %v2585_v41 = vadd.f32 %v2584_v47, %v2392_v58  ;;  %v9622_v58 = vld [vmem:[#allocation79_spill] sm:$0xff]  ;;  %v3044_v9 = vadd.f32 %v3043_v46, %v2851_v5  ;;  %v2400_v47 = vsel %vm9625_vm14, %v9624_v49, 0.0  ;;  %v2404_v51 = vsel %vm9641_vm12, %v9640_v18, 0.0  ;;  %v9652_v49 = vld [vmem:[#allocation176_spill] sm:$0xff] }
 0x21c   : >> { %v2399_v4 = vsel %vm9623_vm2, %v9622_v58, 0.0  ;;  %vm9647_vm2 = vcmp.eq.s32.totalorder %v9124_v45, 3  ;;  %vm9649_vm14 = vcmp.eq.s32.totalorder %v9322_v16, 3  ;;  %v9650_v5 = vld [vmem:[#allocation7_spill] sm:$0xff]  ;;  %vm9651_vm3 = vcmp.eq.s32.totalorder %v9314_v36, 3  ;;  %v3857_v45 = vld [vmem:[%s4749_s29 + $0x88] sm:$0xff] }
 0x21d   : >> { %v2586_v31 = vadd.f32 %v2585_v41, %v2393_v42  ;;  %v2853_v41 = vsel %vm9631_vm15, %v9630_v35, 0.0  ;;  %v3045_v14 = vadd.f32 %v3044_v9, %v2852_v1  ;;  %vm9653_vm11 = vcmp.eq.s32.totalorder %v9237_v61, 3  ;;  %v9662_v18 = vld [vmem:[#allocation124_spill] sm:$0xff] }
 0x21e   : >> { %vm9655_vm15 = vcmp.eq.s32.totalorder %v6201_v44, 3  ;;  %vm9659_vm0 = vcmp.eq.s32.totalorder %v9191_v50, 3  ;;  %vm9666_vm8 = vcmp.eq.s32.totalorder %v9512_v27, 3  ;;  %vm9675_vm12 = vcmp.eq.s32.totalorder %v9492_v56, 3 }
 0x21f   : >> { %v2587_v38 = vadd.f32 %v2586_v31, %v2394_v43  ;;  %v9632_v43 = vld [vmem:[#allocation46_spill] sm:$0xff]  ;;  %v3046_v62 = vadd.f32 %v3045_v14, %v2853_v41  ;;  %v2861_v36 = vsel %vm9655_vm15, %v9654_v30, 0.0 }
 0x220   : >> { %v2402_v23 = vsel %vm9633_vm1, %v9632_v43, 0.0  ;;  %vm9657_vm1 = vcmp.eq.s32.totalorder %v9177_v63, 3 }
 0x221   : >> { %v2588_v33 = vadd.f32 %v2587_v38, %v2395_v52  ;;  %v2403_v52 = vsel %vm9637_vm7, %v9636_v59, 0.0  ;;  %v3047_v38 = vadd.f32 %v3046_v62, %v2854_v10  ;;  %v9658_v62 = vld [vmem:[#allocation147_spill] sm:$0xff]  ;;  %vm9661_vm7 = vcmp.eq.s32.totalorder %v9199_v34, 3 }
 0x222   : >> { %v2863_v44 = vsel %vm9659_vm0, %v9658_v62, 0.0 }
 0x223   : >> { %v2589_v3 = vadd.f32 %v2588_v33, %v2396_v54  ;;  %v9642_v54 = vld [vmem:[#allocation42_spill] sm:$0xff]  ;;  %v3048_v57 = vadd.f32 %v3047_v38, %v2855_v39  ;;  %v9644_v33 = vld [vmem:[#allocation11_spill] sm:$0xff] }
 0x224   : >> { %v2856_v21 = vsel %vm9643_vm5, %v9642_v54, 0.0  ;;  %v2405_v48 = vsel %vm9645_vm9, %v9644_v33, 0.0  ;;  %v9660_v39 = vld [vmem:[#allocation135_spill] sm:$0xff]  ;;  %v9664_v33 = vld [vmem:[#allocation102_spill] sm:$0xff]  ;;  %vm9677_vm5 = vcmp.eq.s32.totalorder %v9487_v28, 3  ;;  %v3961_v28 = vld [vmem:[%s4749_s29 + $0x50] sm:$0xff] }
 0x225   : >> { %v2590_v25 = vadd.f32 %v2589_v3, %v2397_v60  ;;  %v9646_v60 = vld [vmem:[#allocation28_spill] sm:$0xff]  ;;  %v3049_v46 = vadd.f32 %v3048_v57, %v2856_v21 }
 0x226   : >> { %v2857_v37 = vsel %vm9647_vm2, %v9646_v60, 0.0  ;;  %v9665_v60 = vld [vmem:[#allocation92_spill] sm:$0xff] }
 0x227   : >> { %v2591_v29 = vadd.f32 %v2590_v25, %v2398_v17  ;;  %v2858_v17 = vsel %vm9649_vm14, %v9648_v19, 0.0  ;;  %v3050_v53 = vadd.f32 %v3049_v46, %v2857_v37  ;;  %v2859_v25 = vsel %vm9651_vm3, %v9650_v5, 0.0 }
 0x228   : >> { %v2868_v37 = vsel %vm9666_vm8, %v9665_v60, 0.0 }
 0x229   : >> { %v2592_v42 = vadd.f32 %v2591_v29, %v2399_v4  ;;  %v3051_v29 = vadd.f32 %v3050_v53, %v2858_v17  ;;  %v9669_v17 = vld [vmem:[#allocation69_spill] sm:$0xff]  ;;  %v9671_v53 = vld [vmem:[#allocation59_spill] sm:$0xff] }
 0x22a   : >> { %v2871_v12 = vsel %vm2807_vm10, %v9671_v53, 0.0  ;;  %vm9679_vm10 = vcmp.eq.s32.totalorder %v9482_v20, 3 }
 0x22b   : >> { %v2593_v13 = vadd.f32 %v2592_v42, %v2400_v47  ;;  %v2860_v47 = vsel %vm9653_vm11, %v9652_v49, 0.0  ;;  %v3052_v42 = vadd.f32 %v3051_v29, %v2859_v25  ;;  %v9672_v25 = vld [vmem:[#allocation47_spill] sm:$0xff]  ;;  %v9678_v49 = vld [vmem:[#allocation13_spill] sm:$0xff] }
 0x22c   : >> { %v2875_v0 = vsel %vm9679_vm10, %v9678_v49, 0.0 }
 0x22d   : >> { %v2594_v31 = vadd.f32 %v2593_v13, %v2401_v32  ;;  %v3821_v32 = vld [vmem:[%s4749_s29 + $0x68] sm:$0xff]  ;;  %v3053_v14 = vadd.f32 %v3052_v42, %v2860_v47 }
 0x22f   : >> { %v2595_v2 = vadd.f32 %v2594_v31, %v2402_v23  ;;  %v9656_v23 = vld [vmem:[#allocation157_spill] sm:$0xff]  ;;  %v3054_v10 = vadd.f32 %v3053_v14, %v2861_v36 }
 0x230   : >> { %v2862_v61 = vsel %vm9657_vm1, %v9656_v23, 0.0  ;;  %v4133_v23 = vld [vmem:[%s4749_s29 + $0x18] sm:$0x1] }
 0x231   : >> { %v2596_v7 = vadd.f32 %v2595_v2, %v2403_v52  ;;  %v3055_v52 = vadd.f32 %v3054_v10, %v2862_v61  ;;  %v2864_v2 = vsel %vm9661_vm7, %v9660_v39, 0.0 }
 0x233   : >> { %v2597_v3 = vadd.f32 %v2596_v7, %v2404_v51  ;;  %v3056_v63 = vadd.f32 %v3055_v52, %v2863_v44  ;;  %v2865_v51 = vsel %vm2801_vm13, %v9662_v18, 0.0  ;;  %v9663_v7 = vld [vmem:[#allocation114_spill] sm:$0xff]  ;;  %vm9668_vm13 = vcmp.eq.s32.totalorder %v9174_v40, 3  ;;  %v9674_v40 = vld [vmem:[#allocation36_spill] sm:$0xff] }
 0x234   : >> { %v2305_v58 = vpop.f32.mrf.mxu3  ;;  %v2866_v50 = vsel %vm2802_vm4, %v9663_v7, 0.0  ;;  %v2869_v46 = vsel %vm9668_vm13, %v9667_v26, 0.0  ;;  %vm9670_vm4 = vcmp.eq.s32.totalorder %v9505_v22, 3  ;;  %v9676_v22 = vld [vmem:[#allocation24_spill] sm:$0xff]  ;;  %v4173_v18 = vld [vmem:[%s4749_s29 + $0x78] sm:$0xff] }
 0x235   : >> { %v2598_v8 = vadd.f32 %v2597_v3, %v2405_v48  ;;  %v2285_v9 = vpop.f32.mrf.mxu2  ;;  %v2241_v24 = vpop.f32.mrf.mxu0  ;;  %v3057_v21 = vadd.f32 %v3056_v63, %v2864_v2  ;;  %v2867_v48 = vsel %vm2803_vm6, %v9664_v33, 0.0  ;;  %v2870_v11 = vsel %vm9670_vm4, %v9669_v17, 0.0  ;;  %v4209_v7 = vld [vmem:[%s4749_s29 + $0x98] sm:$0xff] }
 0x236   : >> { %v2306_v16 = vadd.f32 %v2305_v58, %v2285_v9  ;;  %v2261_v35 = vpop.f32.mrf.mxu1  ;;  %vm9673_vm6 = vcmp.eq.s32.totalorder %v9497_v15, 3  ;;  %v2874_v9 = vsel %vm9677_vm5, %v9676_v22, 0.0 }
 0x237   : >> { %v2599_v4 = vrot.slane %v2598_v8, 4  ;;  %v2262_v43 = vadd.f32 %v2261_v35, %v2241_v24  ;;  %v3058_v57 = vadd.f32 %v3057_v21, %v2865_v51  ;;  %v2872_v27 = vsel %vm9673_vm6, %v9672_v25, 0.0 }
 0x238   : >> { %v2308_v41 = vadd.f32 %v3857_v45, %v2306_v16 }
 0x239   : >> { %v2600_v1 = vadd.f32 %v2599_v4, %v2598_v8  ;;  %v2264_v31 = vadd.f32 %v3821_v32, %v2262_v43  ;;  %v3059_v34 = vadd.f32 %v3058_v57, %v2866_v50  ;;  %v2873_v4 = vsel %vm9675_vm12, %v9674_v40, 0.0 }
 0x23a   : >> { %3892 = vst [vmem:[%s4749_s29 + $0x88] sm:$0xff] %v2308_v41 }
 0x23b   : >> { %v2601_v13 = vrot.slane %v2600_v1, 2  ;;  %3856 = vst [vmem:[%s4749_s29 + $0x68] sm:$0xff] %v2264_v31  ;;  %v3060_v3 = vadd.f32 %v3059_v34, %v2867_v48  ;;  %v4137_v31 = vld [vmem:[%s4749_s29 + $0x58] sm:$0xff] }
 0x23d   : >> { %v2602_v55 = vadd.f32 %v2601_v13, %v2600_v1  ;;  %v3061_v19 = vadd.f32 %v3060_v3, %v2868_v37  ;;  %v3997_v1 = vld [vmem:[%s4749_s29 + $0x70] sm:$0xff] }
 0x23f   : >> { %v2603_v59 = vrot.slane %v2602_v55, 1  ;;  %v3062_v8 = vadd.f32 %v3061_v19, %v2869_v46 }
 0x241   : >> { %v2604_v38 = vadd.f32 %v2603_v59, %v2602_v55  ;;  %v3063_v5 = vadd.f32 %v3062_v8, %v2870_v11  ;;  %v4033_v59 = vld [vmem:[%s4749_s29 + $0x90] sm:$0xff] }
 0x243   : >> { %v2605_v54 = vadd.f32 %v3957_v6, %v2604_v38  ;;  %v3064_v58 = vadd.f32 %v3063_v5, %v2871_v12 }
 0x245   : >> { %3958 = vst [vmem:[%s4749_s29 + $0x10] sm:$0x1] %v2605_v54  ;;  %v3065_v29 = vadd.f32 %v3064_v58, %v2872_v27 }
 0x247   : >> { %v3066_v45 = vadd.f32 %v3065_v29, %v2873_v4 }
 0x249   : >> { %v3067_v47 = vadd.f32 %v3066_v45, %v2874_v9 }
 0x24b   : >> { %v3068_v15 = vadd.f32 %v3067_v47, %v2875_v0 }
 0x24d   : >> { %v3069_v24 = vrot.slane %v3068_v15, 4 }
 0x24f   : >> { %v3070_v36 = vadd.f32 %v3069_v24, %v3068_v15 }
 0x251   : >> { %v3071_v41 = vrot.slane %v3070_v36, 2 }
 0x253   : >> { %v3072_v14 = vadd.f32 %v3071_v41, %v3070_v36 }
 0x255   : >> { %v3073_v43 = vrot.slane %v3072_v14, 1 }
 0x257   : >> { %v3074_v61 = vadd.f32 %v3073_v43, %v3072_v14 }
 0x259   : >> { %v3075_v55 = vadd.f32 %v4133_v23, %v3074_v61 }
 0x25a   : >> { %v2711_v16 = vpop.f32.mrf.mxu2 }
 0x25b   : >> { %v2731_v56 = vpop.f32.mrf.mxu3  ;;  %v2667_v42 = vpop.f32.mrf.mxu0  ;;  %4134 = vst [vmem:[%s4749_s29 + $0x18] sm:$0x1] %v3075_v55 }
 0x25c   : >> { %v2732_v30 = vadd.f32 %v2731_v56, %v2711_v16  ;;  %v2687_v32 = vpop.f32.mrf.mxu1 }
 0x25d   : >> { %v2688_v35 = vadd.f32 %v2687_v32, %v2667_v42 }
 0x25e   : >> { %v2734_v20 = vadd.f32 %v3997_v1, %v2732_v30 }
 0x25f   : >> { %v2690_v13 = vadd.f32 %v3961_v28, %v2688_v35 }
 0x260   : >> { %4032 = vst [vmem:[%s4749_s29 + $0x70] sm:$0xff] %v2734_v20 }
 0x261   : >> { %3996 = vst [vmem:[%s4749_s29 + $0x50] sm:$0xff] %v2690_v13 }
 0x276   : >> { %v3137_v10 = vpop.f32.mrf.mxu2 }
 0x277   : >> { %v3157_v62 = vpop.f32.mrf.mxu3 }
 0x278   : >> { %v2755_v44 = vpop.f32.mrf.mxu0  ;;  %v3158_v6 = vadd.f32 %v3157_v62, %v3137_v10 }
 0x279   : >> { %v2775_v52 = vpop.f32.mrf.mxu1 }
 0x27a   : >> { %v2776_v39 = vadd.f32 %v2775_v52, %v2755_v44  ;;  %v3160_v2 = vadd.f32 %v4137_v31, %v3158_v6 }
 0x27c   : >> { %v2778_v38 = vadd.f32 %v4033_v59, %v2776_v39  ;;  %4172 = vst [vmem:[%s4749_s29 + $0x58] sm:$0xff] %v3160_v2 }
 0x27e   : >> { %4068 = vst [vmem:[%s4749_s29 + $0x90] sm:$0xff] %v2778_v38 }
 0x281   : >> { %v3225_v21 = vpop.f32.mrf.mxu2 }
 0x282   : >> { %v3181_v63 = vpop.f32.mrf.mxu0  ;;  %v3201_v51 = vpop.f32.mrf.mxu1 }
 0x283   : >> { %v3202_v54 = vadd.f32 %v3201_v51, %v3181_v63  ;;  %v3245_v50 = vpop.f32.mrf.mxu3 }
 0x284   : >> { %v3246_v57 = vadd.f32 %v3245_v50, %v3225_v21  ;;  %559 = sbr.rel (!%p557_p9) target bundleno = 123 (0x7b), region = 183 }
 0x285   : >> { %v3204_v33 = vadd.f32 %v4173_v18, %v3202_v54 }
 0x286   : >> { %v3248_v48 = vadd.f32 %v4209_v7, %v3246_v57 }
 0x287   : >> { %4208 = vst [vmem:[%s4749_s29 + $0x78] sm:$0xff] %v3204_v33 }
 0x288   : >> { %4244 = vst [vmem:[%s4749_s29 + $0x98] sm:$0xff] %v3248_v48 }
 0x289 PF: > { %s12_s15 = sadd.s32 1, %s4475_s15   ;;  %s9680_s9 = smov %s4455_s10 }
 0x28a   : > { %p9_p10 = scmp.ge.s32.totalorder %s12_s15, 6   ;;  %s9681_s10 = smov %s4585_s24 }
 0x28b   : > { %s9682_s11 = smov %s4467_s13  ;;  %s9683_s12 = smov %s4471_s14 }
 0x28c   : > { %s9684_s13 = smov %s9687_s16  ;;  %s9685_s14 = smov %s9691_s17 }
 0x28d   :  { %11 = sbr.rel (!%p9_p10) target bundleno = 4 (0x4), region = 194 }

</bundles_post_ra>
